<compile_context>
chip_gen: v5e
topology: v5e:2x2
jax: 0.10.0
libtpu: 0.0.40
codegen_flags: <defaults>
</compile_context>

<pallas_src>
import jax
import jax.numpy as jnp
from jax.experimental import pallas as pl
from jax.experimental.pallas import tpu as pltpu

K_HOPS = 2          # SGConv K
BN_EPS = 1e-5


# ----------------------------------------------------------------------------------
# Pallas kernel: the entire forward pass on-chip, one invocation, MXU-centric.
# Data layout: rows = B * n_chans (= 16), lanes = (conv_channel, time/hidden) segments.
# ----------------------------------------------------------------------------------
def shallow_sgcn_kernel(xb_ref, toep_ref, seg1_ref, pbd_ref, sege_ref, segr_ref,
                        wlbd_ref, abig_ref, blin_ref, segrh_ref, pp_ref,
                        wbig_ref, mask_ref, rsum_ref, sego_ref, bfc_ref, out_ref):
    f32 = jnp.float32
    bf16 = jnp.bfloat16

    rows = xb_ref.shape[0]                 # B * n_chans
    KC = seg1_ref.shape[1]                 # num_kernels
    T1 = seg1_ref.shape[0] // KC           # conv output length
    H = segrh_ref.shape[0] // KC           # num_hidden

    def elu(v):
        # exp only sees non-positive inputs -> no overflow on the unselected branch
        return jnp.where(v > 0.0, v, jnp.exp(jnp.minimum(v, 0.0)) - 1.0)

    def mm(a, b):
        # bf16 operands, f32 accumulate on the MXU
        return jnp.dot(a.astype(bf16), b, preferred_element_type=f32)

    # --- temporal Conv2d(1, KC, (1, KS)) + bias: one MXU dot vs. the Toeplitz operator ---
    h = elu(mm(xb_ref[...], toep_ref[...]))                          # (rows, KC*T1)

    # --- BatchNorm2d #1 (training-mode batch stats, biased var): channel sums on MXU -----
    inv_cnt1 = 1.0 / (rows * T1)
    mean1 = jnp.sum(mm(h, seg1_ref[...]), axis=0, keepdims=True) * inv_cnt1       # (1, KC)
    ex2_1 = jnp.sum(mm(h * h, seg1_ref[...]), axis=0, keepdims=True) * inv_cnt1   # (1, KC)
    var1 = jnp.maximum(ex2_1 - mean1 * mean1, 0.0)
    scale1 = pp_ref[0:1, :] * jax.lax.rsqrt(var1 + BN_EPS)
    shift1 = pp_ref[1:2, :] - mean1 * scale1

    # --- AvgPool2d((1,2)) as one dot; BN affine applied post-pool (exactly commutes) -----
    hp = mm(h, pbd_ref[...])                                         # (rows, KC*T2)
    hp = hp * mm(scale1, sege_ref[...]) + mm(shift1, sege_ref[...])

    # --- F.normalize(p=2, dim=-1) per (sample, channel, node): seg reduce + rsqrt --------
    ssq = mm(hp * hp, segr_ref[...])                                 # (rows, KC)
    hn = hp * mm(jax.lax.rsqrt(jnp.maximum(ssq, 1e-24)), sege_ref[...])

    # --- SGConv: per-channel Linear(T2->H) (block-diag) then A_hat^K propagation, + bias -
    hw = mm(hn, wlbd_ref[...])                                       # (rows, KC*H)
    h2 = jnp.dot(abig_ref[...], hw.astype(bf16), preferred_element_type=f32)
    h2 = elu(h2 + blin_ref[...])

    # --- BatchNorm2d #2 + AvgPool2d((1, H)); affine folded onto the pooled features ------
    inv_cnt2 = 1.0 / (rows * H)
    praw = mm(h2, segrh_ref[...])                                    # (rows, KC): sums over H
    mean2 = jnp.sum(praw, axis=0, keepdims=True) * inv_cnt2
    ex2_2 = jnp.sum(mm(h2 * h2, segrh_ref[...]), axis=0, keepdims=True) * inv_cnt2
    var2 = jnp.maximum(ex2_2 - mean2 * mean2, 0.0)
    scale2 = pp_ref[2:3, :] * jax.lax.rsqrt(var2 + BN_EPS)
    shift2 = pp_ref[3:4, :] - mean2 * scale2
    pooled = praw * (1.0 / H) * scale2 + shift2                      # (rows, KC)

    # TODO(synk): nn.Dropout applied as identity (training-mode stochastic mask not implemented).

    # --- flatten (torch channel-major order) + final Linear via masked select/reduce -----
    full = mm(pooled, wbig_ref[...])                                 # (rows, N*O)
    fc1 = mm(full * mask_ref[...], sego_ref[...])                    # (rows, O)
    out = jnp.dot(rsum_ref[...], fc1.astype(bf16), preferred_element_type=f32)  # (B, O)
    out_ref[...] = (out + bfc_ref[...]).astype(out_ref.dtype)


# ----------------------------------------------------------------------------------
# gcn_norm (dense, PyG semantics: keep existing self-loop weights, fill missing with 1)
# ----------------------------------------------------------------------------------
def gcn_norm_dense(edge_index, edge_weight, num_nodes):
    src, tgt = edge_index[0], edge_index[1]
    W = jnp.zeros((num_nodes, num_nodes), jnp.float32).at[src, tgt].add(edge_weight)
    has_loop = jnp.zeros((num_nodes,), jnp.float32).at[src].add(
        jnp.where(src == tgt, 1.0, 0.0)) > 0
    eye = jnp.eye(num_nodes, dtype=jnp.float32)
    W = W + eye * jnp.where(has_loop, 0.0, 1.0)[None, :]   # add_remaining_self_loops(fill=1)
    deg = W.sum(axis=0)                                    # in-degree (source -> target flow)
    dinv = jnp.where(deg > 0, jax.lax.rsqrt(deg), 0.0)
    # A_hat[t, s] = dinv[t] * W[s, t] * dinv[s];  out[t] = sum_s A_hat[t, s] x[s]
    return dinv[:, None] * W.T * dinv[None, :]


# ----------------------------------------------------------------------------------
# Wrapper: builds the (tiny) constant operators and issues a single pallas_call.
# ----------------------------------------------------------------------------------
@jax.jit
def shallow_sgcn_forward(x, edge_index, params):
    f32, bf16 = jnp.float32, jnp.bfloat16
    B, N, T = x.shape
    KC, KS = params['w_temp'].shape
    T1 = T - KS + 1
    T2 = T1 // 2
    H = params['w_lin'].shape[0]                       # num_hidden (== pool_size by default)
    O = params['w_fc'].shape[0]

    # gcn_norm adjacency and its K-hop power (N x N, computed once outside the kernel)
    A_hat = gcn_norm_dense(edge_index, params['edge_weights'], N)
    A_k = A_hat
    for _ in range(K_HOPS - 1):
        A_k = A_k @ A_hat

    eyeKC = jnp.eye(KC, dtype=f32)

    # Conv2d as a Toeplitz operator, bias folded into an extra all-ones input column
    cols_c = jnp.repeat(jnp.arange(KC), T1)                          # (KC*T1,)
    cols_t = jnp.tile(jnp.arange(T1), KC)                            # (KC*T1,)
    s = jnp.arange(T)[:, None] - cols_t[None, :]                     # (T, KC*T1)
    tap = params['w_temp'][cols_c[None, :], jnp.clip(s, 0, KS - 1)]
    toep = jnp.where((s >= 0) & (s < KS), tap, 0.0)
    toep = jnp.concatenate([toep, params['b_temp'][cols_c][None, :]], axis=0)   # (T+1, KC*T1)

    # segment reducers / expander + block-diagonal pool / SGConv-linear operators
    seg1 = jnp.repeat(eyeKC, T1, axis=0)                             # (KC*T1, KC)
    segr = jnp.repeat(eyeKC, T2, axis=0)                             # (KC*T2, KC)
    sege = segr.T                                                    # (KC, KC*T2)
    segrh = jnp.repeat(eyeKC, H, axis=0)                             # (KC*H, KC)
    p2 = 0.5 * (jnp.arange(T1)[:, None] // 2 == jnp.arange(T2)[None, :]).astype(f32)
    pbd = jnp.kron(eyeKC, p2)                                        # (KC*T1, KC*T2)
    wlbd = jnp.kron(eyeKC, params['w_lin'].T)                        # (KC*T2, KC*H)
    abig = jnp.kron(jnp.eye(B, dtype=f32), A_k)                      # (B*N, B*N)
    blin = jnp.tile(params['b_lin'], KC)[None, :]                    # (1, KC*H)

    # packed per-channel BatchNorm parameters: one operand, one DMA
    pp = jnp.stack([params['tbn_gamma'], params['tbn_beta'],
                    params['bn_gamma'], params['bn_beta']], axis=0)  # (4, KC)

    # final Linear permuted for the (b*N+n, c) pooled layout + node-select mask / reducers
    wbig = jnp.transpose(params['w_fc'].reshape(O, KC, N), (1, 2, 0)).reshape(KC, N * O)
    mask = jnp.tile(jnp.repeat(jnp.eye(N, dtype=f32), O, axis=1), (B, 1))    # (B*N, N*O)
    rsum = jnp.repeat(jnp.eye(B, dtype=f32), N, axis=1)                      # (B, B*N)
    sego = jnp.tile(jnp.eye(O, dtype=f32), (N, 1))                           # (N*O, O)
    bfc = params['b_fc'][None, :]                                            # (1, O)

    xb = jnp.concatenate([x.reshape(B * N, T), jnp.ones((B * N, 1), f32)], axis=1)

    operands = [
        xb,                      # (B*N, T+1) f32
        toep.astype(bf16),       # (T+1, KC*T1)
        seg1.astype(bf16),       # (KC*T1, KC)
        pbd.astype(bf16),        # (KC*T1, KC*T2)
        sege.astype(bf16),       # (KC, KC*T2)
        segr.astype(bf16),       # (KC*T2, KC)
        wlbd.astype(bf16),       # (KC*T2, KC*H)
        abig.astype(bf16),       # (B*N, B*N)
        blin,                    # (1, KC*H) f32
        segrh.astype(bf16),      # (KC*H, KC)
        pp,                      # (4, KC) f32
        wbig.astype(bf16),       # (KC, N*O)
        mask,                    # (B*N, N*O) f32
        rsum.astype(bf16),       # (B, B*N)
        sego.astype(bf16),       # (N*O, O)
        bfc,                     # (1, O) f32
    ]

    vmem = pl.BlockSpec(memory_space=pltpu.MemorySpace.VMEM)   # whole-array VMEM blocks
    return pl.pallas_call(
        shallow_sgcn_kernel,
        out_shape=jax.ShapeDtypeStruct((B, O), jnp.float32),
        in_specs=[vmem] * len(operands),
        out_specs=vmem,
    )(*operands)


# ----------------------------------------------------------------------------------
# Pure-JAX reference (independent formulation) for correctness checking.
# ----------------------------------------------------------------------------------
def reference_forward(x, edge_index, params):
    B, N, T = x.shape
    KC, KS = params['w_temp'].shape
    T1 = T - KS + 1
    T2 = T1 // 2

    def elu(v):
        return jnp.where(v > 0, v, jnp.exp(jnp.minimum(v, 0.0)) - 1.0)

    def bn(v, g, b, axes):
        m = v.mean(axes, keepdims=True)
        var = ((v - m) ** 2).mean(axes, keepdims=True)
        return (v - m) / jnp.sqrt(var + BN_EPS) * g + b

    cols = jnp.stack([x[:, :, s:s + T1] for s in range(KS)], axis=-1)        # (B,N,T1,KS)
    h = jnp.einsum('bnts,cs->bcnt', cols, params['w_temp'], precision='highest')
    h = h + params['b_temp'][None, :, None, None]
    h = elu(h)
    h = bn(h, params['tbn_gamma'][None, :, None, None],
           params['tbn_beta'][None, :, None, None], (0, 2, 3))
    h = h.reshape(B, KC, N, T2, 2).mean(-1)                                  # AvgPool2d((1,2))

    h = h / jnp.maximum(jnp.linalg.norm(h, axis=-1, keepdims=True), 1e-12)
    A_hat = gcn_norm_dense(edge_index, params['edge_weights'], N)
    for _ in range(K_HOPS):
        h = jnp.einsum('ij,bcjt->bcit', A_hat, h, precision='highest')
    h = jnp.einsum('bcnt,ht->bcnh', h, params['w_lin'], precision='highest')
    h = h + params['b_lin'][None, None, None, :]
    h = elu(h)
    h = bn(h, params['bn_gamma'][None, :, None, None],
           params['bn_beta'][None, :, None, None], (0, 2, 3))
    h = h.mean(-1)                                                           # AvgPool2d((1,H))
    feat = h.reshape(B, KC * N)
    return jnp.einsum('bf,of->bo', feat, params['w_fc'], precision='highest') + params['b_fc']


if __name__ == "__main__":
    key = jax.random.PRNGKey(0)
    B, N, T = 2, 8, 64            # batch, n_chans, n_times
    KC, KS = 20, 25               # num_kernels, kernel_size
    H = 20                        # num_hidden == pool_size (module defaults)
    O = 3                         # n_outputs
    T1 = T - KS + 1               # 40
    T2 = T1 // 2                  # 20 == gcn_input_dim

    ks = jax.random.split(key, 12)
    params = {
        'w_temp':    0.1 * jax.random.normal(ks[0], (KC, KS), jnp.float32),
        'b_temp':    0.1 * jax.random.normal(ks[1], (KC,), jnp.float32),
        'tbn_gamma': 1.0 + 0.1 * jax.random.normal(ks[2], (KC,), jnp.float32),
        'tbn_beta':  0.1 * jax.random.normal(ks[3], (KC,), jnp.float32),
        'edge_weights': jax.random.uniform(ks[4], (N * N,), jnp.float32, 0.1, 1.0),
        'w_lin':     0.1 * jax.random.normal(ks[5], (H, T2), jnp.float32),
        'b_lin':     0.1 * jax.random.normal(ks[6], (H,), jnp.float32),
        'bn_gamma':  1.0 + 0.1 * jax.random.normal(ks[7], (KC,), jnp.float32),
        'bn_beta':   0.1 * jax.random.normal(ks[8], (KC,), jnp.float32),
        'w_fc':      0.05 * jax.random.normal(ks[9], (O, KC * N), jnp.float32),
        'b_fc':      0.05 * jax.random.normal(ks[10], (O,), jnp.float32),
    }
    x = jax.random.normal(ks[11], (B, N, T), jnp.float32)

    # get_e_index with threshold=0 on a distance matrix => fully connected graph
    ii = jnp.arange(N, dtype=jnp.int32)
    edge_index = jnp.stack([jnp.repeat(ii, N), jnp.tile(ii, N)])             # (2, N*N)

    out = shallow_sgcn_forward(x, edge_index, params)
    out = jax.block_until_ready(out)

    ref = reference_forward(x, edge_index, params)
    assert out.shape == (B, O)
    assert bool(jnp.all(jnp.isfinite(out)))
    assert bool(jnp.allclose(out, ref, atol=2e-2, rtol=2e-2)), \
        f"max abs diff {float(jnp.max(jnp.abs(out - ref)))}"
    print("KERNEL_OK")
</pallas_src>

<mosaic_0001>
module attributes {stable_mosaic.version = 11 : i64} {
  func.func @shallow_sgcn_kernel(%arg0: memref<16x65xf32, #tpu.memory_space<vmem>>, %arg1: memref<65x800xbf16, #tpu.memory_space<vmem>>, %arg2: memref<800x20xbf16, #tpu.memory_space<vmem>>, %arg3: memref<800x400xbf16, #tpu.memory_space<vmem>>, %arg4: memref<20x400xbf16, #tpu.memory_space<vmem>>, %arg5: memref<400x20xbf16, #tpu.memory_space<vmem>>, %arg6: memref<400x400xbf16, #tpu.memory_space<vmem>>, %arg7: memref<16x16xbf16, #tpu.memory_space<vmem>>, %arg8: memref<1x400xf32, #tpu.memory_space<vmem>>, %arg9: memref<400x20xbf16, #tpu.memory_space<vmem>>, %arg10: memref<4x20xf32, #tpu.memory_space<vmem>>, %arg11: memref<20x24xbf16, #tpu.memory_space<vmem>>, %arg12: memref<16x24xf32, #tpu.memory_space<vmem>>, %arg13: memref<2x16xbf16, #tpu.memory_space<vmem>>, %arg14: memref<24x3xbf16, #tpu.memory_space<vmem>>, %arg15: memref<1x3xf32, #tpu.memory_space<vmem>>, %arg16: memref<2x3xf32, #tpu.memory_space<vmem>>) attributes {dimension_semantics = [], scalar_prefetch = 0 : i64, scratch_operands = 0 : i64, tpu.core_type = #tpu.core_type<tc>} {
    %c0 = arith.constant 0 : index
    %c0_0 = arith.constant 0 : index
    %0 = vector.load %arg0[%c0, %c0_0] : memref<16x65xf32, #tpu.memory_space<vmem>>, vector<16x65xf32>
    %c0_1 = arith.constant 0 : index
    %c0_2 = arith.constant 0 : index
    %1 = vector.load %arg1[%c0_1, %c0_2] : memref<65x800xbf16, #tpu.memory_space<vmem>>, vector<65x800xbf16>
    %2 = arith.truncf %0 : vector<16x65xf32> to vector<16x65xbf16>
    %cst = arith.constant dense<0.000000e+00> : vector<16x800xf32>
    %3 = tpu.matmul %2, %1, %cst {dimension_numbers = #tpu.dot_dimension_numbers<[1], [0], [0], [1], [0, 0, 1, 1], [], []>} : vector<16x65xbf16>, vector<65x800xbf16>, vector<16x800xf32> -> vector<16x800xf32>
    %cst_3 = arith.constant 0.000000e+00 : f32
    %4 = vector.broadcast %cst_3 : f32 to vector<16x800xf32>
    %5 = arith.cmpf ogt, %3, %4 : vector<16x800xf32>
    %cst_4 = arith.constant 0.000000e+00 : f32
    %6 = vector.broadcast %cst_4 : f32 to vector<16x800xf32>
    %7 = arith.minimumf %3, %6 : vector<16x800xf32>
    %8 = math.exp %7 : vector<16x800xf32>
    %cst_5 = arith.constant 1.000000e+00 : f32
    %9 = vector.broadcast %cst_5 : f32 to vector<16x800xf32>
    %10 = arith.subf %8, %9 : vector<16x800xf32>
    %11 = arith.select %5, %3, %10 : vector<16x800xi1>, vector<16x800xf32>
    %c0_6 = arith.constant 0 : index
    %c0_7 = arith.constant 0 : index
    %12 = vector.load %arg2[%c0_6, %c0_7] : memref<800x20xbf16, #tpu.memory_space<vmem>>, vector<800x20xbf16>
    %13 = arith.truncf %11 : vector<16x800xf32> to vector<16x800xbf16>
    %cst_8 = arith.constant dense<0.000000e+00> : vector<16x20xf32>
    %14 = tpu.matmul %13, %12, %cst_8 {dimension_numbers = #tpu.dot_dimension_numbers<[1], [0], [0], [1], [0, 0, 1, 1], [], []>} : vector<16x800xbf16>, vector<800x20xbf16>, vector<16x20xf32> -> vector<16x20xf32>
    %cst_9 = arith.constant dense<0.000000e+00> : vector<20xf32>
    %15 = vector.multi_reduction <add>, %14, %cst_9 [0] : vector<16x20xf32> to vector<20xf32>
    %16 = vector.shape_cast %15 : vector<20xf32> to vector<1x20xf32>
    %cst_10 = arith.constant 1.562500e-03 : f32
    %17 = vector.broadcast %cst_10 : f32 to vector<1x20xf32>
    %18 = arith.mulf %16, %17 : vector<1x20xf32>
    %19 = arith.mulf %11, %11 : vector<16x800xf32>
    %c0_11 = arith.constant 0 : index
    %c0_12 = arith.constant 0 : index
    %20 = vector.load %arg2[%c0_11, %c0_12] : memref<800x20xbf16, #tpu.memory_space<vmem>>, vector<800x20xbf16>
    %21 = arith.truncf %19 : vector<16x800xf32> to vector<16x800xbf16>
    %cst_13 = arith.constant dense<0.000000e+00> : vector<16x20xf32>
    %22 = tpu.matmul %21, %20, %cst_13 {dimension_numbers = #tpu.dot_dimension_numbers<[1], [0], [0], [1], [0, 0, 1, 1], [], []>} : vector<16x800xbf16>, vector<800x20xbf16>, vector<16x20xf32> -> vector<16x20xf32>
    %cst_14 = arith.constant dense<0.000000e+00> : vector<20xf32>
    %23 = vector.multi_reduction <add>, %22, %cst_14 [0] : vector<16x20xf32> to vector<20xf32>
    %24 = vector.shape_cast %23 : vector<20xf32> to vector<1x20xf32>
    %cst_15 = arith.constant 1.562500e-03 : f32
    %25 = vector.broadcast %cst_15 : f32 to vector<1x20xf32>
    %26 = arith.mulf %24, %25 : vector<1x20xf32>
    %27 = arith.mulf %18, %18 : vector<1x20xf32>
    %28 = arith.subf %26, %27 : vector<1x20xf32>
    %cst_16 = arith.constant 0.000000e+00 : f32
    %29 = vector.broadcast %cst_16 : f32 to vector<1x20xf32>
    %30 = arith.maximumf %28, %29 : vector<1x20xf32>
    %c0_17 = arith.constant 0 : index
    %c0_18 = arith.constant 0 : index
    %31 = vector.load %arg10[%c0_17, %c0_18] : memref<4x20xf32, #tpu.memory_space<vmem>>, vector<1x20xf32>
    %cst_19 = arith.constant 9.99999974E-6 : f32
    %32 = vector.broadcast %cst_19 : f32 to vector<1x20xf32>
    %33 = arith.addf %30, %32 : vector<1x20xf32>
    %34 = math.rsqrt %33 : vector<1x20xf32>
    %35 = arith.mulf %31, %34 : vector<1x20xf32>
    %c1 = arith.constant 1 : index
    %c0_20 = arith.constant 0 : index
    %36 = vector.load %arg10[%c1, %c0_20] : memref<4x20xf32, #tpu.memory_space<vmem>>, vector<1x20xf32>
    %37 = arith.mulf %18, %35 : vector<1x20xf32>
    %38 = arith.subf %36, %37 : vector<1x20xf32>
    %c0_21 = arith.constant 0 : index
    %c0_22 = arith.constant 0 : index
    %39 = vector.load %arg3[%c0_21, %c0_22] : memref<800x400xbf16, #tpu.memory_space<vmem>>, vector<800x400xbf16>
    %40 = arith.truncf %11 : vector<16x800xf32> to vector<16x800xbf16>
    %cst_23 = arith.constant dense<0.000000e+00> : vector<16x400xf32>
    %41 = tpu.matmul %40, %39, %cst_23 {dimension_numbers = #tpu.dot_dimension_numbers<[1], [0], [0], [1], [0, 0, 1, 1], [], []>} : vector<16x800xbf16>, vector<800x400xbf16>, vector<16x400xf32> -> vector<16x400xf32>
    %c0_24 = arith.constant 0 : index
    %c0_25 = arith.constant 0 : index
    %42 = vector.load %arg4[%c0_24, %c0_25] : memref<20x400xbf16, #tpu.memory_space<vmem>>, vector<20x400xbf16>
    %43 = arith.truncf %35 : vector<1x20xf32> to vector<1x20xbf16>
    %cst_26 = arith.constant dense<0.000000e+00> : vector<1x400xf32>
    %44 = tpu.matmul %43, %42, %cst_26 {dimension_numbers = #tpu.dot_dimension_numbers<[1], [0], [0], [1], [0, 0, 1, 1], [], []>} : vector<1x20xbf16>, vector<20x400xbf16>, vector<1x400xf32> -> vector<1x400xf32>
    %45 = vector.broadcast %44 : vector<1x400xf32> to vector<16x400xf32>
    %46 = arith.mulf %41, %45 : vector<16x400xf32>
    %c0_27 = arith.constant 0 : index
    %c0_28 = arith.constant 0 : index
    %47 = vector.load %arg4[%c0_27, %c0_28] : memref<20x400xbf16, #tpu.memory_space<vmem>>, vector<20x400xbf16>
    %48 = arith.truncf %38 : vector<1x20xf32> to vector<1x20xbf16>
    %cst_29 = arith.constant dense<0.000000e+00> : vector<1x400xf32>
    %49 = tpu.matmul %48, %47, %cst_29 {dimension_numbers = #tpu.dot_dimension_numbers<[1], [0], [0], [1], [0, 0, 1, 1], [], []>} : vector<1x20xbf16>, vector<20x400xbf16>, vector<1x400xf32> -> vector<1x400xf32>
    %50 = vector.broadcast %49 : vector<1x400xf32> to vector<16x400xf32>
    %51 = arith.addf %46, %50 : vector<16x400xf32>
    %52 = arith.mulf %51, %51 : vector<16x400xf32>
    %c0_30 = arith.constant 0 : index
    %c0_31 = arith.constant 0 : index
    %53 = vector.load %arg5[%c0_30, %c0_31] : memref<400x20xbf16, #tpu.memory_space<vmem>>, vector<400x20xbf16>
    %54 = arith.truncf %52 : vector<16x400xf32> to vector<16x400xbf16>
    %cst_32 = arith.constant dense<0.000000e+00> : vector<16x20xf32>
    %55 = tpu.matmul %54, %53, %cst_32 {dimension_numbers = #tpu.dot_dimension_numbers<[1], [0], [0], [1], [0, 0, 1, 1], [], []>} : vector<16x400xbf16>, vector<400x20xbf16>, vector<16x20xf32> -> vector<16x20xf32>
    %cst_33 = arith.constant 1.000000e-24 : f32
    %56 = vector.broadcast %cst_33 : f32 to vector<16x20xf32>
    %57 = arith.maximumf %55, %56 : vector<16x20xf32>
    %58 = math.rsqrt %57 : vector<16x20xf32>
    %c0_34 = arith.constant 0 : index
    %c0_35 = arith.constant 0 : index
    %59 = vector.load %arg4[%c0_34, %c0_35] : memref<20x400xbf16, #tpu.memory_space<vmem>>, vector<20x400xbf16>
    %60 = arith.truncf %58 : vector<16x20xf32> to vector<16x20xbf16>
    %cst_36 = arith.constant dense<0.000000e+00> : vector<16x400xf32>
    %61 = tpu.matmul %60, %59, %cst_36 {dimension_numbers = #tpu.dot_dimension_numbers<[1], [0], [0], [1], [0, 0, 1, 1], [], []>} : vector<16x20xbf16>, vector<20x400xbf16>, vector<16x400xf32> -> vector<16x400xf32>
    %62 = arith.mulf %51, %61 : vector<16x400xf32>
    %c0_37 = arith.constant 0 : index
    %c0_38 = arith.constant 0 : index
    %63 = vector.load %arg6[%c0_37, %c0_38] : memref<400x400xbf16, #tpu.memory_space<vmem>>, vector<400x400xbf16>
    %64 = arith.truncf %62 : vector<16x400xf32> to vector<16x400xbf16>
    %cst_39 = arith.constant dense<0.000000e+00> : vector<16x400xf32>
    %65 = tpu.matmul %64, %63, %cst_39 {dimension_numbers = #tpu.dot_dimension_numbers<[1], [0], [0], [1], [0, 0, 1, 1], [], []>} : vector<16x400xbf16>, vector<400x400xbf16>, vector<16x400xf32> -> vector<16x400xf32>
    %c0_40 = arith.constant 0 : index
    %c0_41 = arith.constant 0 : index
    %66 = vector.load %arg7[%c0_40, %c0_41] : memref<16x16xbf16, #tpu.memory_space<vmem>>, vector<16x16xbf16>
    %67 = arith.truncf %65 : vector<16x400xf32> to vector<16x400xbf16>
    %cst_42 = arith.constant dense<0.000000e+00> : vector<16x400xf32>
    %68 = tpu.matmul %66, %67, %cst_42 {dimension_numbers = #tpu.dot_dimension_numbers<[1], [0], [0], [1], [0, 0, 1, 1], [], []>} : vector<16x16xbf16>, vector<16x400xbf16>, vector<16x400xf32> -> vector<16x400xf32>
    %c0_43 = arith.constant 0 : index
    %c0_44 = arith.constant 0 : index
    %69 = vector.load %arg8[%c0_43, %c0_44] : memref<1x400xf32, #tpu.memory_space<vmem>>, vector<1x400xf32>
    %70 = vector.broadcast %69 : vector<1x400xf32> to vector<16x400xf32>
    %71 = arith.addf %68, %70 : vector<16x400xf32>
    %cst_45 = arith.constant 0.000000e+00 : f32
    %72 = vector.broadcast %cst_45 : f32 to vector<16x400xf32>
    %73 = arith.cmpf ogt, %71, %72 : vector<16x400xf32>
    %cst_46 = arith.constant 0.000000e+00 : f32
    %74 = vector.broadcast %cst_46 : f32 to vector<16x400xf32>
    %75 = arith.minimumf %71, %74 : vector<16x400xf32>
    %76 = math.exp %75 : vector<16x400xf32>
    %cst_47 = arith.constant 1.000000e+00 : f32
    %77 = vector.broadcast %cst_47 : f32 to vector<16x400xf32>
    %78 = arith.subf %76, %77 : vector<16x400xf32>
    %79 = arith.select %73, %71, %78 : vector<16x400xi1>, vector<16x400xf32>
    %c0_48 = arith.constant 0 : index
    %c0_49 = arith.constant 0 : index
    %80 = vector.load %arg9[%c0_48, %c0_49] : memref<400x20xbf16, #tpu.memory_space<vmem>>, vector<400x20xbf16>
    %81 = arith.truncf %79 : vector<16x400xf32> to vector<16x400xbf16>
    %cst_50 = arith.constant dense<0.000000e+00> : vector<16x20xf32>
    %82 = tpu.matmul %81, %80, %cst_50 {dimension_numbers = #tpu.dot_dimension_numbers<[1], [0], [0], [1], [0, 0, 1, 1], [], []>} : vector<16x400xbf16>, vector<400x20xbf16>, vector<16x20xf32> -> vector<16x20xf32>
    %cst_51 = arith.constant dense<0.000000e+00> : vector<20xf32>
    %83 = vector.multi_reduction <add>, %82, %cst_51 [0] : vector<16x20xf32> to vector<20xf32>
    %84 = vector.shape_cast %83 : vector<20xf32> to vector<1x20xf32>
    %cst_52 = arith.constant 3.125000e-03 : f32
    %85 = vector.broadcast %cst_52 : f32 to vector<1x20xf32>
    %86 = arith.mulf %84, %85 : vector<1x20xf32>
    %87 = arith.mulf %79, %79 : vector<16x400xf32>
    %c0_53 = arith.constant 0 : index
    %c0_54 = arith.constant 0 : index
    %88 = vector.load %arg9[%c0_53, %c0_54] : memref<400x20xbf16, #tpu.memory_space<vmem>>, vector<400x20xbf16>
    %89 = arith.truncf %87 : vector<16x400xf32> to vector<16x400xbf16>
    %cst_55 = arith.constant dense<0.000000e+00> : vector<16x20xf32>
    %90 = tpu.matmul %89, %88, %cst_55 {dimension_numbers = #tpu.dot_dimension_numbers<[1], [0], [0], [1], [0, 0, 1, 1], [], []>} : vector<16x400xbf16>, vector<400x20xbf16>, vector<16x20xf32> -> vector<16x20xf32>
    %cst_56 = arith.constant dense<0.000000e+00> : vector<20xf32>
    %91 = vector.multi_reduction <add>, %90, %cst_56 [0] : vector<16x20xf32> to vector<20xf32>
    %92 = vector.shape_cast %91 : vector<20xf32> to vector<1x20xf32>
    %cst_57 = arith.constant 3.125000e-03 : f32
    %93 = vector.broadcast %cst_57 : f32 to vector<1x20xf32>
    %94 = arith.mulf %92, %93 : vector<1x20xf32>
    %95 = arith.mulf %86, %86 : vector<1x20xf32>
    %96 = arith.subf %94, %95 : vector<1x20xf32>
    %cst_58 = arith.constant 0.000000e+00 : f32
    %97 = vector.broadcast %cst_58 : f32 to vector<1x20xf32>
    %98 = arith.maximumf %96, %97 : vector<1x20xf32>
    %c2 = arith.constant 2 : index
    %c0_59 = arith.constant 0 : index
    %99 = vector.load %arg10[%c2, %c0_59] : memref<4x20xf32, #tpu.memory_space<vmem>>, vector<1x20xf32>
    %cst_60 = arith.constant 9.99999974E-6 : f32
    %100 = vector.broadcast %cst_60 : f32 to vector<1x20xf32>
    %101 = arith.addf %98, %100 : vector<1x20xf32>
    %102 = math.rsqrt %101 : vector<1x20xf32>
    %103 = arith.mulf %99, %102 : vector<1x20xf32>
    %c3 = arith.constant 3 : index
    %c0_61 = arith.constant 0 : index
    %104 = vector.load %arg10[%c3, %c0_61] : memref<4x20xf32, #tpu.memory_space<vmem>>, vector<1x20xf32>
    %105 = arith.mulf %86, %103 : vector<1x20xf32>
    %106 = arith.subf %104, %105 : vector<1x20xf32>
    %cst_62 = arith.constant 5.000000e-02 : f32
    %107 = vector.broadcast %cst_62 : f32 to vector<16x20xf32>
    %108 = arith.mulf %82, %107 : vector<16x20xf32>
    %109 = vector.broadcast %103 : vector<1x20xf32> to vector<16x20xf32>
    %110 = arith.mulf %108, %109 : vector<16x20xf32>
    %111 = vector.broadcast %106 : vector<1x20xf32> to vector<16x20xf32>
    %112 = arith.addf %110, %111 : vector<16x20xf32>
    %c0_63 = arith.constant 0 : index
    %c0_64 = arith.constant 0 : index
    %113 = vector.load %arg11[%c0_63, %c0_64] : memref<20x24xbf16, #tpu.memory_space<vmem>>, vector<20x24xbf16>
    %114 = arith.truncf %112 : vector<16x20xf32> to vector<16x20xbf16>
    %cst_65 = arith.constant dense<0.000000e+00> : vector<16x24xf32>
    %115 = tpu.matmul %114, %113, %cst_65 {dimension_numbers = #tpu.dot_dimension_numbers<[1], [0], [0], [1], [0, 0, 1, 1], [], []>} : vector<16x20xbf16>, vector<20x24xbf16>, vector<16x24xf32> -> vector<16x24xf32>
    %c0_66 = arith.constant 0 : index
    %c0_67 = arith.constant 0 : index
    %116 = vector.load %arg12[%c0_66, %c0_67] : memref<16x24xf32, #tpu.memory_space<vmem>>, vector<16x24xf32>
    %117 = arith.mulf %115, %116 : vector<16x24xf32>
    %c0_68 = arith.constant 0 : index
    %c0_69 = arith.constant 0 : index
    %118 = vector.load %arg14[%c0_68, %c0_69] : memref<24x3xbf16, #tpu.memory_space<vmem>>, vector<24x3xbf16>
    %119 = arith.truncf %117 : vector<16x24xf32> to vector<16x24xbf16>
    %cst_70 = arith.constant dense<0.000000e+00> : vector<16x3xf32>
    %120 = tpu.matmul %119, %118, %cst_70 {dimension_numbers = #tpu.dot_dimension_numbers<[1], [0], [0], [1], [0, 0, 1, 1], [], []>} : vector<16x24xbf16>, vector<24x3xbf16>, vector<16x3xf32> -> vector<16x3xf32>
    %c0_71 = arith.constant 0 : index
    %c0_72 = arith.constant 0 : index
    %121 = vector.load %arg13[%c0_71, %c0_72] : memref<2x16xbf16, #tpu.memory_space<vmem>>, vector<2x16xbf16>
    %122 = arith.truncf %120 : vector<16x3xf32> to vector<16x3xbf16>
    %cst_73 = arith.constant dense<0.000000e+00> : vector<2x3xf32>
    %123 = tpu.matmul %121, %122, %cst_73 {dimension_numbers = #tpu.dot_dimension_numbers<[1], [0], [0], [1], [0, 0, 1, 1], [], []>} : vector<2x16xbf16>, vector<16x3xbf16>, vector<2x3xf32> -> vector<2x3xf32>
    %c0_74 = arith.constant 0 : index
    %c0_75 = arith.constant 0 : index
    %124 = vector.load %arg15[%c0_74, %c0_75] : memref<1x3xf32, #tpu.memory_space<vmem>>, vector<1x3xf32>
    %125 = vector.broadcast %124 : vector<1x3xf32> to vector<2x3xf32>
    %126 = arith.addf %123, %125 : vector<2x3xf32>
    %c0_76 = arith.constant 0 : index
    %c0_77 = arith.constant 0 : index
    %127 = vector.load %arg16[%c0_76, %c0_77] : memref<2x3xf32, #tpu.memory_space<vmem>>, vector<2x3xf32>
    tpu.vector_store %arg16[%c0_76, %c0_77], %126 {strides = array<i32>} : memref<2x3xf32, #tpu.memory_space<vmem>>, vector<2x3xf32>,
    return
  }
}

</mosaic_0001>

<bundles_post_ra>
// kernel: tile.27
= control target key start
LH: loop header
LB: loop body
LE: loop exit
PB: predicated region body
PF: predicated region fallthrough
CT: control target
= control target key end

     0   :  { %s34_s0 = inlined_call_operand.vmem [shape: f32[20], index: 0, kind: input, shape index: {}]   ;;  %s35_s1 = inlined_call_operand.vmem [shape: f32[20,20], index: 1, kind: output, shape index: {}]  }
   0x1   :  { %v4_v0 = vld [vmem:[%s34_s0] ss:$0 sm:$0xff] }
   0x2   :  { %5 = vst [vmem:[%s35_s1] sm:$0xff] %v4_v0 }
   0x3   :  { %10 = vst [vmem:[%s35_s1 + $0x8] sm:$0xff] %v4_v0 }
   0x4   :  { %11 = vst [vmem:[%s35_s1 + $0x10] sm:$0xff] %v4_v0 }

// kernel: tile.28
= control target key start
LH: loop header
LB: loop body
LE: loop exit
PB: predicated region body
PF: predicated region fallthrough
CT: control target
= control target key end

     0   :  { %vm9_vm0 = vcmask 31744   ;;  %vm13_vm1 = vcmask 130048   ;;  %s221_s14 = smov 124   ;;  %s222_s15 = smov 112   ;;  %vm23_vm2 = vcmask 64512   ;;  %vm3_vm3 = vcmask 162816   ;;  %s335_s0 = inlined_call_operand.vmem [shape: f32[20,20], index: 0, kind: input, shape index: {}]   ;;  %s336_s1 = inlined_call_operand.vmem [shape: f32[1,400], index: 1, kind: output, shape index: {}]  }
   0x1   :  { %v177_v0 = vld [vmem:[%s335_s0 + $0x13] sm:$0x1]   ;;  %v181_v3 = vld [vmem:[%s335_s0 + $0xc] sm:$0x1]   ;;  %v179_v6 = vld [vmem:[%s335_s0 + $0x6] sm:$0x1]  }
   0x2   :  { %v178_v1 = vld [vmem:[%s335_s0 + $0x13] sm:$0x1]   ;;  %v182_v4 = vld [vmem:[%s335_s0 + $0xc] sm:$0x1]   ;;  %v180_v7 = vld [vmem:[%s335_s0 + $0x6] sm:$0x1]  }
   0x3   :  { %v10_v2 = vsel %vm9_vm0, %v178_v1, %v177_v0  ;;  %v37_v5 = vsel %vm13_vm1, %v182_v4, %v181_v3  ;;  %v184_v8 = vld [vmem:[%s335_s0 + $0x5] sm:$0x1]   ;;  %s223_s22 = smov 100   ;;  %v24_v9 = vsel %vm23_vm2, %v180_v7, %v179_v6  ;;  %v183_v10 = vld [vmem:[%s335_s0 + $0x12] sm:$0x1]   ;;  %s224_s25 = smov 120  }
   0x4   :  { %11 = vrot.lane.b32.xlu0 %v10_v2, %s221_s14  ;;  %38 = vrot.lane.b32.xlu1 %v37_v5, %s222_s15  ;;  %s225_s26 = smov 104   ;;  %v185_v11 = vld [vmem:[%s335_s0 + $0xb] sm:$0x1]   ;;  %s226_s29 = smov 92   ;;  %v186_v12 = vld [vmem:[%s335_s0 + $0x11] sm:$0x1]  }
   0x5   :  { %55 = vrot.lane.b32.xlu2 %v184_v8, %s223_s22  ;;  %v187_v13 = vld [vmem:[%s335_s0 + $0x4] sm:$0x1]   ;;  %s227_s5 = smov 84   ;;  %s228_s6 = smov 80   ;;  %v188_v14 = vld [vmem:[%s335_s0 + $0xa] sm:$0x1]  }
   0x6   :  { %s229_s9 = smov 72   ;;  %v189_v15 = vld [vmem:[%s335_s0 + $0x10] sm:$0x1]   ;;  %v190_v16 = vld [vmem:[%s335_s0 + $0x3] sm:$0x1]   ;;  %s230_s14 = smov 64  }
   0x7   :  { %s231_s15 = smov 60   ;;  %v191_v17 = vld [vmem:[%s335_s0 + $0x9] sm:$0x1]   ;;  %s232_s18 = smov 52   ;;  %v192_v18 = vld [vmem:[%s335_s0 + $0xf] sm:$0x1]  }
   0x8   :  { %v193_v19 = vld [vmem:[%s335_s0 + $0x2] sm:$0x1]   ;;  %s233_s23 = smov 44   ;;  %s234_s24 = smov 40   ;;  %v194_v20 = vld [vmem:[%s335_s0 + $0x8] sm:$0x1]  }
   0x9   :  { %s235_s27 = smov 32   ;;  %v195_v21 = vld [vmem:[%s335_s0 + $0xe] sm:$0x1]   ;;  %v196_v22 = vld [vmem:[%s335_s0 + $0x1] sm:$0x1]   ;;  %s236_s3 = smov 24  }
   0xa   :  { %s237_s4 = smov 20   ;;  %v197_v23 = vld [vmem:[%s335_s0 + $0x7] sm:$0x1]   ;;  %s238_s7 = smov 12   ;;  %v198_v24 = vld [vmem:[%s335_s0 + $0xd] sm:$0x1]  }
   0xb   :  { %s239_s10 = smov 4   ;;  %v2_v25 = vld [vmem:[%s335_s0] sm:$0x1]   ;;  %vm16_vm4 = vcmask 1048544   ;;  %vm27_vm5 = vcmask 97280   ;;  %vm30_vm6 = vcmask 1048512  }
   0xc   :  { %25 = vrot.lane.b32.xlu0 %v24_v9, %s224_s25  ;;  %48 = vrot.lane.b32.xlu1 %v183_v10, %s225_s26  ;;  %4 = vst.msk [vmem:[#allocation0] sm:$0x1] %vm3_vm3, %v2_v25   ;;  %vm43_vm7 = vcmask 1048448   ;;  %vm57_vm8 = vcmask 982816   ;;  %vm50_vm9 = vcmask 1015616   ;;  %vm63_vm10 = vcmask 917216  }
   0xd   :  { %61 = vrot.lane.b32.xlu2 %v185_v11, %s226_s29  ;;  %vm83_vm11 = vcmask 753216   ;;  %vm70_vm12 = vcmask 851616   ;;  %vm77_vm13 = vcmask 818816   ;;  %vm103_vm14 = vcmask 589216  }
   0xe   :  { %vm123_vm15 = vcmask 425216   ;;  %vm97_vm2 = vcmask 654816   ;;  %vm110_vm3 = vcmask 523616  }
  0x14   :  { %68 = vrot.lane.b32.xlu0 %v186_v12, %s227_s5  ;;  %75 = vrot.lane.b32.xlu1 %v187_v13, %s228_s6 }
  0x15   :  { %81 = vrot.lane.b32.xlu2 %v188_v14, %s229_s9 }
  0x1c   :  { %88 = vrot.lane.b32.xlu0 %v189_v15, %s230_s14  ;;  %95 = vrot.lane.b32.xlu1 %v190_v16, %s231_s15 }
  0x1d   :  { %101 = vrot.lane.b32.xlu2 %v191_v17, %s232_s18 }
  0x24   :  { %108 = vrot.lane.b32.xlu0 %v192_v18, %s233_s23  ;;  %115 = vrot.lane.b32.xlu1 %v193_v19, %s234_s24 }
  0x25   :  { %121 = vrot.lane.b32.xlu2 %v194_v20, %s235_s27 }
  0x2c   :  { %128 = vrot.lane.b32.xlu0 %v195_v21, %s236_s3  ;;  %135 = vrot.lane.b32.xlu1 %v196_v22, %s237_s4 }
  0x2d   :  { %141 = vrot.lane.b32.xlu2 %v197_v23, %s238_s7 }
  0x34   :  { %148 = vrot.lane.b32.xlu0 %v198_v24, %s239_s10 }
  0x5f   :  { %v56_v26 = vpop.permute.xlu2 %55  }
  0x67   :  { %v62_v27 = vpop.permute.xlu2 %61  }
  0x6f   :  { %v82_v28 = vpop.permute.xlu2 %81  }
  0x76   :  { %v12_v29 = vpop.permute.xlu0 %11   ;;  %v39_v30 = vpop.permute.xlu1 %38  }
  0x77   :  { %15 = vst.msk [vmem:[#allocation0 + $0x18] sm:$0x1] %vm13_vm1, %v12_v29   ;;  %v102_v31 = vpop.permute.xlu2 %101   ;;  %vm90_vm1 = vcmask 687616  }
  0x78   :  { %18 = vst.msk [vmem:[#allocation0 + $0x10] sm:$0x1] %vm16_vm4, %v12_v29   ;;  %vm117_vm4 = vcmask 490816  }
  0x79   :  { %42 = vst.msk [vmem:[#allocation0 + $0x10] sm:$0x1] %vm9_vm0, %v39_v30   ;;  %vm143_vm0 = vcmask 261216  }
  0x7e   :  { %v172_v32 = vld [vmem:[#allocation0 + $0x18] sm:$0x1]  ;;  %v26_v33 = vpop.permute.xlu0 %25   ;;  %v49_v34 = vpop.permute.xlu1 %48  }
  0x7f   :  { %201 = vst [vmem:[%s336_s1 + $0x3] sm:$0x1] %v172_v32  ;;  %v122_v35 = vpop.permute.xlu2 %121  }
  0x80   :  { %29 = vst.msk [vmem:[#allocation0 + $0x8] sm:$0x1] %vm27_vm5, %v26_v33   ;;  %vm130_vm5 = vcmask 359616  }
  0x81   :  { %31 = vst.msk [vmem:[#allocation0] sm:$0x1] %vm30_vm6, %v26_v33   ;;  %vm137_vm6 = vcmask 326816  }
  0x82   :  { %45 = vst.msk [vmem:[#allocation0 + $0x8] sm:$0x1] %vm43_vm7, %v39_v30   ;;  %vm150_vm7 = vcmask 195616  }
  0x83   :  { %58 = vst.msk [vmem:[#allocation0] sm:$0x1] %vm57_vm8, %v56_v26  }
  0x84   :  { %52 = vst.msk [vmem:[#allocation0 + $0x10] sm:$0x1] %vm50_vm9, %v49_v34  }
  0x85   :  { %65 = vst.msk [vmem:[#allocation0 + $0x8] sm:$0x1] %vm63_vm10, %v62_v27  }
  0x86   :  { %v69_v36 = vpop.permute.xlu0 %68   ;;  %85 = vst.msk [vmem:[#allocation0 + $0x8] sm:$0x1] %vm83_vm11, %v82_v28   ;;  %v76_v37 = vpop.permute.xlu1 %75  }
  0x87   :  { %72 = vst.msk [vmem:[#allocation0 + $0x10] sm:$0x1] %vm70_vm12, %v69_v36   ;;  %v142_v38 = vpop.permute.xlu2 %141  }
  0x88   :  { %78 = vst.msk [vmem:[#allocation0] sm:$0x1] %vm77_vm13, %v76_v37  }
  0x89   :  { %105 = vst.msk [vmem:[#allocation0 + $0x8] sm:$0x1] %vm103_vm14, %v102_v31  }
  0x8a   :  { %125 = vst.msk [vmem:[#allocation0 + $0x8] sm:$0x1] %vm123_vm15, %v122_v35  }
  0x8b   :  { %145 = vst.msk [vmem:[#allocation0 + $0x8] sm:$0x1] %vm143_vm0, %v142_v38  }
  0x8e   :  { %v89_v39 = vpop.permute.xlu0 %88   ;;  %v96_v40 = vpop.permute.xlu1 %95  }
  0x8f   :  { %92 = vst.msk [vmem:[#allocation0 + $0x10] sm:$0x1] %vm90_vm1, %v89_v39  }
  0x90   :  { %98 = vst.msk [vmem:[#allocation0] sm:$0x1] %vm97_vm2, %v96_v40  }
  0x92   :  { %v160_v41 = vld [vmem:[#allocation0 + $0x8] sm:$0x1] }
  0x93   :  { %199 = vst [vmem:[%s336_s1 + $0x1] sm:$0x1] %v160_v41 }
  0x96   :  { %v109_v42 = vpop.permute.xlu0 %108   ;;  %v116_v43 = vpop.permute.xlu1 %115  }
  0x97   :  { %112 = vst.msk [vmem:[#allocation0 + $0x10] sm:$0x1] %vm110_vm3, %v109_v42  }
  0x98   :  { %118 = vst.msk [vmem:[#allocation0] sm:$0x1] %vm117_vm4, %v116_v43  }
  0x9e   :  { %v129_v44 = vpop.permute.xlu0 %128   ;;  %v136_v45 = vpop.permute.xlu1 %135  }
  0x9f   :  { %132 = vst.msk [vmem:[#allocation0 + $0x10] sm:$0x1] %vm130_vm5, %v129_v44  }
  0xa0   :  { %138 = vst.msk [vmem:[#allocation0] sm:$0x1] %vm137_vm6, %v136_v45  }
  0xa6   :  { %v149_v46 = vpop.permute.xlu0 %148  }
  0xa7   :  { %v155_v47 = vld [vmem:[#allocation0] sm:$0x1]  ;;  %152 = vst.msk [vmem:[#allocation0 + $0x10] sm:$0x1] %vm150_vm7, %v149_v46  }
  0xa8   :  { %158 = vst [vmem:[%s336_s1] sm:$0x1] %v155_v47 }
  0xae   :  { %v166_v48 = vld [vmem:[#allocation0 + $0x10] sm:$0x1] }
  0xaf   :  { %200 = vst [vmem:[%s336_s1 + $0x2] sm:$0x1] %v166_v48 }

// kernel: shallow_sgcn_forward.1
= control target key start
LH: loop header
LB: loop body
LE: loop exit
PB: predicated region body
PF: predicated region fallthrough
CT: control target
= control target key end

     0   :  { %s10294_s0 = inlined_call_operand.vmem [shape: f32[16,65], index: 0, kind: input, shape index: {}]   ;;  %s10295_s1 = inlined_call_operand.vmem [shape: bf16[65,800], index: 1, kind: input, shape index: {}]   ;;  %s10296_s2 = inlined_call_operand.vmem [shape: bf16[800,20], index: 2, kind: input, shape index: {}]   ;;  %s10297_s3 = inlined_call_operand.vmem [shape: bf16[800,400], index: 3, kind: input, shape index: {}]   ;;  %s10298_s4 = inlined_call_operand.vmem [shape: bf16[20,400], index: 4, kind: input, shape index: {}]   ;;  %s10299_s5 = inlined_call_operand.vmem [shape: bf16[400,20], index: 5, kind: input, shape index: {}, may-alias: {5,9}]   ;;  %s10300_s6 = inlined_call_operand.vmem [shape: bf16[400,400], index: 6, kind: input, shape index: {}]   ;;  %s10301_s7 = inlined_call_operand.vmem [shape: bf16[16,16], index: 7, kind: input, shape index: {}]   ;;  %s10302_s8 = inlined_call_operand.vmem [shape: f32[1,400], index: 8, kind: input, shape index: {}]   ;;  %s10303_s9 = inlined_call_operand.vmem [shape: bf16[400,20], index: 9, kind: input, shape index: {}, may-alias: {5,9}]   ;;  %s10304_s10 = inlined_call_operand.vmem [shape: f32[4,20], index: 10, kind: input, shape index: {}]   ;;  %s10305_s11 = inlined_call_operand.vmem [shape: bf16[20,24], index: 11, kind: input, shape index: {}]   ;;  %s10306_s12 = inlined_call_operand.vmem [shape: f32[16,24], index: 12, kind: input, shape index: {}]   ;;  %s10307_s13 = inlined_call_operand.vmem [shape: bf16[2,16], index: 13, kind: input, shape index: {}]   ;;  %s10308_s14 = inlined_call_operand.vmem [shape: bf16[24,3], index: 14, kind: input, shape index: {}]   ;;  %s10309_s15 = inlined_call_operand.vmem [shape: f32[1,3], index: 15, kind: input, shape index: {}]   ;;  %s10310_s16 = inlined_call_operand.hbm [shape: f32[2,3], index: 16, kind: output, shape index: {}]  }
   0x1   :  { %10318 = sst [smem:[#allocation11_spill]] %s10294_s0 }
   0x2   :  { %v89_v0 = vld [vmem:[%s10295_s1 + $0xe0] sm:$0x11]  ;;  %vm260_vm0 = vcmask 1040384   ;;  %v90_v1 = vld [vmem:[%s10295_s1 + $0xe8] sm:$0x11]  ;;  %v7045_v5 = vmov 0  }
   0x3   :  { %v186_v2 = vunpack.c.l.b16 %v89_v0  ;;  %v187_v3 = vunpack.c.h.b16 %v89_v0  ;;  %v188_v4 = vunpack.c.l.b16 %v90_v1  ;;  %v7138_v6 = vsel %vm260_vm0, 65535, %v7045_v5  ;;  %v4814_v11 = vld [vmem:[%s10295_s1 + $0xa8] sm:$0xf]  ;;  %v6553_v12 = vld [vmem:[%s10295_s1 + $0xc0] sm:$0xf0]  ;;  %s10319_s20 = sld [smem:[#allocation11_spill]] }
   0x4   :  { %v189_v7 = vunpack.c.h.b16 %v90_v1  ;;  %v6550_v14 = vld [vmem:[%s10295_s1 + $0xac] sm:$0xf]  ;;  %v4816_v15 = vld [vmem:[%s10295_s1 + $0xc4] sm:$0xf0]  ;;  %v4822_v16 = vld [vmem:[%s10295_s1 + $0xb0] sm:$0xf]  ;;  %v4815_v24 = vor.u32 %v6553_v12, %v4814_v11 }
   0x5   :  { %v221_v8 = vpack.c.b16 %v186_v2, %v186_v2  ;;  %v222_v9 = vpack.c.b16 %v187_v3, %v187_v3  ;;  %v223_v10 = vpack.c.b16 %v188_v4, %v188_v4  ;;  %v6554_v20 = vld [vmem:[%s10295_s1 + $0xc8] sm:$0xf0]  ;;  %v6551_v21 = vld [vmem:[%s10295_s1 + $0xb4] sm:$0xf]  ;;  %v4824_v22 = vld [vmem:[%s10295_s1 + $0xcc] sm:$0xf0]  ;;  %v4819_v25 = vor.u32 %v6550_v14, %v4816_v15 }
   0x6   :  { %v224_v13 = vpack.c.b16 %v189_v7, %v189_v7  ;;  %v4786_v26 = vld [vmem:[%s10295_s1 + $0x70] sm:$0xf]  ;;  %v6546_v27 = vld [vmem:[%s10295_s1 + $0x88] sm:$0xf0]  ;;  %v4823_v28 = vor.u32 %v6554_v20, %v4822_v16  ;;  %v4827_v29 = vor.u32 %v6551_v21, %v4824_v22  ;;  %v6543_v30 = vld [vmem:[%s10295_s1 + $0x74] sm:$0xf] }
   0x7   :  { %v264_v17 = vand.u32 %v7138_v6, %v221_v8  ;;  %v267_v18 = vand.u32 %v7138_v6, %v222_v9  ;;  %v270_v19 = vand.u32 %v7138_v6, %v223_v10  ;;  %v4788_v31 = vld [vmem:[%s10295_s1 + $0x8c] sm:$0xf0]  ;;  %v4794_v32 = vld [vmem:[%s10295_s1 + $0x78] sm:$0xf]  ;;  %v6547_v33 = vld [vmem:[%s10295_s1 + $0x90] sm:$0xf0]  ;;  %v4787_v37 = vor.u32 %v6546_v27, %v4786_v26 }
   0x8   :  { %v273_v23 = vand.u32 %v7138_v6, %v224_v13  ;;  %v6544_v34 = vld [vmem:[%s10295_s1 + $0x7c] sm:$0xf]  ;;  %v4796_v35 = vld [vmem:[%s10295_s1 + $0x94] sm:$0xf0]  ;;  %v4791_v38 = vor.u32 %v6543_v30, %v4788_v31  ;;  %v6539_v39 = vld [vmem:[%s10295_s1 + $0x50] sm:$0xf0]  ;;  %v4795_v42 = vor.u32 %v6547_v33, %v4794_v32 }
   0x9   :  { %287 = vmatpush.bf16.msra.mxu0 %v264_v17  ;;  %301 = vmatpush.bf16.msra.mxu1 %v267_v18  ;;  %v4758_v36 = vld [vmem:[%s10295_s1 + $0x38] sm:$0xf]  ;;  %v6536_v40 = vld [vmem:[%s10295_s1 + $0x3c] sm:$0xf]  ;;  %v4799_v43 = vor.u32 %v6544_v34, %v4796_v35  ;;  %v4766_v44 = vld [vmem:[%s10295_s1 + $0x40] sm:$0xf] }
   0xa   :  { %315 = vmatpush.bf16.msra.mxu2 %v270_v19  ;;  %329 = vmatpush.bf16.msra.mxu3 %v273_v23  ;;  %v4760_v41 = vld [vmem:[%s10295_s1 + $0x54] sm:$0xf0]  ;;  %v91_v45 = vld [vmem:[%s10295_s1 + $0xf0] sm:$0x11]  ;;  %v6540_v47 = vld [vmem:[%s10295_s1 + $0x58] sm:$0xf0]  ;;  %v4759_v53 = vor.u32 %v6539_v39, %v4758_v36 }
   0xb   :  { %v92_v46 = vld [vmem:[%s10295_s1 + $0xf8] sm:$0x1]  ;;  %v6537_v48 = vld [vmem:[%s10295_s1 + $0x44] sm:$0xf]  ;;  %v4768_v49 = vld [vmem:[%s10295_s1 + $0x5c] sm:$0xf0]  ;;  %v190_v50 = vunpack.c.l.b16 %v91_v45  ;;  %v191_v51 = vunpack.c.h.b16 %v91_v45  ;;  %v4763_v54 = vor.u32 %v6536_v40, %v4760_v41  ;;  %v4767_v57 = vor.u32 %v6540_v47, %v4766_v44 }
   0xc   :  { %v192_v52 = vunpack.c.l.b16 %v92_v46  ;;  %v4730_v55 = vld [vmem:[%s10295_s1] sm:$0xf]  ;;  %v6532_v56 = vld [vmem:[%s10295_s1 + $0x18] sm:$0xf0]  ;;  %v4771_v58 = vor.u32 %v6537_v48, %v4768_v49  ;;  %v6529_v59 = vld [vmem:[%s10295_s1 + $0x4] sm:$0xf] }
   0xd   :  { %288 = vmatpush.bf16.msra.mxu0 %v4815_v24  ;;  %302 = vmatpush.bf16.msra.mxu1 %v4819_v25  ;;  %v4732_v60 = vld [vmem:[%s10295_s1 + $0x1c] sm:$0xf0]  ;;  %v4738_v61 = vld [vmem:[%s10295_s1 + $0x8] sm:$0xf]  ;;  %v6533_v62 = vld [vmem:[%s10295_s1 + $0x20] sm:$0xf0]  ;;  %v225_v1 = vpack.c.b16 %v190_v50, %v190_v50  ;;  %v226_v2 = vpack.c.b16 %v191_v51, %v191_v51  ;;  %v4731_v4 = vor.u32 %v6532_v56, %v4730_v55 }
   0xe   :  { %316 = vmatpush.bf16.msra.mxu2 %v4823_v28  ;;  %330 = vmatpush.bf16.msra.mxu3 %v4827_v29  ;;  %v6530_v63 = vld [vmem:[%s10295_s1 + $0xc] sm:$0xf]  ;;  %v4740_v0 = vld [vmem:[%s10295_s1 + $0x24] sm:$0xf0]  ;;  %v227_v3 = vpack.c.b16 %v192_v52, %v192_v52  ;;  %v4735_v5 = vor.u32 %v6529_v59, %v4732_v60  ;;  %v55_v7 = vld [vmem:[%s10319_s20] sm:$0xff]  ;;  %v4739_v9 = vor.u32 %v6533_v62, %v4738_v61  ;;  %vm256_vm1 = vcmask 531456  }
   0xf   :  { %v56_v8 = vld [vmem:[%s10319_s20 + $0x8] sm:$0xff]  ;;  %v4743_v10 = vor.u32 %v6530_v63, %v4740_v0  ;;  %v276_v11 = vand.u32 %v7138_v6, %v225_v1  ;;  %v279_v12 = vand.u32 %v7138_v6, %v226_v2  ;;  %v4830_v13 = vld [vmem:[%s10295_s1 + $0xb8] sm:$0xf]  ;;  %v6555_v16 = vld [vmem:[%s10295_s1 + $0xd0] sm:$0xf0] }
  0x10   :  { %v282_v14 = vand.u32 %v7138_v6, %v227_v3  ;;  %v7258_v15 = vpack.c.bf16 %v56_v8, %v55_v7  ;;  %v6552_v17 = vld [vmem:[%s10295_s1 + $0xbc] sm:$0xf]  ;;  %v4832_v18 = vld [vmem:[%s10295_s1 + $0xd4] sm:$0xf0]  ;;  %v4838_v6 = vld [vmem:[%s10295_s1 + $0xc0] sm:$0xf]  ;;  %v4831_v21 = vor.u32 %v6555_v16, %v4830_v13 }
  0x11   :  { %289 = vmatpush.bf16.msra.mxu0 %v4787_v37  ;;  %303 = vmatpush.bf16.msra.mxu1 %v4791_v38  ;;  %v6556_v19 = vld [vmem:[%s10295_s1 + $0xd8] sm:$0xf0]  ;;  %v4802_v20 = vld [vmem:[%s10295_s1 + $0x80] sm:$0xf]  ;;  %v4835_v22 = vor.u32 %v6552_v17, %v4832_v18 }
  0x12   :  { %317 = vmatpush.bf16.msra.mxu2 %v4795_v42  ;;  %331 = vmatpush.bf16.msra.mxu3 %v4799_v43  ;;  %v6548_v23 = vld [vmem:[%s10295_s1 + $0x98] sm:$0xf0] }
  0x15   :  { %290 = vmatpush.bf16.msra.mxu0 %v4759_v53  ;;  %304 = vmatpush.bf16.msra.mxu1 %v4763_v54 }
  0x16   :  { %318 = vmatpush.bf16.msra.mxu2 %v4767_v57  ;;  %332 = vmatpush.bf16.msra.mxu3 %v4771_v58 }
  0x19   :  { %291 = vmatpush.bf16.msra.mxu0 %v4731_v4  ;;  %305 = vmatpush.bf16.msra.mxu1 %v4735_v5 }
  0x1a   :  { %319 = vmatpush.bf16.msra.mxu2 %v4739_v9  ;;  %333 = vmatpush.bf16.msra.mxu3 %v4743_v10 }
  0x1d   :  { %343 = vmatpush.bf16.msrb.mxu0 %v276_v11  ;;  %357 = vmatpush.bf16.msrb.mxu1 %v279_v12 }
  0x1e   :  { %21 = vsyncpa [#allocation3], 0  ;;  %371 = vmatpush.bf16.msrb.mxu2 %v282_v14  ;;  %4840 = vmatmul.msk.bf16.vlgmr.msra.gmra.mxu0 %vm256_vm1, %v7258_v15  ;;  %v4839_v24 = vor.u32 %v6556_v19, %v4838_v6  ;;  %v6545_v25 = vld [vmem:[%s10295_s1 + $0x84] sm:$0xf]  ;;  %v4804_v26 = vld [vmem:[%s10295_s1 + $0x9c] sm:$0xf0]  ;;  %v4803_v30 = vor.u32 %v6548_v23, %v4802_v20 }
  0x1f   :  { %v7292_v27 = vld [vmem:[%s10296_s2 + $0x38] sm:$0xff]  ;;  %4841 = vmatmul.msk.bf16.vlgmr.msra.gmra.mxu1 %vm256_vm1, %v7258_v15  ;;  %4842 = vmatmul.msk.bf16.vlgmr.msra.gmra.mxu2 %vm256_vm1, %v7258_v15  ;;  %v4810_v28 = vld [vmem:[%s10295_s1 + $0x88] sm:$0xf]  ;;  %v6549_v29 = vld [vmem:[%s10295_s1 + $0xa0] sm:$0xf0]  ;;  %v4807_v31 = vor.u32 %v6545_v25, %v4804_v26  ;;  %vm873_vm0 = vcmask 261120  }
  0x20   :  { %4843 = vmatmul.msk.bf16.vlgmr.msra.gmra.mxu3 %vm256_vm1, %v7258_v15  ;;  %v4774_v32 = vld [vmem:[%s10295_s1 + $0x48] sm:$0xf]  ;;  %v6541_v33 = vld [vmem:[%s10295_s1 + $0x60] sm:$0xf0]  ;;  %v4811_v34 = vor.u32 %v6549_v29, %v4810_v28  ;;  %v6538_v35 = vld [vmem:[%s10295_s1 + $0x4c] sm:$0xf] }
  0x21   :  { %344 = vmatpush.bf16.msrb.mxu0 %v4831_v21  ;;  %358 = vmatpush.bf16.msrb.mxu1 %v4835_v22  ;;  %v4776_v36 = vld [vmem:[%s10295_s1 + $0x64] sm:$0xf0]  ;;  %v7322_v37 = vld [vmem:[%s10296_s2 + $0x30] sm:$0xff]  ;;  %v6542_v39 = vld [vmem:[%s10295_s1 + $0x68] sm:$0xf0]  ;;  %v4775_v40 = vor.u32 %v6541_v33, %v4774_v32  ;;  %s4719_s0 = sshll.u32 %s10310_s16, 4  ;;  %s4720_s0 = int_to_ptr.hbm [resolvable:$true] %s4719_s0 }
  0x22   :  { %372 = vmatpush.bf16.msrb.mxu2 %v4839_v24  ;;  %877 = vmatpush.bf16.msrb.mxu3 %v7292_v27  ;;  %v4782_v38 = vld [vmem:[%s10295_s1 + $0x50] sm:$0xf]  ;;  %v4779_v41 = vor.u32 %v6538_v35, %v4776_v36  ;;  %v6534_v43 = vld [vmem:[%s10295_s1 + $0x28] sm:$0xf0]  ;;  %v6531_v45 = vld [vmem:[%s10295_s1 + $0x14] sm:$0xf] }
  0x23   :  { %v4746_v42 = vld [vmem:[%s10295_s1 + $0x10] sm:$0xf]  ;;  %v4783_v44 = vor.u32 %v6542_v39, %v4782_v38  ;;  %v7346_v47 = vld [vmem:[%s10296_s2 + $0x28] sm:$0xff]  ;;  %v4754_v48 = vld [vmem:[%s10295_s1 + $0x18] sm:$0xf] }
  0x24   :  { %v4748_v46 = vld [vmem:[%s10295_s1 + $0x2c] sm:$0xf0]  ;;  %v6535_v49 = vld [vmem:[%s10295_s1 + $0x30] sm:$0xf0]  ;;  %v4747_v50 = vor.u32 %v6534_v43, %v4746_v42  ;;  %v7357_v53 = vld [vmem:[%s10296_s2 + $0x78] sm:$0xff] }
  0x25   :  { %345 = vmatpush.bf16.msrb.mxu0 %v4803_v30  ;;  %359 = vmatpush.bf16.msrb.mxu1 %v4807_v31  ;;  %v4751_v51 = vor.u32 %v6531_v45, %v4748_v46  ;;  %v4755_v52 = vor.u32 %v6535_v49, %v4754_v48  ;;  %v7363_v54 = vld [vmem:[%s10296_s2 + $0xf8] sm:$0xff]  ;;  %v7368_v55 = vld [vmem:[%s10296_s2 + $0x20] sm:$0xff]  ;;  %v7379_v57 = vld [vmem:[%s10296_s2 + $0x70] sm:$0xff] }
  0x26   :  { %373 = vmatpush.bf16.msrb.mxu2 %v4811_v34  ;;  %878 = vmatpush.bf16.msrb.mxu3 %v7322_v37  ;;  %v7373_v56 = vld [vmem:[%s10296_s2 + $0xb8] sm:$0xff]  ;;  %v7385_v58 = vld [vmem:[%s10296_s2 + $0xf0] sm:$0xff]  ;;  %v7404_v60 = vld [vmem:[%s10296_s2 + $0x68] sm:$0xff] }
  0x27   :  { %v7391_v59 = vld [vmem:[%s10296_s2 + $0x18] sm:$0xff]  ;;  %v7410_v61 = vld [vmem:[%s10296_s2 + $0xe8] sm:$0xff]  ;;  %v7416_v62 = vld [vmem:[%s10296_s2 + $0x10] sm:$0xff] }
  0x28   :  { %v7422_v63 = vld [vmem:[%s10296_s2 + $0x60] sm:$0xff]  ;;  %v7434_v1 = vld [vmem:[%s10296_s2 + $0x8] sm:$0xff]  ;;  %v7440_v2 = vld [vmem:[%s10296_s2 + $0x58] sm:$0xff] }
  0x29   :  { %346 = vmatpush.bf16.msrb.mxu0 %v4775_v40  ;;  %360 = vmatpush.bf16.msrb.mxu1 %v4779_v41  ;;  %v7428_v0 = vld [vmem:[%s10296_s2 + $0xe0] sm:$0xff]  ;;  %v7446_v3 = vld [vmem:[%s10296_s2 + $0xd8] sm:$0xff]  ;;  %v7463_v7 = vld [vmem:[%s10296_s2 + $0x50] sm:$0xff] }
  0x2a   :  { %374 = vmatpush.bf16.msrb.mxu2 %v4783_v44  ;;  %879 = vmatpush.bf16.msrb.mxu3 %v7346_v47  ;;  %v7452_v4 = vld [vmem:[%s10296_s2] sm:$0xff]  ;;  %v7457_v5 = vld [vmem:[%s10296_s2 + $0x138] sm:$0xff]  ;;  %v7469_v8 = vld [vmem:[%s10296_s2 + $0xd0] sm:$0xff] }
  0x2b   :  { %v7477_v9 = vld [vmem:[%s10296_s2 + $0x48] sm:$0xff]  ;;  %v7489_v11 = vld [vmem:[%s10296_s2 + $0x40] sm:$0xff]  ;;  %v7494_v12 = vld [vmem:[%s10296_s2 + $0x178] sm:$0xff] }
  0x2c   :  { %v7483_v10 = vld [vmem:[%s10296_s2 + $0xc8] sm:$0xff]  ;;  %v7502_v13 = vld [vmem:[%s10296_s2 + $0x130] sm:$0xff]  ;;  %v7517_v16 = vld [vmem:[%s10296_s2 + $0xc0] sm:$0xff] }
  0x2d   :  { %347 = vmatpush.bf16.msrb.mxu0 %v4747_v50  ;;  %361 = vmatpush.bf16.msrb.mxu1 %v4751_v51  ;;  %v7507_v14 = vld [vmem:[%s10296_s2 + $0x170] sm:$0xff]  ;;  %v7527_v17 = vld [vmem:[%s10296_s2 + $0x128] sm:$0xff]  ;;  %v7546_v19 = vld [vmem:[%s10296_s2 + $0x120] sm:$0xff] }
  0x2e   :  { %375 = vmatpush.bf16.msrb.mxu2 %v4755_v52  ;;  %880 = vmatpush.bf16.msrb.mxu3 %v7368_v55  ;;  %v7532_v18 = vld [vmem:[%s10296_s2 + $0x168] sm:$0xff]  ;;  %v7551_v20 = vld [vmem:[%s10296_s2 + $0x160] sm:$0xff]  ;;  %v7565_v22 = vld [vmem:[%s10296_s2 + $0x118] sm:$0xff] }
  0x2f   :  { %v7537_v6 = vld [vmem:[%s10296_s2 + $0xa8] sm:$0xff]  ;;  %10320 = vst [vmem:[#allocation5_spill] sm:$0xff] %v7551_v20  ;;  %v7556_v21 = vld [vmem:[%s10296_s2 + $0xa0] sm:$0xff]  ;;  %v7570_v23 = vld [vmem:[%s10296_s2 + $0x158] sm:$0xff] }
  0x30   :  { %4844 = vmatmul.msk.bf16.vlgmr.msrb.gmra.mxu0 %vm256_vm1, %v7258_v15  ;;  %4845 = vmatmul.msk.bf16.vlgmr.msrb.gmra.mxu1 %vm256_vm1, %v7258_v15  ;;  %10321 = vst [vmem:[#allocation6_spill] sm:$0xff] %v7570_v23  ;;  %v7575_v24 = vld [vmem:[%s10296_s2 + $0x98] sm:$0xff]  ;;  %v7584_v25 = vld [vmem:[%s10296_s2 + $0x110] sm:$0xff]  ;;  %v7603_v28 = vld [vmem:[%s10296_s2 + $0x108] sm:$0xff] }
  0x31   :  { %891 = vmatpush.bf16.msra.mxu0 %v7357_v53  ;;  %4846 = vmatmul.msk.bf16.vlgmr.msrb.gmra.mxu2 %vm256_vm1, %v7258_v15  ;;  %v7512_v15 = vld [vmem:[%s10296_s2 + $0xb0] sm:$0xff]  ;;  %v7608_v29 = vld [vmem:[%s10296_s2 + $0x148] sm:$0xff]  ;;  %v7622_v31 = vld [vmem:[%s10296_s2 + $0x100] sm:$0xff]  ;;  %vm975_vm1 = vcmask 162816  }
  0x32   :  { %919 = vmatpush.bf16.msra.mxu2 %v7363_v54  ;;  %905 = vmatpush.bf16.msra.mxu1 %v7373_v56  ;;  %v7589_v26 = vld [vmem:[%s10296_s2 + $0x150] sm:$0xff]  ;;  %10323 = vst [vmem:[#allocation8_spill] sm:$0xff] %v7608_v29  ;;  %v7613_v30 = vld [vmem:[%s10296_s2 + $0x88] sm:$0xff]  ;;  %v7627_v32 = vld [vmem:[%s10296_s2 + $0x140] sm:$0xff] }
  0x33   :  { %881 = vmatpush.bf16.msrb.mxu3 %v7391_v59  ;;  %10322 = vst [vmem:[#allocation7_spill] sm:$0xff] %v7589_v26  ;;  %v7634_v33 = vld [vmem:[%s10296_s2 + $0x80] sm:$0xff]  ;;  %v7639_v34 = vld [vmem:[%s10296_s2 + $0x188] sm:$0xff] }
  0x34   :  { %10324 = vst [vmem:[#allocation9_spill] sm:$0xff] %v7627_v32  ;;  %v7647_v36 = vld [vmem:[%s10296_s2 + $0x180] sm:$0xff] }
  0x35   :  { %892 = vmatpush.bf16.msra.mxu0 %v7379_v57  ;;  %10325 = vst [vmem:[#allocation10_spill] sm:$0xff] %v7647_v36 }
  0x36   :  { %920 = vmatpush.bf16.msra.mxu2 %v7385_v58  ;;  %906 = vmatpush.bf16.msra.mxu1 %v7512_v15 }
  0x37   :  { %882 = vmatpush.bf16.msrb.mxu3 %v7416_v62 }
  0x39   :  { %893 = vmatpush.bf16.msra.mxu0 %v7404_v60 }
  0x3a   :  { %921 = vmatpush.bf16.msra.mxu2 %v7410_v61  ;;  %907 = vmatpush.bf16.msra.mxu1 %v7537_v6 }
  0x3b   :  { %883 = vmatpush.bf16.msrb.mxu3 %v7434_v1 }
  0x3d   :  { %894 = vmatpush.bf16.msra.mxu0 %v7422_v63 }
  0x3e   :  { %922 = vmatpush.bf16.msra.mxu2 %v7428_v0  ;;  %908 = vmatpush.bf16.msra.mxu1 %v7556_v21 }
  0x3f   :  { %884 = vmatpush.bf16.msrb.mxu3 %v7452_v4 }
  0x41   :  { %895 = vmatpush.bf16.msra.mxu0 %v7440_v2 }
  0x42   :  { %923 = vmatpush.bf16.msra.mxu2 %v7446_v3  ;;  %909 = vmatpush.bf16.msra.mxu1 %v7575_v24 }
  0x43   :  { %933 = vmatpush.bf16.msra.mxu3 %v7457_v5 }
  0x45   :  { %896 = vmatpush.bf16.msra.mxu0 %v7463_v7 }
  0x46   :  { %924 = vmatpush.bf16.msra.mxu2 %v7469_v8 }
  0x47   :  { %934 = vmatpush.bf16.msra.mxu3 %v7502_v13 }
  0x49   :  { %897 = vmatpush.bf16.msra.mxu0 %v7477_v9 }
  0x4a   :  { %925 = vmatpush.bf16.msra.mxu2 %v7483_v10 }
  0x4b   :  { %935 = vmatpush.bf16.msra.mxu3 %v7527_v17 }
  0x4d   :  { %898 = vmatpush.bf16.msra.mxu0 %v7489_v11 }
  0x4e   :  { %926 = vmatpush.bf16.msra.mxu2 %v7517_v16 }
  0x4f   :  { %936 = vmatpush.bf16.msra.mxu3 %v7546_v19 }
  0x51   :  { %947 = vmatpush.bf16.msrb.mxu0 %v7494_v12 }
  0x52   :  { %1010 = vmatpush.bf16.msrb.mxu2 %v7292_v27  ;;  %v7594_v27 = vld [vmem:[%s10296_s2 + $0x90] sm:$0xff] }
  0x53   :  { %937 = vmatpush.bf16.msra.mxu3 %v7565_v22  ;;  %910 = vmatpush.bf16.msra.mxu1 %v7594_v27 }
  0x55   :  { %948 = vmatpush.bf16.msrb.mxu0 %v7507_v14 }
  0x56   :  { %1011 = vmatpush.bf16.msrb.mxu2 %v7322_v37 }
  0x57   :  { %938 = vmatpush.bf16.msra.mxu3 %v7584_v25  ;;  %911 = vmatpush.bf16.msra.mxu1 %v7613_v30 }
  0x59   :  { %949 = vmatpush.bf16.msrb.mxu0 %v7532_v18 }
  0x5a   :  { %1012 = vmatpush.bf16.msrb.mxu2 %v7346_v47 }
  0x5b   :  { %939 = vmatpush.bf16.msra.mxu3 %v7603_v28  ;;  %912 = vmatpush.bf16.msra.mxu1 %v7634_v33 }
  0x5d   :  { %950 = vmatpush.bf16.msrb.mxu0 %v7551_v20 }
  0x5e   :  { %1013 = vmatpush.bf16.msrb.mxu2 %v7368_v55 }
  0x5f   :  { %940 = vmatpush.bf16.msra.mxu3 %v7622_v31  ;;  %967 = vmatpush.bf16.msrb.mxu1 %v7639_v34 }
  0x61   :  { %951 = vmatpush.bf16.msrb.mxu0 %v7570_v23 }
  0x62   :  { %1014 = vmatpush.bf16.msrb.mxu2 %v7391_v59 }
  0x63   :  { %968 = vmatpush.bf16.msrb.mxu1 %v7647_v36 }
  0x65   :  { %952 = vmatpush.bf16.msrb.mxu0 %v7589_v26 }
  0x66   :  { %1015 = vmatpush.bf16.msrb.mxu2 %v7416_v62 }
  0x69   :  { %953 = vmatpush.bf16.msrb.mxu0 %v7608_v29 }
  0x6a   :  { %1016 = vmatpush.bf16.msrb.mxu2 %v7434_v1 }
  0x6d   :  { %954 = vmatpush.bf16.msrb.mxu0 %v7627_v32 }
  0x6e   :  { %1017 = vmatpush.bf16.msrb.mxu2 %v7452_v4 }
  0x9b   :  { %v293_v35 = vpop.f32.mrf.mxu0 }
  0x9c   :  { %v307_v37 = vpop.f32.mrf.mxu1  ;;  %v396_v38 = vmin.f32 %v293_v35, 0.0  ;;  %vm382_vm4 = vcmp.gt.f32.partialorder %v293_v35, 0.0 }
  0x9d   :  { %v397_v39 = vmin.f32 %v307_v37, 0.0  ;;  %vm383_vm2 = vcmp.gt.f32.partialorder %v307_v37, 0.0 }
  0x9e   :  { %v410_v41 = vmul.f32 1.442695, %v396_v38 }
  0x9f   :  { %v412_v40 = vmul.f32 1.442695, %v397_v39 }
  0xa1   :  { %6967 = vpow2.f32 %v412_v40 }
  0xa2   :  { %v7651_v42 = vpop.f32.mrf.mxu2  ;;  %6969 = vpow2.f32 %v410_v41 }
  0xa3   :  { %v398_v43 = vmin.f32 %v7651_v42, 0.0  ;;  %v7654_v44 = vpop.f32.mrf.mxu3  ;;  %v295_v45 = vpop.f32.mrf.mxu0  ;;  %vm384_vm7 = vcmp.gt.f32.partialorder %v7651_v42, 0.0 }
  0xa4   :  { %v399_v46 = vmin.f32 %v7654_v44, 0.0  ;;  %v403_v47 = vmin.f32 %v295_v45, 0.0  ;;  %v309_v48 = vpop.f32.mrf.mxu1  ;;  %vm389_vm5 = vcmp.gt.f32.partialorder %v295_v45, 0.0  ;;  %vm385_vm6 = vcmp.gt.f32.partialorder %v7654_v44, 0.0 }
  0xa5   :  { %v404_v49 = vmin.f32 %v309_v48, 0.0  ;;  %v414_v52 = vmul.f32 1.442695, %v398_v43  ;;  %vm390_vm3 = vcmp.gt.f32.partialorder %v309_v48, 0.0 }
  0xa6   :  { %v416_v50 = vmul.f32 1.442695, %v399_v46  ;;  %v424_v51 = vmul.f32 1.442695, %v403_v47 }
  0xa7   :  { %v426_v55 = vmul.f32 1.442695, %v404_v49  ;;  %v6968_v59 = vpop.eup %6967 }
  0xa8   :  { %6971 = vpow2.f32 %v416_v50  ;;  %v6970_v1 = vpop.eup %6969  ;;  %v4848_v40 = vadd.f32 -1.0, %v6968_v59 }
  0xa9   :  { %6973 = vpow2.f32 %v424_v51  ;;  %v4847_v47 = vadd.f32 -1.0, %v6970_v1 }
  0xaa   :  { %6975 = vpow2.f32 %v426_v55  ;;  %v323_v62 = vpop.f32.mrf.mxu2 }
  0xab   :  { %6977 = vpow2.f32 %v414_v52  ;;  %v405_v4 = vmin.f32 %v323_v62, 0.0  ;;  %v337_v38 = vpop.f32.mrf.mxu3  ;;  %v7665_v23 = vsel %vm382_vm4, %v293_v35, %v4847_v47  ;;  %vm391_vm8 = vcmp.gt.f32.partialorder %v323_v62, 0.0 }
  0xac   :  { %v406_v39 = vmin.f32 %v337_v38, 0.0  ;;  %vm392_vm9 = vcmp.gt.f32.partialorder %v337_v38, 0.0 }
  0xad   :  { %v428_v32 = vmul.f32 1.442695, %v405_v4  ;;  %v7657_v29 = vpop.f32.mrf.mxu0  ;;  %v7659_v41 = vpop.f32.mrf.mxu1  ;;  %v7663_v4 = vsel %vm383_vm2, %v307_v37, %v4848_v40  ;;  %vm2769_vm2 = vcmask 1041408  }
  0xae   :  { %v6972_v46 = vpop.eup %6971  ;;  %v430_v43 = vmul.f32 1.442695, %v406_v39  ;;  %v400_v49 = vmin.f32 %v7657_v29, 0.0  ;;  %v401_v51 = vmin.f32 %v7659_v41, 0.0  ;;  %vm386_vm10 = vcmp.gt.f32.partialorder %v7657_v29, 0.0 }
  0xaf   :  { %v6974_v50 = vpop.eup %6973  ;;  %6979 = vpow2.f32 %v428_v32  ;;  %v4850_v20 = vadd.f32 -1.0, %v6972_v46  ;;  %vm387_vm11 = vcmp.gt.f32.partialorder %v7659_v41, 0.0 }
  0xb0   :  { %v6976_v52 = vpop.eup %6975  ;;  %v4854_v55 = vadd.f32 -1.0, %v6974_v50  ;;  %6981 = vpow2.f32 %v430_v43  ;;  %v418_v39 = vmul.f32 1.442695, %v400_v49  ;;  %v420_v50 = vmul.f32 1.442695, %v401_v51 }
  0xb1   :  { %v6978_v59 = vpop.eup %6977  ;;  %v4855_v26 = vadd.f32 -1.0, %v6976_v52  ;;  %v7692_v51 = vsel %vm385_vm6, %v7654_v44, %v4850_v20  ;;  %vm3126_vm6 = vcmask 130048  }
  0xb2   :  { %v7667_v1 = vsel %vm389_vm5, %v295_v45, %v4854_v55  ;;  %v4849_v43 = vadd.f32 -1.0, %v6978_v59  ;;  %6983 = vpow2.f32 %v418_v39 }
  0xb3   :  { %v7671_v32 = vpack.c.bf16 %v7667_v1, %v7665_v23  ;;  %v7673_v36 = vsel %vm390_vm3, %v309_v48, %v4855_v26  ;;  %6985 = vpow2.f32 %v420_v50 }
  0xb4   :  { %v7678_v37 = vpack.c.bf16 %v7673_v36, %v7663_v4  ;;  %v7680_v35 = vpop.f32.mrf.mxu2  ;;  %v7699_v59 = vsel %vm384_vm7, %v7651_v42, %v4849_v43 }
  0xb5   :  { %v6980_v45 = vpop.eup %6979  ;;  %v402_v40 = vmin.f32 %v7680_v35, 0.0  ;;  %v351_v46 = vpop.f32.mrf.mxu0  ;;  %885 = vmatmul.bf16.vlgmr.msrb.gmra.mxu3 %v7671_v32  ;;  %vm388_vm14 = vcmp.gt.f32.partialorder %v7680_v35, 0.0 }
  0xb6   :  { %v7684_v47 = vpop.f32.mrf.mxu1  ;;  %v6982_v26 = vpop.eup %6981  ;;  %v4856_v48 = vadd.f32 -1.0, %v6980_v45  ;;  %v407_v49 = vmin.f32 %v351_v46, 0.0  ;;  %899 = vmatmul.bf16.vlgmr.msra.gmra.mxu0 %v7678_v37  ;;  %1024 = vmatpush.bf16.msrb.mxu3 %v7357_v53  ;;  %vm393_vm12 = vcmp.gt.f32.partialorder %v351_v46, 0.0 }
  0xb7   :  { %v4857_v52 = vadd.f32 -1.0, %v6982_v26  ;;  %v408_v55 = vmin.f32 %v7684_v47, 0.0  ;;  %1052 = vmatpush.bf16.msra.mxu0 %v7363_v54  ;;  %v422_v53 = vmul.f32 1.442695, %v402_v40  ;;  %vm394_vm13 = vcmp.gt.f32.partialorder %v7684_v47, 0.0 }
  0xb8   :  { %v7702_v39 = vsel %vm391_vm8, %v323_v62, %v4856_v48  ;;  %v432_v45 = vmul.f32 1.442695, %v407_v49  ;;  %v6984_v42 = vpop.eup %6983 }
  0xb9   :  { %v7706_v20 = vpack.c.bf16 %v7702_v39, %v7699_v59  ;;  %v7708_v44 = vsel %vm392_vm9, %v337_v38, %v4857_v52  ;;  %v434_v54 = vmul.f32 1.442695, %v408_v55  ;;  %v6986_v38 = vpop.eup %6985  ;;  %v6697_v55 = vld [vmem:[%s10297_s3 + $0x2cc] sm:$0xf0] }
  0xba   :  { %v7712_v50 = vpack.c.bf16 %v7708_v44, %v7692_v51  ;;  %1025 = vmatpush.bf16.msrb.mxu3 %v7379_v57  ;;  %6987 = vpow2.f32 %v432_v45  ;;  %v4852_v40 = vadd.f32 -1.0, %v6986_v38  ;;  %v988_v45 = vmul.f32 %v7699_v59, %v7699_v59 }
  0xbb   :  { %1053 = vmatpush.bf16.msra.mxu0 %v7385_v58  ;;  %913 = vmatmul.bf16.vlgmr.msra.gmra.mxu1 %v7706_v20  ;;  %6989 = vpow2.f32 %v422_v53  ;;  %v4851_v58 = vadd.f32 -1.0, %v6984_v42  ;;  %v6669_v53 = vld [vmem:[%s10297_s3 + $0x1ec] sm:$0xf0] }
  0xbc   :  { %v379_v62 = vpop.f32.mrf.mxu2  ;;  %927 = vmatmul.bf16.vlgmr.msra.gmra.mxu2 %v7712_v50  ;;  %1038 = vmatpush.bf16.msra.mxu1 %v7373_v56  ;;  %6991 = vpow2.f32 %v434_v54  ;;  %v6625_v54 = vld [vmem:[%s10297_s3 + $0x8c] sm:$0xf0] }
  0xbd   :  { %v409_v43 = vmin.f32 %v379_v62, 0.0  ;;  %1066 = vmatpush.bf16.msra.mxu2 %v7457_v5  ;;  %v7733_v5 = vsel %vm387_vm11, %v7659_v41, %v4852_v40  ;;  %vm395_vm15 = vcmp.gt.f32.partialorder %v379_v62, 0.0  ;;  %v10326_v40 = vld [vmem:[#allocation10_spill] sm:$0xff] }
  0xbe   :  { %1026 = vmatpush.bf16.msrb.mxu3 %v7404_v60 }
  0xbf   :  { %v436_v57 = vmul.f32 1.442695, %v409_v43  ;;  %1054 = vmatpush.bf16.msra.mxu0 %v7410_v61  ;;  %v7730_v61 = vsel %vm386_vm10, %v7657_v29, %v4851_v58  ;;  %v6621_v58 = vld [vmem:[%s10297_s3 + $0x6c] sm:$0xf0] }
  0xc0   :  { %1039 = vmatpush.bf16.msra.mxu1 %v7512_v15  ;;  %v6988_v26 = vpop.eup %6987 }
  0xc1   :  { %6993 = vpow2.f32 %v436_v57  ;;  %1067 = vmatpush.bf16.msra.mxu2 %v7502_v13  ;;  %v6990_v56 = vpop.eup %6989  ;;  %v4858_v48 = vadd.f32 -1.0, %v6988_v26  ;;  %v6693_v57 = vld [vmem:[%s10297_s3 + $0x2ac] sm:$0xf0] }
  0xc2   :  { %1027 = vmatpush.bf16.msrb.mxu3 %v7422_v63  ;;  %v6992_v60 = vpop.eup %6991  ;;  %v993_v63 = vmul.f32 %v7667_v1, %v7667_v1  ;;  %v4853_v52 = vadd.f32 -1.0, %v6990_v56 }
  0xc3   :  { %1055 = vmatpush.bf16.msra.mxu0 %v7428_v0  ;;  %v463_v15 = vsel %vm393_vm12, %v351_v46, %v4858_v48  ;;  %v4859_v49 = vadd.f32 -1.0, %v6992_v60  ;;  %v5385_v48 = vld [vmem:[%s10297_s3 + $0x280] sm:$0xf] }
  0xc4   :  { %1040 = vmatpush.bf16.msra.mxu1 %v7537_v6  ;;  %v7737_v13 = vpack.c.bf16 %v463_v15, %v7730_v61  ;;  %v10327_v60 = vld [vmem:[#allocation5_spill] sm:$0xff] }
  0xc5   :  { %1068 = vmatpush.bf16.msra.mxu2 %v7527_v17  ;;  %v7743_v0 = vsel %vm394_vm13, %v7684_v47, %v4859_v49  ;;  %v986_v17 = vmul.f32 %v7665_v23, %v7665_v23  ;;  %v5273_v49 = vld [vmem:[%s10297_s3 + $0x1a0] sm:$0xf] }
  0xc6   :  { %1028 = vmatpush.bf16.msrb.mxu3 %v7440_v2  ;;  %v7749_v6 = vpack.c.bf16 %v7743_v0, %v7733_v5  ;;  %v7759_v2 = vsel %vm388_vm14, %v7680_v35, %v4853_v52  ;;  %v997_v35 = vmul.f32 %v463_v15, %v463_v15  ;;  %v6689_v15 = vld [vmem:[%s10297_s3 + $0x28c] sm:$0xf0]  ;;  %v5097_v52 = vld [vmem:[%s10297_s3 + $0x40] sm:$0xf] }
  0xc7   :  { %v6994_v29 = vpop.eup %6993  ;;  %1056 = vmatpush.bf16.msra.mxu0 %v7446_v3  ;;  %941 = vmatmul.bf16.vlgmr.msra.gmra.mxu3 %v7737_v13  ;;  %v1000_v3 = vpack.c.bf16 %v993_v63, %v986_v17  ;;  %v6661_v63 = vld [vmem:[%s10297_s3 + $0x1ac] sm:$0xf0]  ;;  %v5386_v17 = vor.u32 %v6689_v15, %v5385_v48 }
  0xc8   :  { %v4860_v41 = vadd.f32 -1.0, %v6994_v29  ;;  %1041 = vmatpush.bf16.msra.mxu1 %v7556_v21  ;;  %955 = vmatmul.bf16.vlgmr.msrb.gmra.mxu0 %v7749_v6  ;;  %v987_v21 = vmul.f32 %v7663_v4, %v7663_v4  ;;  %v6617_v29 = vld [vmem:[%s10297_s3 + $0x4c] sm:$0xf0] }
  0xc9   :  { %1069 = vmatpush.bf16.msra.mxu2 %v7546_v19  ;;  %v6637_v19 = vld [vmem:[%s10297_s3 + $0xec] sm:$0xf0] }
  0xca   :  { %v7761_v1 = vsel %vm395_vm15, %v379_v62, %v4860_v41  ;;  %1029 = vmatpush.bf16.msrb.mxu3 %v7463_v7  ;;  %v5177_v7 = vld [vmem:[%s10297_s3 + $0xe0] sm:$0xf]  ;;  %v5274_v41 = vor.u32 %v6661_v63, %v5273_v49  ;;  %v6645_v48 = vld [vmem:[%s10297_s3 + $0x12c] sm:$0xf0] }
  0xcb   :  { %v7766_v23 = vpack.c.bf16 %v7761_v1, %v7759_v2  ;;  %1057 = vmatpush.bf16.msra.mxu0 %v7469_v8  ;;  %v5178_v8 = vor.u32 %v6637_v19, %v5177_v7  ;;  %v10328_v7 = vld [vmem:[#allocation6_spill] sm:$0xff]  ;;  %v5098_v19 = vor.u32 %v6617_v29, %v5097_v52  ;;  %v5849_v49 = vld [vmem:[%s10297_s3 + $0x620] sm:$0xf] }
  0xcc   :  { %1018 = vmatmul.bf16.vlgmr.msrb.gmra.mxu2 %v1000_v3  ;;  %1042 = vmatpush.bf16.msra.mxu1 %v7575_v24  ;;  %v5161_v24 = vld [vmem:[%s10297_s3 + $0xc0] sm:$0xf]  ;;  %v6805_v63 = vld [vmem:[%s10297_s3 + $0x62c] sm:$0xf0] }
  0xcd   :  { %1070 = vmatpush.bf16.msra.mxu2 %v7565_v22  ;;  %5061 = vmatmul.msk.bf16.vlgmr.msrb.gmra.mxu1 %vm873_vm0, %v7766_v23  ;;  %v994_v22 = vmul.f32 %v7673_v36, %v7673_v36  ;;  %v5433_v36 = vld [vmem:[%s10297_s3 + $0x2e0] sm:$0xf]  ;;  %v6725_v29 = vld [vmem:[%s10297_s3 + $0x3ac] sm:$0xf0] }
  0xce   :  { %1030 = vmatpush.bf16.msrb.mxu3 %v7477_v9  ;;  %v6633_v9 = vld [vmem:[%s10297_s3 + $0xcc] sm:$0xf0]  ;;  %v5369_v3 = vld [vmem:[%s10297_s3 + $0x260] sm:$0xf] }
  0xcf   :  { %1058 = vmatpush.bf16.msra.mxu0 %v7483_v10  ;;  %v989_v10 = vmul.f32 %v7692_v51, %v7692_v51  ;;  %v1001_v4 = vpack.c.bf16 %v994_v22, %v987_v21  ;;  %v5257_v21 = vld [vmem:[%s10297_s3 + $0x180] sm:$0xf]  ;;  %v6657_v22 = vld [vmem:[%s10297_s3 + $0x18c] sm:$0xf0] }
  0xd0   :  { %1043 = vmatpush.bf16.msra.mxu1 %v7594_v27  ;;  %v996_v27 = vmul.f32 %v7708_v44, %v7708_v44  ;;  %v5129_v44 = vld [vmem:[%s10297_s3 + $0x80] sm:$0xf] }
  0xd1   :  { %1071 = vmatpush.bf16.msra.mxu2 %v7584_v25  ;;  %v5162_v25 = vor.u32 %v6633_v9, %v5161_v24  ;;  %v5130_v43 = vor.u32 %v6625_v54, %v5129_v44  ;;  %v5081_v24 = vld [vmem:[%s10297_s3 + $0x20] sm:$0xf]  ;;  %v6613_v9 = vld [vmem:[%s10297_s3 + $0x2c] sm:$0xf0] }
  0xd2   :  { %1031 = vmatpush.bf16.msrb.mxu3 %v7489_v11  ;;  %v6701_v11 = vld [vmem:[%s10297_s3 + $0x2ec] sm:$0xf0]  ;;  %v1003_v46 = vpack.c.bf16 %v996_v27, %v989_v10  ;;  %v999_v10 = vmul.f32 %v7761_v1, %v7761_v1  ;;  %v5241_v1 = vld [vmem:[%s10297_s3 + $0x160] sm:$0xf] }
  0xd3   :  { %1059 = vmatpush.bf16.msra.mxu0 %v7517_v16  ;;  %v5145_v16 = vld [vmem:[%s10297_s3 + $0xa0] sm:$0xf]  ;;  %v5434_v47 = vor.u32 %v6701_v11, %v5433_v36  ;;  %v10329_v11 = vld [vmem:[#allocation7_spill] sm:$0xff] }
  0xd4   :  { %1044 = vmatpush.bf16.msra.mxu1 %v7613_v30  ;;  %v995_v30 = vmul.f32 %v7702_v39, %v7702_v39  ;;  %v5305_v39 = vld [vmem:[%s10297_s3 + $0x1e0] sm:$0xf]  ;;  %v6677_v54 = vld [vmem:[%s10297_s3 + $0x22c] sm:$0xf0] }
  0xd5   :  { %1072 = vmatpush.bf16.msra.mxu2 %v7603_v28  ;;  %v5417_v28 = vld [vmem:[%s10297_s3 + $0x2c0] sm:$0xf]  ;;  %v5306_v38 = vor.u32 %v6669_v53, %v5305_v39 }
  0xd6   :  { %1080 = vmatpush.bf16.msra.mxu3 %v7494_v12  ;;  %v6629_v12 = vld [vmem:[%s10297_s3 + $0xac] sm:$0xf0]  ;;  %v1002_v42 = vpack.c.bf16 %v995_v30, %v988_v45  ;;  %v5418_v62 = vor.u32 %v6697_v55, %v5417_v28  ;;  %v5353_v36 = vld [vmem:[%s10297_s3 + $0x240] sm:$0xf]  ;;  %v992_v30 = vmul.f32 %v7759_v2, %v7759_v2 }
  0xd7   :  { %2337 = vmatpush.bf16.msrb.mxu0 %v5178_v8  ;;  %1032 = vmatmul.bf16.vlgmr.msrb.gmra.mxu3 %v1001_v4  ;;  %v5146_v51 = vor.u32 %v6629_v12, %v5145_v16  ;;  %v6685_v8 = vld [vmem:[%s10297_s3 + $0x26c] sm:$0xf0]  ;;  %v5082_v4 = vor.u32 %v6613_v9, %v5081_v24  ;;  %v5689_v2 = vld [vmem:[%s10297_s3 + $0x4e0] sm:$0xf] }
  0xd8   :  { %1060 = vmatmul.bf16.vlgmr.msra.gmra.mxu0 %v1003_v46  ;;  %1045 = vmatpush.bf16.msra.mxu1 %v7634_v33  ;;  %v5401_v33 = vld [vmem:[%s10297_s3 + $0x2a0] sm:$0xf]  ;;  %v5370_v27 = vor.u32 %v6685_v8, %v5369_v3  ;;  %v6681_v16 = vld [vmem:[%s10297_s3 + $0x24c] sm:$0xf0]  ;;  %v1006_v55 = vpack.c.bf16 %v999_v10, %v992_v30 }
  0xd9   :  { %1073 = vmatpush.bf16.msra.mxu2 %v7622_v31  ;;  %v5289_v31 = vld [vmem:[%s10297_s3 + $0x1c0] sm:$0xf]  ;;  %v5402_v26 = vor.u32 %v6693_v57, %v5401_v33  ;;  %v6653_v12 = vld [vmem:[%s10297_s3 + $0x16c] sm:$0xf0]  ;;  %v5354_v39 = vor.u32 %v6681_v16, %v5353_v36  ;;  %v6667_v36 = vld [vmem:[%s10297_s3 + $0x1e4] sm:$0xf] }
  0xda   :  { %1081 = vmatpush.bf16.msra.mxu3 %v7507_v14  ;;  %v990_v14 = vmul.f32 %v7730_v61, %v7730_v61  ;;  %v6609_v46 = vld [vmem:[%s10297_s3 + $0xc] sm:$0xf0]  ;;  %v5242_v53 = vor.u32 %v6653_v12, %v5241_v1  ;;  %v10330_v45 = vld [vmem:[#allocation8_spill] sm:$0xff] }
  0xdb   :  { %2338 = vmatpush.bf16.msrb.mxu0 %v5162_v25  ;;  %v5258_v25 = vor.u32 %v6657_v22, %v5257_v21  ;;  %v6733_v28 = vld [vmem:[%s10297_s3 + $0x3ec] sm:$0xf0]  ;;  %v5337_v44 = vld [vmem:[%s10297_s3 + $0x220] sm:$0xf] }
  0xdc   :  { %1100 = vmatpush.bf16.msrb.mxu1 %v7639_v34  ;;  %v1004_v59 = vpack.c.bf16 %v997_v35, %v990_v14  ;;  %v6665_v34 = vld [vmem:[%s10297_s3 + $0x1cc] sm:$0xf0]  ;;  %v5065_v35 = vld [vmem:[%s10297_s3] sm:$0xf] }
  0xdd   :  { %2365 = vmatpush.bf16.msrb.mxu2 %v5434_v47  ;;  %1046 = vmatmul.bf16.vlgmr.msra.gmra.mxu1 %v1002_v42  ;;  %v5290_v56 = vor.u32 %v6665_v34, %v5289_v31  ;;  %v5561_v47 = vld [vmem:[%s10297_s3 + $0x3e0] sm:$0xf]  ;;  %v5066_v14 = vor.u32 %v6609_v46, %v5065_v35  ;;  %v998_v42 = vmul.f32 %v7743_v0, %v7743_v0  ;;  %v6761_v31 = vld [vmem:[%s10297_s3 + $0x4cc] sm:$0xf0] }
  0xde   :  { %1082 = vmatpush.bf16.msra.mxu3 %v7532_v18  ;;  %1074 = vmatmul.bf16.vlgmr.msra.gmra.mxu2 %v1004_v59  ;;  %v5113_v18 = vld [vmem:[%s10297_s3 + $0x60] sm:$0xf]  ;;  %v991_v59 = vmul.f32 %v7733_v5, %v7733_v5  ;;  %v6729_v5 = vld [vmem:[%s10297_s3 + $0x3cc] sm:$0xf0]  ;;  %v5338_v34 = vor.u32 %v6677_v54, %v5337_v44 }
  0xdf   :  { %2339 = vmatpush.bf16.msrb.mxu0 %v5146_v51  ;;  %v5114_v61 = vor.u32 %v6621_v58, %v5113_v18  ;;  %v6765_v51 = vld [vmem:[%s10297_s3 + $0x4ec] sm:$0xf0]  ;;  %v5225_v33 = vld [vmem:[%s10297_s3 + $0x140] sm:$0xf] }
  0xe0   :  { %1101 = vmatpush.bf16.msrb.mxu1 %v10326_v40  ;;  %v5545_v57 = vld [vmem:[%s10297_s3 + $0x3c0] sm:$0xf]  ;;  %v6641_v21 = vld [vmem:[%s10297_s3 + $0x10c] sm:$0xf0] }
  0xe1   :  { %2366 = vmatpush.bf16.msrb.mxu2 %v5418_v62  ;;  %v5562_v62 = vor.u32 %v6733_v28, %v5561_v47  ;;  %v5673_v0 = vld [vmem:[%s10297_s3 + $0x4c0] sm:$0xf]  ;;  %v6801_v10 = vld [vmem:[%s10297_s3 + $0x60c] sm:$0xf0] }
  0xe2   :  { %1083 = vmatpush.bf16.msra.mxu3 %v10327_v60  ;;  %v5321_v18 = vld [vmem:[%s10297_s3 + $0x200] sm:$0xf]  ;;  %v1005_v60 = vpack.c.bf16 %v998_v42, %v991_v59  ;;  %v5674_v15 = vor.u32 %v6761_v31, %v5673_v0  ;;  %v6721_v16 = vld [vmem:[%s10297_s3 + $0x38c] sm:$0xf0] }
  0xe3   :  { %2340 = vmatpush.bf16.msrb.mxu0 %v5130_v43  ;;  %v6649_v43 = vld [vmem:[%s10297_s3 + $0x14c] sm:$0xf0]  ;;  %v10331_v58 = vld [vmem:[#allocation9_spill] sm:$0xff] }
  0xe4   :  { %2351 = vmatpush.bf16.msra.mxu1 %v5306_v38  ;;  %v5690_v38 = vor.u32 %v6765_v51, %v5689_v2  ;;  %v5226_v40 = vor.u32 %v6649_v43, %v5225_v33  ;;  %v5529_v52 = vld [vmem:[%s10297_s3 + $0x3a0] sm:$0xf]  ;;  %v6753_v12 = vld [vmem:[%s10297_s3 + $0x48c] sm:$0xf0] }
  0xe5   :  { %2367 = vmatpush.bf16.msrb.mxu2 %v5402_v26  ;;  %v6673_v26 = vld [vmem:[%s10297_s3 + $0x20c] sm:$0xf0]  ;;  %v5193_v8 = vld [vmem:[%s10297_s3 + $0x100] sm:$0xf]  ;;  %v5530_v24 = vor.u32 %v6725_v29, %v5529_v52 }
  0xe6   :  { %1084 = vmatpush.bf16.msra.mxu3 %v10328_v7  ;;  %v5322_v3 = vor.u32 %v6673_v26, %v5321_v18  ;;  %v5833_v22 = vld [vmem:[%s10297_s3 + $0x600] sm:$0xf]  ;;  %v5194_v30 = vor.u32 %v6641_v21, %v5193_v8  ;;  %v6793_v2 = vld [vmem:[%s10297_s3 + $0x5cc] sm:$0xf0] }
  0xe7   :  { %2341 = vmatpush.bf16.msrb.mxu0 %v5114_v61  ;;  %v5546_v61 = vor.u32 %v6729_v5, %v5545_v57  ;;  %v5641_v1 = vld [vmem:[%s10297_s3 + $0x480] sm:$0xf]  ;;  %v5834_v35 = vor.u32 %v6801_v10, %v5833_v22  ;;  %v6749_v54 = vld [vmem:[%s10297_s3 + $0x46c] sm:$0xf0]  ;;  %v6659_v57 = vld [vmem:[%s10297_s3 + $0x1a4] sm:$0xf] }
  0xe8   :  { %2352 = vmatpush.bf16.msra.mxu1 %v5290_v56  ;;  %v5209_v56 = vld [vmem:[%s10297_s3 + $0x120] sm:$0xf]  ;;  %v5275_v5 = vld [vmem:[%s10297_s3 + $0x1b0] sm:$0xf0]  ;;  %v6713_v31 = vld [vmem:[%s10297_s3 + $0x34c] sm:$0xf0] }
  0xe9   :  { %2368 = vmatpush.bf16.msrb.mxu2 %v5386_v17  ;;  %v5657_v17 = vld [vmem:[%s10297_s3 + $0x4a0] sm:$0xf]  ;;  %v5210_v7 = vor.u32 %v6645_v48, %v5209_v56  ;;  %v6745_v18 = vld [vmem:[%s10297_s3 + $0x44c] sm:$0xf0]  ;;  %v5243_v22 = vld [vmem:[%s10297_s3 + $0x170] sm:$0xf0] }
  0xea   :  { %1085 = vmatpush.bf16.msra.mxu3 %v10329_v11  ;;  %v5307_v11 = vld [vmem:[%s10297_s3 + $0x1f0] sm:$0xf0]  ;;  %v5801_v28 = vld [vmem:[%s10297_s3 + $0x5c0] sm:$0xf]  ;;  %v6785_v56 = vld [vmem:[%s10297_s3 + $0x58c] sm:$0xf0] }
  0xeb   :  { %2342 = vmatpush.bf16.msrb.mxu0 %v5098_v19  ;;  %v5850_v19 = vor.u32 %v6805_v63, %v5849_v49  ;;  %v5310_v47 = vor.u32 %v6667_v36, %v5307_v11  ;;  %v5625_v44 = vld [vmem:[%s10297_s3 + $0x460] sm:$0xf]  ;;  %v5802_v59 = vor.u32 %v6793_v2, %v5801_v28  ;;  %v6709_v63 = vld [vmem:[%s10297_s3 + $0x32c] sm:$0xf0]  ;;  %v5179_v36 = vld [vmem:[%s10297_s3 + $0xf0] sm:$0xf0] }
  0xec   :  { %2353 = vmatpush.bf16.msra.mxu1 %v5274_v41  ;;  %v6757_v41 = vld [vmem:[%s10297_s3 + $0x4ac] sm:$0xf0]  ;;  %v5626_v43 = vor.u32 %v6749_v54, %v5625_v44  ;;  %v5481_v0 = vld [vmem:[%s10297_s3 + $0x340] sm:$0xf]  ;;  %v6699_v11 = vld [vmem:[%s10297_s3 + $0x2e4] sm:$0xf] }
  0xed   :  { %2369 = vmatpush.bf16.msrb.mxu2 %v5370_v27  ;;  %5062 = vmatmul.msk.bf16.vlgmr.msrb.gmra.mxu1 %vm873_vm0, %v1006_v55  ;;  %v5658_v9 = vor.u32 %v6757_v41, %v5657_v17  ;;  %v5817_v27 = vld [vmem:[%s10297_s3 + $0x5e0] sm:$0xf]  ;;  %v5642_v55 = vor.u32 %v6753_v12, %v5641_v1  ;;  %v5482_v48 = vor.u32 %v6713_v31, %v5481_v0  ;;  %v6741_v29 = vld [vmem:[%s10297_s3 + $0x42c] sm:$0xf0]  ;;  %v6647_v2 = vld [vmem:[%s10297_s3 + $0x144] sm:$0xf] }
  0xee   :  { %1086 = vmatpush.bf16.msra.mxu3 %v10330_v45  ;;  %v5497_v45 = vld [vmem:[%s10297_s3 + $0x360] sm:$0xf]  ;;  %v5403_v0 = vld [vmem:[%s10297_s3 + $0x2b0] sm:$0xf0] }
  0xef   :  { %2343 = vmatpush.bf16.msrb.mxu0 %v5082_v4  ;;  %v5513_v4 = vld [vmem:[%s10297_s3 + $0x380] sm:$0xf] }
  0xf0   :  { %2354 = vmatpush.bf16.msra.mxu1 %v5258_v25  ;;  %v6797_v25 = vld [vmem:[%s10297_s3 + $0x5ec] sm:$0xf0]  ;;  %v5514_v51 = vor.u32 %v6721_v16, %v5513_v4  ;;  %v5769_v26 = vld [vmem:[%s10297_s3 + $0x580] sm:$0xf]  ;;  %v5435_v4 = vld [vmem:[%s10297_s3 + $0x2f0] sm:$0xf0] }
  0xf1   :  { %2370 = vmatpush.bf16.msrb.mxu2 %v5354_v39  ;;  %v5818_v46 = vor.u32 %v6797_v25, %v5817_v27  ;;  %v6663_v39 = vld [vmem:[%s10297_s3 + $0x1c4] sm:$0xf]  ;;  %v5465_v49 = vld [vmem:[%s10297_s3 + $0x320] sm:$0xf]  ;;  %v5770_v17 = vor.u32 %v6785_v56, %v5769_v26  ;;  %v6737_v27 = vld [vmem:[%s10297_s3 + $0x40c] sm:$0xf0]  ;;  %v5438_v28 = vor.u32 %v6699_v11, %v5435_v4 }
  0xf2   :  { %1087 = vmatpush.bf16.msra.mxu3 %v10331_v58  ;;  %v5593_v52 = vld [vmem:[%s10297_s3 + $0x420] sm:$0xf]  ;;  %v5466_v8 = vor.u32 %v6709_v63, %v5465_v49  ;;  %v6635_v25 = vld [vmem:[%s10297_s3 + $0xe4] sm:$0xf]  ;;  %v5819_v49 = vld [vmem:[%s10297_s3 + $0x5f0] sm:$0xf0] }
  0xf3   :  { %2344 = vmatpush.bf16.msrb.mxu0 %v5066_v14  ;;  %v6717_v14 = vld [vmem:[%s10297_s3 + $0x36c] sm:$0xf0]  ;;  %v5594_v21 = vor.u32 %v6741_v29, %v5593_v52  ;;  %v5577_v10 = vld [vmem:[%s10297_s3 + $0x400] sm:$0xf]  ;;  %v6623_v63 = vld [vmem:[%s10297_s3 + $0x84] sm:$0xf] }
  0xf4   :  { %2355 = vmatpush.bf16.msra.mxu1 %v5242_v53  ;;  %v5291_v53 = vld [vmem:[%s10297_s3 + $0x1d0] sm:$0xf0]  ;;  %v5498_v33 = vor.u32 %v6717_v14, %v5497_v45  ;;  %v5721_v54 = vld [vmem:[%s10297_s3 + $0x520] sm:$0xf]  ;;  %v6687_v29 = vld [vmem:[%s10297_s3 + $0x284] sm:$0xf] }
  0xf5   :  { %2371 = vmatpush.bf16.msrb.mxu2 %v5338_v34  ;;  %1088 = vmatmul.bf16.vlgmr.msra.gmra.mxu3 %v1005_v60  ;;  %v5294_v42 = vor.u32 %v6663_v39, %v5291_v53  ;;  %v5609_v34 = vld [vmem:[%s10297_s3 + $0x440] sm:$0xf]  ;;  %v5163_v39 = vld [vmem:[%s10297_s3 + $0xd0] sm:$0xf0]  ;;  %v6695_v53 = vld [vmem:[%s10297_s3 + $0x2c4] sm:$0xf] }
  0xf6   :  { %2379 = vmatpush.bf16.msrb.mxu3 %v5562_v62  ;;  %2345 = vmatmul.bf16.vlgmr.msrb.gmra.mxu0 %v7671_v32  ;;  %v5785_v62 = vld [vmem:[%s10297_s3 + $0x5a0] sm:$0xf]  ;;  %v5610_v60 = vor.u32 %v6745_v18, %v5609_v34  ;;  %v5419_v45 = vld [vmem:[%s10297_s3 + $0x2d0] sm:$0xf0] }
  0xf7   :  { %2393 = vmatpush.bf16.msra.mxu0 %v5690_v38  ;;  %v6789_v38 = vld [vmem:[%s10297_s3 + $0x5ac] sm:$0xf0]  ;;  %v5705_v18 = vld [vmem:[%s10297_s3 + $0x500] sm:$0xf]  ;;  %v5131_v52 = vld [vmem:[%s10297_s3 + $0x90] sm:$0xf0] }
  0xf8   :  { %2356 = vmatpush.bf16.msra.mxu1 %v5226_v40  ;;  %v5786_v58 = vor.u32 %v6789_v38, %v5785_v62  ;;  %v5278_v40 = vor.u32 %v6659_v57, %v5275_v5  ;;  %v5422_v62 = vor.u32 %v6695_v53, %v5419_v45  ;;  %v6643_v38 = vld [vmem:[%s10297_s3 + $0x124] sm:$0xf]  ;;  %v5147_v57 = vld [vmem:[%s10297_s3 + $0xb0] sm:$0xf0] }
  0xf9   :  { %2372 = vmatpush.bf16.msrb.mxu2 %v5322_v3  ;;  %v5753_v3 = vld [vmem:[%s10297_s3 + $0x560] sm:$0xf]  ;;  %v6691_v5 = vld [vmem:[%s10297_s3 + $0x2a4] sm:$0xf]  ;;  %v5371_v11 = vld [vmem:[%s10297_s3 + $0x270] sm:$0xf0] }
  0xfa   :  { %2380 = vmatpush.bf16.msrb.mxu3 %v5546_v61  ;;  %v6655_v61 = vld [vmem:[%s10297_s3 + $0x184] sm:$0xf]  ;;  %v5406_v56 = vor.u32 %v6691_v5, %v5403_v0 }
  0xfb   :  { %2394 = vmatpush.bf16.msra.mxu0 %v5674_v15  ;;  %v5259_v15 = vld [vmem:[%s10297_s3 + $0x190] sm:$0xf0]  ;;  %v6719_v45 = vld [vmem:[%s10297_s3 + $0x384] sm:$0xf] }
  0xfc   :  { %2357 = vmatpush.bf16.msra.mxu1 %v5210_v7  ;;  %2373 = vmatmul.bf16.vlgmr.msrb.gmra.mxu2 %v7706_v20  ;;  %v5262_v41 = vor.u32 %v6655_v61, %v5259_v15  ;;  %v6781_v7 = vld [vmem:[%s10297_s3 + $0x56c] sm:$0xf0]  ;;  %v5563_v61 = vld [vmem:[%s10297_s3 + $0x3f0] sm:$0xf0]  ;;  %v6795_v15 = vld [vmem:[%s10297_s3 + $0x5e4] sm:$0xf] }
  0xfd   :  { %2427 = vmatpush.bf16.msra.mxu2 %v5850_v19  ;;  %v6651_v19 = vld [vmem:[%s10297_s3 + $0x164] sm:$0xf]  ;;  %v5754_v16 = vor.u32 %v6781_v7, %v5753_v3 }
  0xfe   :  { %2381 = vmatpush.bf16.msrb.mxu3 %v5530_v24  ;;  %v5449_v24 = vld [vmem:[%s10297_s3 + $0x300] sm:$0xf]  ;;  %v5246_v1 = vor.u32 %v6651_v19, %v5243_v22  ;;  %v5822_v19 = vor.u32 %v6795_v15, %v5819_v49  ;;  %v5134_v22 = vor.u32 %v6623_v63, %v5131_v52  ;;  %v6715_v0 = vld [vmem:[%s10297_s3 + $0x364] sm:$0xf]  ;;  %v5691_v15 = vld [vmem:[%s10297_s3 + $0x4f0] sm:$0xf0] }
  0xff   :  { %2395 = vmatpush.bf16.msra.mxu0 %v5658_v9  ;;  %v6705_v9 = vld [vmem:[%s10297_s3 + $0x30c] sm:$0xf0]  ;;  %v6803_v49 = vld [vmem:[%s10297_s3 + $0x624] sm:$0xf]  ;;  %v5851_v63 = vld [vmem:[%s10297_s3 + $0x630] sm:$0xf0] }
 0x100   :  { %2358 = vmatpush.bf16.msra.mxu1 %v5194_v30  ;;  %v5450_v12 = vor.u32 %v6705_v9, %v5449_v24  ;;  %v5578_v30 = vor.u32 %v6737_v27, %v5577_v10  ;;  %v6791_v9 = vld [vmem:[%s10297_s3 + $0x5c4] sm:$0xf]  ;;  %v5803_v10 = vld [vmem:[%s10297_s3 + $0x5d0] sm:$0xf0] }
 0x101   :  { %2428 = vmatpush.bf16.msra.mxu2 %v5834_v35  ;;  %v5737_v35 = vld [vmem:[%s10297_s3 + $0x540] sm:$0xf]  ;;  %v6619_v27 = vld [vmem:[%s10297_s3 + $0x64] sm:$0xf] }
 0x102   :  { %2382 = vmatpush.bf16.msrb.mxu3 %v5514_v51  ;;  %v5227_v51 = vld [vmem:[%s10297_s3 + $0x150] sm:$0xf0] }
 0x103   :  { %2396 = vmatpush.bf16.msra.mxu0 %v5642_v55  ;;  %2359 = vmatmul.bf16.vlgmr.msra.gmra.mxu1 %v7678_v37  ;;  %v6631_v55 = vld [vmem:[%s10297_s3 + $0xc4] sm:$0xf]  ;;  %v5230_v44 = vor.u32 %v6647_v2, %v5227_v51  ;;  %v5099_v2 = vld [vmem:[%s10297_s3 + $0x50] sm:$0xf0] }
 0x104   :  { %2407 = vmatpush.bf16.msrb.mxu1 %v5818_v46  ;;  %v6777_v46 = vld [vmem:[%s10297_s3 + $0x54c] sm:$0xf0]  ;;  %v6679_v51 = vld [vmem:[%s10297_s3 + $0x244] sm:$0xf] }
 0x105   :  { %2449 = vmatpush.bf16.msrb.mxu2 %v5310_v47  ;;  %v5182_v47 = vor.u32 %v6635_v25, %v5179_v36  ;;  %v5738_v14 = vor.u32 %v6777_v46, %v5737_v35  ;;  %v5115_v25 = vld [vmem:[%s10297_s3 + $0x70] sm:$0xf0]  ;;  %v6683_v36 = vld [vmem:[%s10297_s3 + $0x264] sm:$0xf] }
 0x106   :  { %2383 = vmatpush.bf16.msrb.mxu3 %v5498_v33  ;;  %v5211_v33 = vld [vmem:[%s10297_s3 + $0x130] sm:$0xf0]  ;;  %v5374_v35 = vor.u32 %v6683_v36, %v5371_v11  ;;  %v6787_v46 = vld [vmem:[%s10297_s3 + $0x5a4] sm:$0xf]  ;;  %v6702_v36 = vld [vmem:[%s10297_s3 + $0x2f4] sm:$0xf0] }
 0x107   :  { %2397 = vmatpush.bf16.msra.mxu0 %v5626_v43  ;;  %v6627_v43 = vld [vmem:[%s10297_s3 + $0xa4] sm:$0xf]  ;;  %v5214_v34 = vor.u32 %v6643_v38, %v5211_v33  ;;  %v5083_v38 = vld [vmem:[%s10297_s3 + $0x30] sm:$0xf0] }
 0x108   :  { %2408 = vmatpush.bf16.msrb.mxu1 %v5802_v59  ;;  %v6773_v59 = vld [vmem:[%s10297_s3 + $0x52c] sm:$0xf0]  ;;  %v5150_v26 = vor.u32 %v6627_v43, %v5147_v57  ;;  %v6675_v33 = vld [vmem:[%s10297_s3 + $0x224] sm:$0xf]  ;;  %v5339_v43 = vld [vmem:[%s10297_s3 + $0x230] sm:$0xf0] }
 0x109   :  { %2450 = vmatpush.bf16.msrb.mxu2 %v5294_v42  ;;  %v5166_v42 = vor.u32 %v6631_v55, %v5163_v39  ;;  %v5722_v31 = vor.u32 %v6773_v59, %v5721_v54  ;;  %v5355_v55 = vld [vmem:[%s10297_s3 + $0x250] sm:$0xf0]  ;;  %v6783_v59 = vld [vmem:[%s10297_s3 + $0x584] sm:$0xf] }
 0x10a   :  { %2384 = vmatpush.bf16.msrb.mxu3 %v5482_v48  ;;  %v5195_v48 = vld [vmem:[%s10297_s3 + $0x110] sm:$0xf0]  ;;  %v5358_v54 = vor.u32 %v6679_v51, %v5355_v55  ;;  %v5425_v51 = vld [vmem:[%s10297_s3 + $0x2c8] sm:$0xf]  ;;  %v6698_v55 = vld [vmem:[%s10297_s3 + $0x2d4] sm:$0xf0] }
 0x10b   :  { %2398 = vmatpush.bf16.msra.mxu0 %v5610_v60  ;;  %v6731_v60 = vld [vmem:[%s10297_s3 + $0x3e4] sm:$0xf] }
 0x10c   :  { %2409 = vmatpush.bf16.msrb.mxu1 %v5786_v58  ;;  %5863 = vmatmul.msk.bf16.vlgmr.msra.gmra.mxu2 %vm873_vm0, %v7766_v23  ;;  %v6769_v58 = vld [vmem:[%s10297_s3 + $0x50c] sm:$0xf0]  ;;  %v5566_v7 = vor.u32 %v6731_v60, %v5563_v61  ;;  %v5323_v60 = vld [vmem:[%s10297_s3 + $0x210] sm:$0xf0]  ;;  %v6763_v61 = vld [vmem:[%s10297_s3 + $0x4e4] sm:$0xf] }
 0x10d   :  { %2451 = vmatpush.bf16.msrb.mxu2 %v5278_v40  ;;  %v6639_v40 = vld [vmem:[%s10297_s3 + $0x104] sm:$0xf] }
 0x10e   :  { %2385 = vmatpush.bf16.msrb.mxu3 %v5466_v8  ;;  %v5198_v3 = vor.u32 %v6639_v40, %v5195_v48  ;;  %v6727_v8 = vld [vmem:[%s10297_s3 + $0x3c4] sm:$0xf]  ;;  %v5755_v40 = vld [vmem:[%s10297_s3 + $0x570] sm:$0xf0] }
 0x10f   :  { %2399 = vmatpush.bf16.msra.mxu0 %v5594_v21  ;;  %v5547_v21 = vld [vmem:[%s10297_s3 + $0x3d0] sm:$0xf0]  ;;  %v6671_v48 = vld [vmem:[%s10297_s3 + $0x204] sm:$0xf] }
 0x110   :  { %2410 = vmatpush.bf16.msrb.mxu1 %v5770_v17  ;;  %v5387_v17 = vld [vmem:[%s10297_s3 + $0x290] sm:$0xf0]  ;;  %v5550_v4 = vor.u32 %v6727_v8, %v5547_v21  ;;  %v5854_v8 = vor.u32 %v6803_v49, %v5851_v63  ;;  %v6775_v21 = vld [vmem:[%s10297_s3 + $0x544] sm:$0xf] }
 0x111   :  { %2452 = vmatpush.bf16.msrb.mxu2 %v5262_v41  ;;  %v5706_v41 = vor.u32 %v6769_v58, %v5705_v18  ;;  %v5390_v24 = vor.u32 %v6687_v29, %v5387_v17  ;;  %v5342_v58 = vor.u32 %v6675_v33, %v5339_v43  ;;  %v5569_v33 = vld [vmem:[%s10297_s3 + $0x3e8] sm:$0xf]  ;;  %v6734_v43 = vld [vmem:[%s10297_s3 + $0x3f4] sm:$0xf0]  ;;  %v6747_v49 = vld [vmem:[%s10297_s3 + $0x464] sm:$0xf] }
 0x112   :  { %2386 = vmatpush.bf16.msrb.mxu3 %v5450_v12  ;;  %v5531_v12 = vld [vmem:[%s10297_s3 + $0x3b0] sm:$0xf0] }
 0x113   :  { %2400 = vmatpush.bf16.msra.mxu0 %v5578_v30  ;;  %v5118_v30 = vor.u32 %v6619_v27, %v5115_v25  ;;  %v5835_v27 = vld [vmem:[%s10297_s3 + $0x610] sm:$0xf0]  ;;  %v5441_v25 = vld [vmem:[%s10297_s3 + $0x2e8] sm:$0xf] }
 0x114   :  { %2411 = vmatpush.bf16.msrb.mxu1 %v5754_v16  ;;  %v5806_v16 = vor.u32 %v6791_v9, %v5803_v10  ;;  %v5675_v9 = vld [vmem:[%s10297_s3 + $0x4d0] sm:$0xf0]  ;;  %v6799_v10 = vld [vmem:[%s10297_s3 + $0x604] sm:$0xf] }
 0x115   :  { %2453 = vmatpush.bf16.msrb.mxu2 %v5246_v1  ;;  %2387 = vmatmul.bf16.vlgmr.msrb.gmra.mxu3 %v7712_v50  ;;  %v6723_v1 = vld [vmem:[%s10297_s3 + $0x3a4] sm:$0xf]  ;;  %v5627_v63 = vld [vmem:[%s10297_s3 + $0x470] sm:$0xf0] }
 0x116   :  { %2435 = vmatpush.bf16.msra.mxu3 %v5182_v47  ;;  %2401 = vmatmul.bf16.vlgmr.msra.gmra.mxu0 %v7737_v13  ;;  %v5787_v47 = vld [vmem:[%s10297_s3 + $0x5b0] sm:$0xf0]  ;;  %v5534_v39 = vor.u32 %v6723_v1, %v5531_v12  ;;  %v5838_v12 = vor.u32 %v6799_v10, %v5835_v27  ;;  %v5377_v27 = vld [vmem:[%s10297_s3 + $0x268] sm:$0xf] }
 0x117   :  { %2463 = vmatpush.bf16.msrb.mxu0 %v5438_v28  ;;  %v6615_v28 = vld [vmem:[%s10297_s3 + $0x44] sm:$0xf]  ;;  %v5790_v53 = vor.u32 %v6787_v46, %v5787_v47  ;;  %v5723_v46 = vld [vmem:[%s10297_s3 + $0x530] sm:$0xf0]  ;;  %v5442_v47 = vor.u32 %v6702_v36, %v5441_v25  ;;  %v6686_v25 = vld [vmem:[%s10297_s3 + $0x274] sm:$0xf0] }
 0x118   :  { %2412 = vmatpush.bf16.msrb.mxu1 %v5738_v14  ;;  %v5515_v14 = vld [vmem:[%s10297_s3 + $0x390] sm:$0xf0] }
 0x119   :  { %2454 = vmatpush.bf16.msrb.mxu2 %v5230_v44  ;;  %v5102_v44 = vor.u32 %v6615_v28, %v5099_v2  ;;  %v5518_v57 = vor.u32 %v6719_v45, %v5515_v14  ;;  %v6755_v28 = vld [vmem:[%s10297_s3 + $0x4a4] sm:$0xf]  ;;  %v5659_v2 = vld [vmem:[%s10297_s3 + $0x4b0] sm:$0xf0] }
 0x11a   :  { %2436 = vmatpush.bf16.msra.mxu3 %v5166_v42  ;;  %v5771_v42 = vld [vmem:[%s10297_s3 + $0x590] sm:$0xf0]  ;;  %v6703_v45 = vld [vmem:[%s10297_s3 + $0x304] sm:$0xf] }
 0x11b   :  { %2464 = vmatpush.bf16.msrb.mxu0 %v5422_v62  ;;  %v6611_v62 = vld [vmem:[%s10297_s3 + $0x24] sm:$0xf]  ;;  %v5774_v5 = vor.u32 %v6783_v59, %v5771_v42  ;;  %v5451_v14 = vld [vmem:[%s10297_s3 + $0x310] sm:$0xf0]  ;;  %v5185_v42 = vld [vmem:[%s10297_s3 + $0xe8] sm:$0xf] }
 0x11c   :  { %2413 = vmatpush.bf16.msrb.mxu1 %v5722_v31  ;;  %v5499_v31 = vld [vmem:[%s10297_s3 + $0x370] sm:$0xf0]  ;;  %v5086_v18 = vor.u32 %v6611_v62, %v5083_v38  ;;  %v6638_v62 = vld [vmem:[%s10297_s3 + $0xf4] sm:$0xf0]  ;;  %v5426_v38 = vor.u32 %v6698_v55, %v5425_v51 }
 0x11d   :  { %2455 = vmatpush.bf16.msrb.mxu2 %v5214_v34  ;;  %v6779_v34 = vld [vmem:[%s10297_s3 + $0x564] sm:$0xf]  ;;  %v5502_v52 = vor.u32 %v6715_v0, %v5499_v31  ;;  %v5707_v59 = vld [vmem:[%s10297_s3 + $0x510] sm:$0xf0]  ;;  %v5409_v0 = vld [vmem:[%s10297_s3 + $0x2a8] sm:$0xf] }
 0x11e   :  { %2437 = vmatpush.bf16.msra.mxu3 %v5150_v26  ;;  %v6607_v26 = vld [vmem:[%s10297_s3 + $0x4] sm:$0xf]  ;;  %v5758_v29 = vor.u32 %v6779_v34, %v5755_v40  ;;  %v6694_v31 = vld [vmem:[%s10297_s3 + $0x2b4] sm:$0xf0]  ;;  %v5454_v34 = vor.u32 %v6703_v45, %v5451_v14  ;;  %v5570_v40 = vor.u32 %v6734_v43, %v5569_v33  ;;  %v5611_v10 = vld [vmem:[%s10297_s3 + $0x450] sm:$0xf0] }
 0x11f   :  { %2465 = vmatpush.bf16.msrb.mxu0 %v5406_v56  ;;  %v5067_v56 = vld [vmem:[%s10297_s3 + $0x10] sm:$0xf0]  ;;  %v6682_v51 = vld [vmem:[%s10297_s3 + $0x254] sm:$0xf0]  ;;  %v5121_v45 = vld [vmem:[%s10297_s3 + $0x68] sm:$0xf] }
 0x120   :  { %2414 = vmatpush.bf16.msrb.mxu1 %v5706_v41  ;;  %v5070_v17 = vor.u32 %v6607_v26, %v5067_v56  ;;  %v5326_v41 = vor.u32 %v6671_v48, %v5323_v60  ;;  %v5169_v26 = vld [vmem:[%s10297_s3 + $0xc8] sm:$0xf]  ;;  %v6634_v56 = vld [vmem:[%s10297_s3 + $0xd4] sm:$0xf0]  ;;  %v5410_v60 = vor.u32 %v6694_v31, %v5409_v0  ;;  %v5579_v43 = vld [vmem:[%s10297_s3 + $0x410] sm:$0xf0] }
 0x121   :  { %2456 = vmatpush.bf16.msrb.mxu2 %v5198_v3  ;;  %v6711_v3 = vld [vmem:[%s10297_s3 + $0x344] sm:$0xf]  ;;  %v6622_v14 = vld [vmem:[%s10297_s3 + $0x74] sm:$0xf0]  ;;  %v5313_v0 = vld [vmem:[%s10297_s3 + $0x1e8] sm:$0xf] }
 0x122   :  { %2438 = vmatpush.bf16.msra.mxu3 %v5134_v22  ;;  %v5739_v22 = vld [vmem:[%s10297_s3 + $0x550] sm:$0xf0]  ;;  %v6670_v31 = vld [vmem:[%s10297_s3 + $0x1f4] sm:$0xf0] }
 0x123   :  { %2466 = vmatpush.bf16.msrb.mxu0 %v5390_v24  ;;  %2415 = vmatmul.bf16.vlgmr.msrb.gmra.mxu1 %v7749_v6  ;;  %v6759_v24 = vld [vmem:[%s10297_s3 + $0x4c4] sm:$0xf] }
 0x124   :  { %2477 = vmatpush.bf16.msra.mxu1 %v5566_v7  ;;  %2457 = vmatmul.bf16.vlgmr.msrb.gmra.mxu2 %v7678_v37  ;;  %v5483_v7 = vld [vmem:[%s10297_s3 + $0x350] sm:$0xf0]  ;;  %v5678_v1 = vor.u32 %v6759_v24, %v5675_v9  ;;  %v6726_v24 = vld [vmem:[%s10297_s3 + $0x3b4] sm:$0xf0]  ;;  %v6743_v9 = vld [vmem:[%s10297_s3 + $0x444] sm:$0xf] }
 0x125   :  { %2505 = vmatpush.bf16.msra.mxu2 %v5822_v19  ;;  %v5694_v19 = vor.u32 %v6763_v61, %v5691_v15  ;;  %v5486_v11 = vor.u32 %v6711_v3, %v5483_v7  ;;  %v5553_v61 = vld [vmem:[%s10297_s3 + $0x3c8] sm:$0xf]  ;;  %v6730_v15 = vld [vmem:[%s10297_s3 + $0x3d4] sm:$0xf0] }
 0x126   :  { %2439 = vmatpush.bf16.msra.mxu3 %v5118_v30  ;;  %v5467_v30 = vld [vmem:[%s10297_s3 + $0x330] sm:$0xf0]  ;;  %v5554_v3 = vor.u32 %v6730_v15, %v5553_v61  ;;  %v5153_v7 = vld [vmem:[%s10297_s3 + $0xa8] sm:$0xf]  ;;  %v6714_v61 = vld [vmem:[%s10297_s3 + $0x354] sm:$0xf0]  ;;  %v5314_v15 = vor.u32 %v6670_v31, %v5313_v0 }
 0x127   :  { %2467 = vmatpush.bf16.msrb.mxu0 %v5374_v35  ;;  %v6771_v35 = vld [vmem:[%s10297_s3 + $0x524] sm:$0xf]  ;;  %v6664_v31 = vld [vmem:[%s10297_s3 + $0x1cc] sm:$0xf] }
 0x128   :  { %2478 = vmatpush.bf16.msra.mxu1 %v5550_v4  ;;  %v5742_v4 = vor.u32 %v6775_v21, %v5739_v22  ;;  %v5537_v22 = vld [vmem:[%s10297_s3 + $0x3a8] sm:$0xf] }
 0x129   :  { %2506 = vmatpush.bf16.msra.mxu2 %v5806_v16  ;;  %v6707_v16 = vld [vmem:[%s10297_s3 + $0x324] sm:$0xf] }
 0x12a   :  { %2440 = vmatpush.bf16.msra.mxu3 %v5102_v44  ;;  %v6767_v44 = vld [vmem:[%s10297_s3 + $0x504] sm:$0xf] }
 0x12b   :  { %2468 = vmatpush.bf16.msrb.mxu0 %v5358_v54  ;;  %v5662_v54 = vor.u32 %v6755_v28, %v5659_v2  ;;  %v5595_v28 = vld [vmem:[%s10297_s3 + $0x430] sm:$0xf0]  ;;  %v5361_v2 = vld [vmem:[%s10297_s3 + $0x248] sm:$0xf] }
 0x12c   :  { %2479 = vmatpush.bf16.msra.mxu1 %v5534_v39  ;;  %v5470_v39 = vor.u32 %v6707_v16, %v5467_v30  ;;  %v5137_v16 = vld [vmem:[%s10297_s3 + $0x88] sm:$0xf]  ;;  %v5378_v30 = vor.u32 %v6686_v25, %v5377_v27  ;;  %v6710_v25 = vld [vmem:[%s10297_s3 + $0x334] sm:$0xf0] }
 0x12d   :  { %2507 = vmatpush.bf16.msra.mxu2 %v5790_v53  ;;  %v5726_v53 = vor.u32 %v6771_v35, %v5723_v46  ;;  %v5521_v35 = vld [vmem:[%s10297_s3 + $0x388] sm:$0xf]  ;;  %v6722_v46 = vld [vmem:[%s10297_s3 + $0x394] sm:$0xf0] }
 0x12e   :  { %2441 = vmatpush.bf16.msra.mxu3 %v5086_v18  ;;  %v5710_v18 = vor.u32 %v6767_v44, %v5707_v59  ;;  %v5362_v59 = vor.u32 %v6682_v51, %v5361_v2  ;;  %v5473_v27 = vld [vmem:[%s10297_s3 + $0x328] sm:$0xf]  ;;  %v6610_v51 = vld [vmem:[%s10297_s3 + $0x14] sm:$0xf0] }
 0x12f   :  { %2469 = vmatpush.bf16.msrb.mxu0 %v5342_v58  ;;  %v5186_v58 = vor.u32 %v6638_v62, %v5185_v42  ;;  %v5505_v42 = vld [vmem:[%s10297_s3 + $0x368] sm:$0xf]  ;;  %v6718_v62 = vld [vmem:[%s10297_s3 + $0x374] sm:$0xf0]  ;;  %v5474_v2 = vor.u32 %v6710_v25, %v5473_v27  ;;  %v6628_v27 = vld [vmem:[%s10297_s3 + $0xac] sm:$0xf] }
 0x130   :  { %2480 = vmatpush.bf16.msra.mxu1 %v5518_v57  ;;  %v6751_v57 = vld [vmem:[%s10297_s3 + $0x484] sm:$0xf] }
 0x131   :  { %2508 = vmatpush.bf16.msra.mxu2 %v5774_v5  ;;  %v5643_v5 = vld [vmem:[%s10297_s3 + $0x490] sm:$0xf0] }
 0x132   :  { %2442 = vmatpush.bf16.msra.mxu3 %v5070_v17  ;;  %v5646_v48 = vor.u32 %v6751_v57, %v5643_v5  ;;  %v5345_v57 = vld [vmem:[%s10297_s3 + $0x228] sm:$0xf]  ;;  %v6678_v5 = vld [vmem:[%s10297_s3 + $0x234] sm:$0xf0] }
 0x133   :  { %2470 = vmatpush.bf16.msrb.mxu0 %v5326_v41  ;;  %v5170_v41 = vor.u32 %v6634_v56, %v5169_v26  ;;  %v8521_v44 = vpop.f32.mrf.mxu0  ;;  %v5346_v56 = vor.u32 %v6678_v5, %v5345_v57  ;;  %v5265_v57 = vld [vmem:[%s10297_s3 + $0x188] sm:$0xf]  ;;  %v6658_v5 = vld [vmem:[%s10297_s3 + $0x194] sm:$0xf0] }
 0x134   :  { %2481 = vmatpush.bf16.msra.mxu1 %v5502_v52  ;;  %v5393_v52 = vld [vmem:[%s10297_s3 + $0x288] sm:$0xf] }
 0x135   :  { %2509 = vmatpush.bf16.msra.mxu2 %v5758_v29  ;;  %2443 = vmatmul.bf16.vlgmr.msra.gmra.mxu3 %v7671_v32  ;;  %v6690_v29 = vld [vmem:[%s10297_s3 + $0x294] sm:$0xf0] }
 0x136   :  { %2491 = vmatpush.bf16.msrb.mxu3 %v5694_v19  ;;  %2471 = vmatmul.bf16.vlgmr.msrb.gmra.mxu0 %v7706_v20  ;;  %v6630_v19 = vld [vmem:[%s10297_s3 + $0xb4] sm:$0xf0]  ;;  %v5394_v21 = vor.u32 %v6690_v29, %v5393_v52 }
 0x137   :  { %2525 = vmatpush.bf16.msra.mxu0 %v5854_v8  ;;  %v5630_v8 = vor.u32 %v6747_v49, %v5627_v63  ;;  %v5297_v49 = vld [vmem:[%s10297_s3 + $0x1c8] sm:$0xf]  ;;  %v6674_v52 = vld [vmem:[%s10297_s3 + $0x214] sm:$0xf0] }
 0x138   :  { %2482 = vmatpush.bf16.msra.mxu1 %v5486_v11  ;;  %v8457_v17 = vpop.f32.mrf.mxu1  ;;  %v8485_v36 = vpop.f32.mrf.mxu3  ;;  %v5154_v11 = vor.u32 %v6630_v19, %v5153_v7  ;;  %v5329_v63 = vld [vmem:[%s10297_s3 + $0x208] sm:$0xf]  ;;  %v6666_v29 = vld [vmem:[%s10297_s3 + $0x1d4] sm:$0xf0] }
 0x139   :  { %2510 = vmatpush.bf16.msra.mxu2 %v5742_v4  ;;  %v5538_v4 = vor.u32 %v6726_v24, %v5537_v22  ;;  %v5089_v22 = vld [vmem:[%s10297_s3 + $0x28] sm:$0xf]  ;;  %v6614_v24 = vld [vmem:[%s10297_s3 + $0x34] sm:$0xf0] }
 0x13a   :  { %2492 = vmatpush.bf16.msrb.mxu3 %v5678_v1  ;;  %v6626_v1 = vld [vmem:[%s10297_s3 + $0x94] sm:$0xf0] }
 0x13b   :  { %2526 = vmatpush.bf16.msra.mxu0 %v5838_v12  ;;  %v5614_v12 = vor.u32 %v6743_v9, %v5611_v10  ;;  %v5298_v9 = vor.u32 %v6666_v29, %v5297_v49  ;;  %v6654_v29 = vld [vmem:[%s10297_s3 + $0x174] sm:$0xf0] }
 0x13c   :  { %2483 = vmatpush.bf16.msra.mxu1 %v5470_v39  ;;  %v5138_v39 = vor.u32 %v6626_v1, %v5137_v16  ;;  %v6662_v16 = vld [vmem:[%s10297_s3 + $0x1b4] sm:$0xf0]  ;;  %v5841_v1 = vld [vmem:[%s10297_s3 + $0x608] sm:$0xf] }
 0x13d   :  { %2511 = vmatpush.bf16.msra.mxu2 %v5726_v53  ;;  %v5522_v53 = vor.u32 %v6722_v46, %v5521_v35  ;;  %v5090_v35 = vor.u32 %v6614_v24, %v5089_v22  ;;  %v5073_v46 = vld [vmem:[%s10297_s3 + $0x8] sm:$0xf] }
 0x13e   :  { %2493 = vmatpush.bf16.msrb.mxu3 %v5662_v54  ;;  %v5074_v0 = vor.u32 %v6610_v51, %v5073_v46 }
 0x13f   :  { %2561 = vmatpush.bf16.msrb.mxu0 %v5442_v47  ;;  %v6739_v47 = vld [vmem:[%s10297_s3 + $0x424] sm:$0xf]  ;;  %v8532_v33 = vpop.f32.mrf.mxu2 }
 0x140   :  { %2484 = vmatpush.bf16.msra.mxu1 %v5454_v34  ;;  %v8513_v55 = vpop.f32.mrf.mxu1  ;;  %v5598_v54 = vor.u32 %v6739_v47, %v5595_v28  ;;  %v5122_v34 = vor.u32 %v6622_v14, %v5121_v45  ;;  %v6668_v47 = vld [vmem:[%s10297_s3 + $0x1ec] sm:$0xf]  ;;  %v5315_v28 = vld [vmem:[%s10297_s3 + $0x1f8] sm:$0xf0] }
 0x141   :  { %2512 = vmatpush.bf16.msra.mxu2 %v5710_v18  ;;  %v5506_v18 = vor.u32 %v6718_v62, %v5505_v42  ;;  %v6636_v42 = vld [vmem:[%s10297_s3 + $0xec] sm:$0xf] }
 0x142   :  { %2494 = vmatpush.bf16.msrb.mxu3 %v5646_v48  ;;  %v6618_v48 = vld [vmem:[%s10297_s3 + $0x54] sm:$0xf0] }
 0x143   :  { %2562 = vmatpush.bf16.msrb.mxu0 %v5426_v38  ;;  %2485 = vmatmul.bf16.vlgmr.msra.gmra.mxu1 %v7712_v50  ;;  %v6735_v38 = vld [vmem:[%s10297_s3 + $0x404] sm:$0xf] }
 0x144   :  { %2533 = vmatpush.bf16.msrb.mxu1 %v5186_v58  ;;  %2513 = vmatmul.bf16.vlgmr.msra.gmra.mxu2 %v7749_v6  ;;  %v5105_v58 = vld [vmem:[%s10297_s3 + $0x48] sm:$0xf]  ;;  %v5582_v26 = vor.u32 %v6735_v38, %v5579_v43  ;;  %v5318_v38 = vor.u32 %v6668_v47, %v5315_v28  ;;  %v5187_v43 = vld [vmem:[%s10297_s3 + $0xf8] sm:$0xf0] }
 0x145   :  { %2575 = vmatpush.bf16.msrb.mxu2 %v5570_v40  ;;  %v8552_v40 = vpop.f32.mrf.mxu3  ;;  %v5106_v7 = vor.u32 %v6618_v48, %v5105_v58  ;;  %v5266_v48 = vor.u32 %v6658_v5, %v5265_v57  ;;  %v5633_v5 = vld [vmem:[%s10297_s3 + $0x468] sm:$0xf] }
 0x146   :  { %2495 = vmatpush.bf16.msrb.mxu3 %v5630_v8  ;;  %5864 = vmatmul.msk.bf16.vlgmr.msra.gmra.mxu0 %vm873_vm0, %v7766_v23 }
 0x147   :  { %2563 = vmatpush.bf16.msrb.mxu0 %v5410_v60  ;;  %v5489_v60 = vld [vmem:[%s10297_s3 + $0x348] sm:$0xf] }
 0x148   :  { %2534 = vmatpush.bf16.msrb.mxu1 %v5170_v41  ;;  %v5857_v41 = vld [vmem:[%s10297_s3 + $0x628] sm:$0xf]  ;;  %v5490_v19 = vor.u32 %v6714_v61, %v5489_v60  ;;  %v6762_v61 = vld [vmem:[%s10297_s3 + $0x4d4] sm:$0xf0] }
 0x149   :  { %2576 = vmatpush.bf16.msrb.mxu2 %v5554_v3  ;;  %v6806_v3 = vld [vmem:[%s10297_s3 + $0x634] sm:$0xf0]  ;;  %v5681_v60 = vld [vmem:[%s10297_s3 + $0x4c8] sm:$0xf] }
 0x14a   :  { %2496 = vmatpush.bf16.msrb.mxu3 %v5614_v12  ;;  %v8581_v8 = vpop.f32.mrf.mxu1  ;;  %v5858_v10 = vor.u32 %v6806_v3, %v5857_v41  ;;  %v6802_v12 = vld [vmem:[%s10297_s3 + $0x614] sm:$0xf0]  ;;  %v6660_v41 = vld [vmem:[%s10297_s3 + $0x1ac] sm:$0xf]  ;;  %v5283_v3 = vld [vmem:[%s10297_s3 + $0x1b8] sm:$0xf0] }
 0x14b   :  { %2564 = vmatpush.bf16.msrb.mxu0 %v5394_v21  ;;  %v5330_v21 = vor.u32 %v6674_v52, %v5329_v63  ;;  %v5842_v14 = vor.u32 %v6802_v12, %v5841_v1  ;;  %v5171_v63 = vld [vmem:[%s10297_s3 + $0xd8] sm:$0xf0]  ;;  %v5249_v52 = vld [vmem:[%s10297_s3 + $0x168] sm:$0xf]  ;;  %v6650_v12 = vld [vmem:[%s10297_s3 + $0x154] sm:$0xf0] }
 0x14c   :  { %2535 = vmatpush.bf16.msrb.mxu1 %v5154_v11  ;;  %v5281_v11 = vld [vmem:[%s10297_s3 + $0x1a8] sm:$0xf]  ;;  %v5250_v24 = vor.u32 %v6654_v29, %v5249_v52  ;;  %v5235_v52 = vld [vmem:[%s10297_s3 + $0x158] sm:$0xf0] }
 0x14d   :  { %2577 = vmatpush.bf16.msrb.mxu2 %v5538_v4  ;;  %v8598_v4 = vpop.f32.mrf.mxu0  ;;  %v5282_v45 = vor.u32 %v6662_v16, %v5281_v11  ;;  %v8639_v62 = vpop.f32.mrf.mxu3  ;;  %v5286_v11 = vor.u32 %v6660_v41, %v5283_v3  ;;  %v5155_v16 = vld [vmem:[%s10297_s3 + $0xb8] sm:$0xf0]  ;;  %v5233_v1 = vld [vmem:[%s10297_s3 + $0x148] sm:$0xf] }
 0x14e   :  { %2497 = vmatpush.bf16.msrb.mxu3 %v5598_v54  ;;  %v5697_v54 = vld [vmem:[%s10297_s3 + $0x4e8] sm:$0xf]  ;;  %v903_v25 = vadd.f32 %v8598_v4, %v8552_v40  ;;  %v6656_v40 = vld [vmem:[%s10297_s3 + $0x18c] sm:$0xf]  ;;  %v5267_v4 = vld [vmem:[%s10297_s3 + $0x198] sm:$0xf0]  ;;  %v5234_v51 = vor.u32 %v6650_v12, %v5233_v1 }
 0x14f   :  { %2565 = vmatpush.bf16.msrb.mxu0 %v5378_v30  ;;  %v8609_v30 = vpop.f32.mrf.mxu2  ;;  %v5809_v1 = vld [vmem:[%s10297_s3 + $0x5c8] sm:$0xf]  ;;  %v6794_v12 = vld [vmem:[%s10297_s3 + $0x5d4] sm:$0xf0] }
 0x150   :  { %2536 = vmatpush.bf16.msrb.mxu1 %v5138_v39  ;;  %v5457_v39 = vld [vmem:[%s10297_s3 + $0x308] sm:$0xf] }
 0x151   :  { %2578 = vmatpush.bf16.msrb.mxu2 %v5522_v53  ;;  %v6706_v53 = vld [vmem:[%s10297_s3 + $0x314] sm:$0xf0] }
 0x152   :  { %2498 = vmatpush.bf16.msrb.mxu3 %v5582_v26  ;;  %v8657_v58 = vpop.f32.mrf.mxu1 }
 0x153   :  { %2566 = vmatpush.bf16.msrb.mxu0 %v5362_v59  ;;  %v6766_v59 = vld [vmem:[%s10297_s3 + $0x4f4] sm:$0xf0] }
 0x154   :  { %2537 = vmatpush.bf16.msrb.mxu1 %v5122_v34  ;;  %v5299_v34 = vld [vmem:[%s10297_s3 + $0x1d8] sm:$0xf0]  ;;  %v5698_v26 = vor.u32 %v6766_v59, %v5697_v54  ;;  %v5217_v54 = vld [vmem:[%s10297_s3 + $0x128] sm:$0xf]  ;;  %v6646_v59 = vld [vmem:[%s10297_s3 + $0x134] sm:$0xf0] }
 0x155   :  { %2579 = vmatpush.bf16.msrb.mxu2 %v5506_v18  ;;  %2499 = vmatmul.bf16.vlgmr.msrb.gmra.mxu3 %v7737_v13  ;;  %v5458_v18 = vor.u32 %v6706_v53, %v5457_v39  ;;  %v5302_v49 = vor.u32 %v6664_v31, %v5299_v34  ;;  %v944_v46 = vpop.f32.mrf.mxu3  ;;  %v5649_v39 = vld [vmem:[%s10297_s3 + $0x488] sm:$0xf]  ;;  %v6754_v53 = vld [vmem:[%s10297_s3 + $0x494] sm:$0xf0]  ;;  %v5218_v31 = vor.u32 %v6646_v59, %v5217_v54  ;;  %v5203_v54 = vld [vmem:[%s10297_s3 + $0x118] sm:$0xf0] }
 0x156   :  { %2547 = vmatpush.bf16.msra.mxu3 %v5314_v15  ;;  %v6632_v15 = vld [vmem:[%s10297_s3 + $0xcc] sm:$0xf]  ;;  %v5650_v57 = vor.u32 %v6754_v53, %v5649_v39  ;;  %v6750_v34 = vld [vmem:[%s10297_s3 + $0x474] sm:$0xf0]  ;;  %v5810_v53 = vor.u32 %v6794_v12, %v5809_v1  ;;  %v5585_v59 = vld [vmem:[%s10297_s3 + $0x408] sm:$0xf] }
 0x157   :  { %2567 = vmatpush.bf16.msrb.mxu0 %v5346_v56  ;;  %v5190_v56 = vor.u32 %v6636_v42, %v5187_v43  ;;  %v5174_v22 = vor.u32 %v6632_v15, %v5171_v63  ;;  %v6652_v42 = vld [vmem:[%s10297_s3 + $0x16c] sm:$0xf]  ;;  %v5825_v15 = vld [vmem:[%s10297_s3 + $0x5e8] sm:$0xf]  ;;  %v5634_v3 = vor.u32 %v6750_v34, %v5633_v5 }
 0x158   :  { %2538 = vmatpush.bf16.msrb.mxu1 %v5106_v7  ;;  %v8683_v7 = vpop.f32.mrf.mxu0  ;;  %v6648_v63 = vld [vmem:[%s10297_s3 + $0x14c] sm:$0xf] }
 0x159   :  { %2580 = vmatpush.bf16.msrb.mxu2 %v5490_v19  ;;  %v5682_v19 = vor.u32 %v6762_v61, %v5681_v60  ;;  %v5201_v60 = vld [vmem:[%s10297_s3 + $0x108] sm:$0xf]  ;;  %v6642_v61 = vld [vmem:[%s10297_s3 + $0x114] sm:$0xf0]  ;;  %v6612_v39 = vld [vmem:[%s10297_s3 + $0x2c] sm:$0xf] }
 0x15a   :  { %2548 = vmatpush.bf16.msra.mxu3 %v5298_v9  ;;  %v5665_v9 = vld [vmem:[%s10297_s3 + $0x4a8] sm:$0xf]  ;;  %v8717_v47 = vpop.f32.mrf.mxu1  ;;  %v6796_v5 = vld [vmem:[%s10297_s3 + $0x5ec] sm:$0xf] }
 0x15b   :  { %2568 = vmatpush.bf16.msrb.mxu0 %v5330_v21  ;;  %v8685_v21 = vpop.f32.mrf.mxu2  ;;  %v6608_v34 = vld [vmem:[%s10297_s3 + $0xc] sm:$0xf] }
 0x15c   :  { %2539 = vmatpush.bf16.msrb.mxu1 %v5090_v35  ;;  %v901_v35 = vadd.f32 %v8521_v44, %v8485_v36  ;;  %v6624_v36 = vld [vmem:[%s10297_s3 + $0x8c] sm:$0xf]  ;;  %v917_v44 = vadd.f32 %v8513_v55, %v903_v25  ;;  %v5251_v55 = vld [vmem:[%s10297_s3 + $0x178] sm:$0xf0]  ;;  %v5238_v25 = vor.u32 %v6648_v63, %v5235_v52  ;;  %v5777_v63 = vld [vmem:[%s10297_s3 + $0x588] sm:$0xf] }
 0x15d   :  { %2581 = vmatpush.bf16.msrb.mxu2 %v5474_v2  ;;  %v5158_v2 = vor.u32 %v6628_v27, %v5155_v16  ;;  %v1033_v27 = vpop.f32.mrf.mxu3  ;;  %v5107_v16 = vld [vmem:[%s10297_s3 + $0x58] sm:$0xf0]  ;;  %v6786_v52 = vld [vmem:[%s10297_s3 + $0x594] sm:$0xf0] }
 0x15e   :  { %2569 = vmatmul.bf16.vlgmr.msrb.gmra.mxu0 %v7706_v20  ;;  %2549 = vmatpush.bf16.msra.mxu3 %v5282_v45  ;;  %v5270_v45 = vor.u32 %v6656_v40, %v5267_v4  ;;  %v931_v43 = vadd.f32 %v8609_v30, %v917_v44  ;;  %v5123_v30 = vld [vmem:[%s10297_s3 + $0x78] sm:$0xf0]  ;;  %v6644_v40 = vld [vmem:[%s10297_s3 + $0x12c] sm:$0xf] }
 0x15f   :  { %2623 = vmatpush.bf16.msra.mxu0 %v5858_v10  ;;  %v6758_v10 = vld [vmem:[%s10297_s3 + $0x4b4] sm:$0xf0]  ;;  %v5219_v4 = vld [vmem:[%s10297_s3 + $0x138] sm:$0xf0] }
 0x160   :  { %2540 = vmatpush.bf16.msrb.mxu1 %v5074_v0  ;;  %v5666_v28 = vor.u32 %v6758_v10, %v5665_v9  ;;  %v6746_v9 = vld [vmem:[%s10297_s3 + $0x454] sm:$0xf0]  ;;  %v5091_v44 = vld [vmem:[%s10297_s3 + $0x38] sm:$0xf0] }
 0x161   :  { %2582 = vmatpush.bf16.msrb.mxu2 %v5458_v18 }
 0x162   :  { %2550 = vmatpush.bf16.msra.mxu3 %v5266_v48  ;;  %v5254_v48 = vor.u32 %v6652_v42, %v5251_v55  ;;  %v8782_v41 = vpop.f32.mrf.mxu1 }
 0x163   :  { %2624 = vmatpush.bf16.msra.mxu0 %v5842_v14  ;;  %2541 = vmatmul.bf16.vlgmr.msrb.gmra.mxu1 %v7671_v32  ;;  %v5139_v14 = vld [vmem:[%s10297_s3 + $0x98] sm:$0xf0] }
 0x164   :  { %2589 = vmatpush.bf16.msra.mxu1 %v5698_v26  ;;  %2583 = vmatmul.bf16.vlgmr.msrb.gmra.mxu2 %v7712_v50  ;;  %v5142_v0 = vor.u32 %v6624_v36, %v5139_v14  ;;  %v958_v26 = vpop.f32.mrf.mxu0  ;;  %v5222_v36 = vor.u32 %v6644_v40, %v5219_v4  ;;  %v6790_v14 = vld [vmem:[%s10297_s3 + $0x5b4] sm:$0xf0]  ;;  %v5683_v40 = vld [vmem:[%s10297_s3 + $0x4d8] sm:$0xf0]  ;;  %v5761_v4 = vld [vmem:[%s10297_s3 + $0x568] sm:$0xf] }
 0x165   :  { %2631 = vmatpush.bf16.msra.mxu2 %v5190_v56  ;;  %v945_v56 = vadd.f32 %v944_v46, %v931_v43 }
 0x166   :  { %2551 = vmatpush.bf16.msra.mxu3 %v5250_v24  ;;  %v5617_v24 = vld [vmem:[%s10297_s3 + $0x448] sm:$0xf] }
 0x167   :  { %2645 = vmatpush.bf16.msrb.mxu0 %v5318_v38  ;;  %v915_v38 = vadd.f32 %v8457_v17, %v901_v35  ;;  %v6620_v17 = vld [vmem:[%s10297_s3 + $0x6c] sm:$0xf]  ;;  %v959_v10 = vadd.f32 %v958_v26, %v945_v56  ;;  %v5618_v46 = vor.u32 %v6746_v9, %v5617_v24 }
 0x168   :  { %2590 = vmatpush.bf16.msra.mxu1 %v5682_v19  ;;  %v5126_v19 = vor.u32 %v6620_v17, %v5123_v30  ;;  %v5075_v17 = vld [vmem:[%s10297_s3 + $0x18] sm:$0xf0]  ;;  %v6700_v30 = vld [vmem:[%s10297_s3 + $0x2ec] sm:$0xf] }
 0x169   :  { %2632 = vmatpush.bf16.msra.mxu2 %v5174_v22  ;;  %v929_v18 = vadd.f32 %v8532_v33, %v915_v38  ;;  %v6798_v33 = vld [vmem:[%s10297_s3 + $0x5f4] sm:$0xf0]  ;;  %v5202_v22 = vor.u32 %v6642_v61, %v5201_v60  ;;  %v6764_v60 = vld [vmem:[%s10297_s3 + $0x4ec] sm:$0xf]  ;;  %v1034_v61 = vadd.f32 %v1033_v27, %v8685_v21  ;;  %v5078_v21 = vor.u32 %v6608_v34, %v5075_v17  ;;  %v5395_v17 = vld [vmem:[%s10297_s3 + $0x298] sm:$0xf0] }
 0x16a   :  { %2552 = vmatpush.bf16.msra.mxu3 %v5234_v51  ;;  %v6742_v51 = vld [vmem:[%s10297_s3 + $0x434] sm:$0xf0]  ;;  %v8841_v38 = vpop.f32.mrf.mxu1  ;;  %v6792_v9 = vld [vmem:[%s10297_s3 + $0x5cc] sm:$0xf] }
 0x16b   :  { %2646 = vmatpush.bf16.msrb.mxu0 %v5302_v49  ;;  %v8768_v49 = vpop.f32.mrf.mxu2  ;;  %v943_v29 = vadd.f32 %v8639_v62, %v929_v18  ;;  %v5826_v62 = vor.u32 %v6798_v33, %v5825_v15  ;;  %v5699_v33 = vld [vmem:[%s10297_s3 + $0x4f8] sm:$0xf0]  ;;  %v1048_v1 = vadd.f32 %v8717_v47, %v1034_v61 }
 0x16c   :  { %2591 = vmatpush.bf16.msra.mxu1 %v5666_v28  ;;  %v8838_v55 = vpop.f32.mrf.mxu0  ;;  %v5702_v27 = vor.u32 %v6764_v60, %v5699_v33  ;;  %v6774_v60 = vld [vmem:[%s10297_s3 + $0x534] sm:$0xf0] }
 0x16d   :  { %2633 = vmatpush.bf16.msra.mxu2 %v5158_v2  ;;  %v957_v35 = vadd.f32 %v8683_v7, %v943_v29  ;;  %v5601_v2 = vld [vmem:[%s10297_s3 + $0x428] sm:$0xf]  ;;  %v973_v7 = vadd.f32 %v8657_v58, %v959_v10  ;;  %v6640_v58 = vld [vmem:[%s10297_s3 + $0x10c] sm:$0xf]  ;;  %v5811_v10 = vld [vmem:[%s10297_s3 + $0x5d8] sm:$0xf0] }
 0x16e   :  { %5865 = vmatmul.msk.bf16.vlgmr.msra.gmra.mxu0 %vm873_vm0, %v7766_v23  ;;  %2553 = vmatpush.bf16.msra.mxu3 %v5218_v31  ;;  %v5602_v43 = vor.u32 %v6742_v51, %v5601_v2  ;;  %v5094_v31 = vor.u32 %v6612_v39, %v5091_v44  ;;  %v5206_v56 = vor.u32 %v6640_v58, %v5203_v54  ;;  %v6788_v2 = vld [vmem:[%s10297_s3 + $0x5ac] sm:$0xf]  ;;  %v5795_v51 = vld [vmem:[%s10297_s3 + $0x5b8] sm:$0xf0] }
 0x16f   :  { %2647 = vmatpush.bf16.msrb.mxu0 %v5286_v11  ;;  %v6616_v11 = vld [vmem:[%s10297_s3 + $0x4c] sm:$0xf]  ;;  %v971_v42 = vadd.f32 %v8581_v8, %v957_v35  ;;  %v5827_v8 = vld [vmem:[%s10297_s3 + $0x5f8] sm:$0xf0]  ;;  %v977_v18 = vsel %vm975_vm1, %v973_v7, 0.0 }
 0x170   :  { %2592 = vmatpush.bf16.msra.mxu1 %v5650_v57  ;;  %v5110_v28 = vor.u32 %v6616_v11, %v5107_v16  ;;  %v6738_v57 = vld [vmem:[%s10297_s3 + $0x414] sm:$0xf0]  ;;  %v5830_v15 = vor.u32 %v6796_v5, %v5827_v8  ;;  %v5427_v11 = vld [vmem:[%s10297_s3 + $0x2d8] sm:$0xf0]  ;;  %v6760_v16 = vld [vmem:[%s10297_s3 + $0x4cc] sm:$0xf] }
 0x171   :  { %2634 = vmatpush.bf16.msra.mxu2 %v5142_v0  ;;  %v976_v29 = vsel %vm975_vm1, %v971_v42, 0.0  ;;  %v6782_v35 = vld [vmem:[%s10297_s3 + $0x574] sm:$0xf0]  ;;  %v5686_v7 = vor.u32 %v6760_v16, %v5683_v40  ;;  %v5411_v44 = vld [vmem:[%s10297_s3 + $0x2b8] sm:$0xf0] }
 0x172   :  { %2554 = vmatpush.bf16.msra.mxu3 %v5202_v22  ;;  %v978_v22 = vadd.f32 %v977_v18, %v976_v29  ;;  %v5745_v42 = vld [vmem:[%s10297_s3 + $0x548] sm:$0xf]  ;;  %v6784_v5 = vld [vmem:[%s10297_s3 + $0x58c] sm:$0xf]  ;;  %v5779_v8 = vld [vmem:[%s10297_s3 + $0x598] sm:$0xf0] }
 0x173   :  { %2648 = vmatpush.bf16.msrb.mxu0 %v5270_v45  ;;  %v5793_v45 = vld [vmem:[%s10297_s3 + $0x5a8] sm:$0xf]  ;;  %v8852_v0 = vpop.f32.mrf.mxu2  ;;  %v5782_v61 = vor.u32 %v6784_v5, %v5779_v8  ;;  %v6770_v16 = vld [vmem:[%s10297_s3 + $0x514] sm:$0xf0]  ;;  %v6732_v40 = vld [vmem:[%s10297_s3 + $0x3ec] sm:$0xf] }
 0x174   :  { %2593 = vmatpush.bf16.msra.mxu1 %v5634_v3  ;;  %v5794_v26 = vor.u32 %v6790_v14, %v5793_v45  ;;  %v1035_v3 = vpop.f32.mrf.mxu3  ;;  %v979_v47 = vrot.slane %v978_v22, 4  ;;  %v1063_v39 = vpop.f32.mrf.mxu0  ;;  %v6756_v45 = vld [vmem:[%s10297_s3 + $0x4ac] sm:$0xf]  ;;  %v1062_v14 = vadd.f32 %v8838_v55, %v1048_v1  ;;  %v5798_v55 = vor.u32 %v6788_v2, %v5795_v51  ;;  %v5747_v51 = vld [vmem:[%s10297_s3 + $0x558] sm:$0xf0] }
 0x175   :  { %2635 = vmatpush.bf16.msra.mxu2 %v5126_v19  ;;  %2555 = vmatmul.bf16.vlgmr.msra.gmra.mxu3 %v7678_v37  ;;  %v5586_v19 = vor.u32 %v6738_v57, %v5585_v59  ;;  %v1036_v12 = vadd.f32 %v1035_v3, %v8768_v49  ;;  %v5667_v59 = vld [vmem:[%s10297_s3 + $0x4b8] sm:$0xf0]  ;;  %v6776_v2 = vld [vmem:[%s10297_s3 + $0x54c] sm:$0xf] }
 0x176   :  { %2603 = vmatpush.bf16.msrb.mxu3 %v5826_v62  ;;  %v5778_v62 = vor.u32 %v6786_v52, %v5777_v63  ;;  %v1076_v18 = vadd.f32 %v8852_v0, %v1062_v14  ;;  %v6780_v0 = vld [vmem:[%s10297_s3 + $0x56c] sm:$0xf]  ;;  %v5763_v52 = vld [vmem:[%s10297_s3 + $0x578] sm:$0xf0] }
 0x177   :  { %2649 = vmatpush.bf16.msrb.mxu0 %v5254_v48  ;;  %v5443_v48 = vld [vmem:[%s10297_s3 + $0x2f8] sm:$0xf0]  ;;  %v1050_v58 = vadd.f32 %v8782_v41, %v1036_v12  ;;  %v5766_v12 = vor.u32 %v6780_v0, %v5763_v52  ;;  %v6744_v14 = vld [vmem:[%s10297_s3 + $0x44c] sm:$0xf] }
 0x178   :  { %2594 = vmatpush.bf16.msra.mxu1 %v5618_v46  ;;  %v5446_v24 = vor.u32 %v6700_v30, %v5443_v48  ;;  %v8907_v46 = vpop.f32.mrf.mxu1  ;;  %v6752_v30 = vld [vmem:[%s10297_s3 + $0x48c] sm:$0xf]  ;;  %v5729_v48 = vld [vmem:[%s10297_s3 + $0x528] sm:$0xf] }
 0x179   :  { %2636 = vmatpush.bf16.msra.mxu2 %v5110_v28  ;;  %v5814_v28 = vor.u32 %v6792_v9, %v5811_v10  ;;  %v6748_v9 = vld [vmem:[%s10297_s3 + $0x46c] sm:$0xf] }
 0x17a   :  { %2604 = vmatpush.bf16.msrb.mxu3 %v5810_v53  ;;  %v5762_v53 = vor.u32 %v6782_v35, %v5761_v4  ;;  %v5571_v4 = vld [vmem:[%s10297_s3 + $0x3f8] sm:$0xf0] }
 0x17b   :  { %2650 = vmatpush.bf16.msrb.mxu0 %v5238_v25  ;;  %v6696_v25 = vld [vmem:[%s10297_s3 + $0x2cc] sm:$0xf]  ;;  %v1077_v54 = vpop.f32.mrf.mxu2 }
 0x17c   :  { %2595 = vmatpush.bf16.msra.mxu1 %v5602_v43  ;;  %v5430_v49 = vor.u32 %v6696_v25, %v5427_v11  ;;  %v6778_v43 = vld [vmem:[%s10297_s3 + $0x554] sm:$0xf0]  ;;  %v1089_v41 = vpop.f32.mrf.mxu3  ;;  %v2346_v29 = vpop.f32.mrf.mxu0  ;;  %v5635_v25 = vld [vmem:[%s10297_s3 + $0x478] sm:$0xf0]  ;;  %v5713_v11 = vld [vmem:[%s10297_s3 + $0x508] sm:$0xf] }
 0x17d   :  { %2637 = vmatpush.bf16.msra.mxu2 %v5094_v31  ;;  %v5670_v31 = vor.u32 %v6756_v45, %v5667_v59  ;;  %v5746_v34 = vor.u32 %v6778_v43, %v5745_v42  ;;  %v1090_v33 = vadd.f32 %v1089_v41, %v1076_v18  ;;  %v5574_v45 = vor.u32 %v6732_v40, %v5571_v4  ;;  %v6728_v59 = vld [vmem:[%s10297_s3 + $0x3cc] sm:$0xf]  ;;  %v5555_v42 = vld [vmem:[%s10297_s3 + $0x3d8] sm:$0xf0] }
 0x17e   :  { %2605 = vmatpush.bf16.msrb.mxu3 %v5794_v26  ;;  %v1064_v26 = vadd.f32 %v1063_v39, %v1050_v58  ;;  %v5619_v58 = vld [vmem:[%s10297_s3 + $0x458] sm:$0xf0]  ;;  %v6724_v18 = vld [vmem:[%s10297_s3 + $0x3ac] sm:$0xf] }
 0x17f   :  { %2651 = vmatpush.bf16.msrb.mxu0 %v5222_v36  ;;  %v6692_v36 = vld [vmem:[%s10297_s3 + $0x2ac] sm:$0xf]  ;;  %v1104_v35 = vadd.f32 %v8841_v38, %v1090_v33  ;;  %v5622_v8 = vor.u32 %v6744_v14, %v5619_v58  ;;  %v2733_v33 = vld [vmem:[%s10298_s4 + $0x20] sm:$0x33] }
 0x180   :  { %2596 = vmatpush.bf16.msra.mxu1 %v5586_v19  ;;  %v5414_v57 = vor.u32 %v6692_v36, %v5411_v44  ;;  %v2360_v3 = vpop.f32.mrf.mxu1  ;;  %v1078_v10 = vadd.f32 %v1077_v54, %v1064_v26  ;;  %v6680_v38 = vld [vmem:[%s10297_s3 + $0x24c] sm:$0xf]  ;;  %v5363_v36 = vld [vmem:[%s10297_s3 + $0x258] sm:$0xf0]  ;;  %v5750_v54 = vor.u32 %v6776_v2, %v5747_v51 }
 0x181   :  { %2638 = vmatpush.bf16.msra.mxu2 %v5078_v21  ;;  %v6684_v21 = vld [vmem:[%s10297_s3 + $0x26c] sm:$0xf]  ;;  %v5366_v41 = vor.u32 %v6680_v38, %v5363_v36  ;;  %v5843_v36 = vld [vmem:[%s10297_s3 + $0x618] sm:$0xf0] }
 0x182   :  { %2606 = vmatpush.bf16.msrb.mxu3 %v5778_v62  ;;  %v6716_v51 = vld [vmem:[%s10297_s3 + $0x36c] sm:$0xf] }
 0x183   :  { %2652 = vmatpush.bf16.msrb.mxu0 %v5206_v56  ;;  %2597 = vmatmul.bf16.vlgmr.msra.gmra.mxu1 %v7737_v13  ;;  %v5651_v56 = vld [vmem:[%s10297_s3 + $0x498] sm:$0xf0]  ;;  %v2374_v62 = vpop.f32.mrf.mxu2  ;;  %v6800_v38 = vld [vmem:[%s10297_s3 + $0x60c] sm:$0xf] }
 0x184   :  { %2659 = vmatpush.bf16.msrb.mxu1 %v5446_v24  ;;  %2639 = vmatmul.bf16.vlgmr.msra.gmra.mxu2 %v7671_v32  ;;  %v6688_v32 = vld [vmem:[%s10297_s3 + $0x28c] sm:$0xf]  ;;  %v5654_v19 = vor.u32 %v6752_v30, %v5651_v56  ;;  %v5379_v24 = vld [vmem:[%s10297_s3 + $0x278] sm:$0xf0]  ;;  %v1091_v1 = vpop.f32.mrf.mxu3 }
 0x185   :  { %2687 = vmatpush.bf16.msrb.mxu2 %v5702_v27  ;;  %v5398_v63 = vor.u32 %v6688_v32, %v5395_v17  ;;  %v2361_v27 = vadd.f32 %v2360_v3, %v2346_v29  ;;  %v5558_v32 = vor.u32 %v6728_v59, %v5555_v42  ;;  %v6740_v17 = vld [vmem:[%s10297_s3 + $0x42c] sm:$0xf]  ;;  %v5603_v30 = vld [vmem:[%s10297_s3 + $0x438] sm:$0xf0]  ;;  %v6809_v59 = vld [vmem:[%s10298_s4 + $0xc] sm:$0xf0] }
 0x186   :  { %2653 = vmatmul.bf16.vlgmr.msrb.gmra.mxu0 %v7678_v37  ;;  %v980_v37 = vadd.f32 %v979_v47, %v978_v22  ;;  %2607 = vmatpush.bf16.msrb.mxu3 %v5762_v53  ;;  %v5730_v22 = vor.u32 %v6774_v60, %v5729_v48  ;;  %v1092_v47 = vadd.f32 %v1091_v1, %v1078_v10  ;;  %v5539_v48 = vld [vmem:[%s10297_s3 + $0x3b8] sm:$0xf0]  ;;  %v6768_v60 = vld [vmem:[%s10297_s3 + $0x50c] sm:$0xf] }
 0x187   :  { %2701 = vmatpush.bf16.msra.mxu0 %v5830_v15  ;;  %v5714_v53 = vor.u32 %v6770_v16, %v5713_v11  ;;  %v5606_v29 = vor.u32 %v6740_v17, %v5603_v30  ;;  %v6672_v3 = vld [vmem:[%s10297_s3 + $0x20c] sm:$0xf]  ;;  %v6807_v30 = vld [vmem:[%s10298_s4 + $0x4] sm:$0xf] }
 0x188   :  { %2660 = vmatpush.bf16.msrb.mxu1 %v5430_v49  ;;  %v981_v15 = vrot.slane %v980_v37, 2  ;;  %v5382_v49 = vor.u32 %v6684_v21, %v5379_v24  ;;  %v1106_v44 = vadd.f32 %v8907_v46, %v1092_v47  ;;  %v1108_v46 = vsel %vm975_vm1, %v1104_v35, 0.0  ;;  %v6804_v10 = vld [vmem:[%s10297_s3 + $0x62c] sm:$0xf]  ;;  %v9136_v17 = vpop.f32.mrf.mxu1 }
 0x189   :  { %2688 = vmatpush.bf16.msrb.mxu2 %v5686_v7  ;;  %v5638_v7 = vor.u32 %v6748_v9, %v5635_v25  ;;  %v5542_v24 = vor.u32 %v6724_v18, %v5539_v48  ;;  %v5587_v9 = vld [vmem:[%s10297_s3 + $0x418] sm:$0xf0]  ;;  %v2750_v25 = vunpack.c.l.b16 %v2733_v33  ;;  %v6720_v1 = vld [vmem:[%s10297_s3 + $0x38c] sm:$0xf]  ;;  %v5871_v18 = vld [vmem:[%s10298_s4 + $0x10] sm:$0xf0] }
 0x18a   :  { %2608 = vmatpush.bf16.msrb.mxu3 %v5746_v34  ;;  %v982_v39 = vadd.f32 %v981_v15, %v980_v37  ;;  %v1109_v43 = vsel %vm975_vm1, %v1106_v44, 0.0  ;;  %v5731_v37 = vld [vmem:[%s10297_s3 + $0x538] sm:$0xf0] }
 0x18b   :  { %2702 = vmatpush.bf16.msra.mxu0 %v5814_v28  ;;  %v8994_v28 = vadd.f32 %v2374_v62, %v2361_v27  ;;  %v1110_v5 = vadd.f32 %v1109_v43, %v1108_v46  ;;  %v5347_v34 = vld [vmem:[%s10297_s3 + $0x238] sm:$0xf0]  ;;  %v2751_v62 = vunpack.c.h.b16 %v2733_v33  ;;  %v2758_v35 = vpack.c.b16 %v2750_v25, %v2750_v25  ;;  %v5877_v46 = vld [vmem:[%s10298_s4 + $0x8] sm:$0xf]  ;;  %v6810_v43 = vld [vmem:[%s10298_s4 + $0x14] sm:$0xf0] }
 0x18c   :  { %2661 = vmatpush.bf16.msrb.mxu1 %v5414_v57  ;;  %v983_v57 = vrot.slane %v982_v39, 1  ;;  %v5715_v15 = vld [vmem:[%s10297_s3 + $0x518] sm:$0xf0] }
 0x18d   :  { %2689 = vmatpush.bf16.msrb.mxu2 %v5670_v31  ;;  %v6676_v31 = vld [vmem:[%s10297_s3 + $0x22c] sm:$0xf]  ;;  %v1111_v26 = vrot.slane %v1110_v5, 4  ;;  %v5859_v27 = vld [vmem:[%s10297_s3 + $0x638] sm:$0xf0]  ;;  %v5718_v16 = vor.u32 %v6768_v60, %v5715_v15  ;;  %v2759_v44 = vpack.c.b16 %v2751_v62, %v2751_v62  ;;  %v9104_v58 = vsel %vm2769_vm2, %v2758_v35, 0 }
 0x18e   :  { %2609 = vmatpush.bf16.msrb.mxu3 %v5730_v22  ;;  %v984_v0 = vadd.f32 %v983_v57, %v982_v39  ;;  %v6736_v22 = vld [vmem:[%s10297_s3 + $0x40c] sm:$0xf]  ;;  %v5862_v39 = vor.u32 %v6804_v10, %v5859_v27 }
 0x18f   :  { %2703 = vmatpush.bf16.msra.mxu0 %v5798_v55  ;;  %v6772_v55 = vld [vmem:[%s10297_s3 + $0x52c] sm:$0xf]  ;;  %v1112_v52 = vadd.f32 %v1111_v26, %v1110_v5  ;;  %v5590_v2 = vor.u32 %v6736_v22, %v5587_v9  ;;  %v5491_v5 = vld [vmem:[%s10297_s3 + $0x358] sm:$0xf0]  ;;  %v9148_v26 = vor.u32 %v6810_v43, %v5877_v46 }
 0x190   :  { %2662 = vmatpush.bf16.msrb.mxu1 %v5398_v63  ;;  %v5734_v56 = vor.u32 %v6772_v55, %v5731_v37  ;;  %v9060_v63 = vld [vmem:[%s10298_s4 + $0x28] sm:$0x33]  ;;  %v9087_v47 = vmul.f32 0.0015625, %v984_v0  ;;  %v5846_v55 = vor.u32 %v6800_v38, %v5843_v36  ;;  %v5459_v22 = vld [vmem:[%s10297_s3 + $0x318] sm:$0xf0] }
 0x191   :  { %2690 = vmatpush.bf16.msrb.mxu2 %v5654_v19  ;;  %v5331_v19 = vld [vmem:[%s10297_s3 + $0x218] sm:$0xf0]  ;;  %v2752_v21 = vunpack.c.l.b16 %v9060_v63  ;;  %v1113_v11 = vrot.slane %v1112_v52, 2  ;;  %v6712_v57 = vld [vmem:[%s10297_s3 + $0x34c] sm:$0xf]  ;;  %v2753_v9 = vunpack.c.h.b16 %v9060_v63 }
 0x192   :  { %2610 = vmatpush.bf16.msrb.mxu3 %v5714_v53  ;;  %v5334_v40 = vor.u32 %v6672_v3, %v5331_v19  ;;  %v5507_v53 = vld [vmem:[%s10297_s3 + $0x378] sm:$0xf0]  ;;  %v5494_v60 = vor.u32 %v6712_v57, %v5491_v5  ;;  %v6708_v0 = vld [vmem:[%s10297_s3 + $0x32c] sm:$0xf] }
 0x193   :  { %2704 = vmatpush.bf16.msra.mxu0 %v5782_v61  ;;  %v5350_v61 = vor.u32 %v6676_v31, %v5347_v34  ;;  %v2760_v4 = vpack.c.b16 %v2752_v21, %v2752_v21  ;;  %v5510_v37 = vor.u32 %v6716_v51, %v5507_v53  ;;  %v1118_v34 = vmul.f32 %v9087_v47, %v9087_v47  ;;  %v6704_v19 = vld [vmem:[%s10297_s3 + $0x30c] sm:$0xf]  ;;  %v1134_v53 = vld [vmem:[%s10304_s10 + $0x1] sm:$0x1] }
 0x194   :  { %2663 = vmatpush.bf16.msrb.mxu1 %v5382_v49  ;;  %v1114_v49 = vadd.f32 %v1113_v11, %v1112_v52  ;;  %v5462_v27 = vor.u32 %v6704_v19, %v5459_v22  ;;  %v2761_v25 = vpack.c.b16 %v2753_v9, %v2753_v9 }
 0x195   :  { %2691 = vmatpush.bf16.msrb.mxu2 %v5638_v7  ;;  %2611 = vmatmul.bf16.vlgmr.msrb.gmra.mxu3 %v7749_v6  ;;  %v9113_v42 = vsel %vm2769_vm2, %v2760_v4, 0  ;;  %v1121_v4 = vld [vmem:[%s10304_s10] sm:$0x1] }
 0x196   :  { %2673 = vmatpush.bf16.msra.mxu3 %v5574_v45  ;;  %v9101_v45 = vpop.f32.mrf.mxu0  ;;  %v1115_v14 = vrot.slane %v1114_v49, 1  ;;  %v9181_v63 = vsel %vm2769_vm2, %v2761_v25, 0 }
 0x197   :  { %2705 = vmatpush.bf16.msra.mxu0 %v5766_v12  ;;  %v5523_v12 = vld [vmem:[%s10297_s3 + $0x398] sm:$0xf0] }
 0x198   :  { %2664 = vmatpush.bf16.msrb.mxu1 %v5366_v41  ;;  %v5526_v7 = vor.u32 %v6720_v1, %v5523_v12  ;;  %v1116_v41 = vadd.f32 %v1115_v14, %v1114_v49  ;;  %v2388_v48 = vpop.f32.mrf.mxu3  ;;  %v6808_v1 = vld [vmem:[%s10298_s4 + $0xc] sm:$0xf]  ;;  %v5879_v12 = vld [vmem:[%s10298_s4 + $0x18] sm:$0xf0] }
 0x199   :  { %2692 = vmatpush.bf16.msrb.mxu2 %v5622_v8  ;;  %v9130_v8 = vsel %vm2769_vm2, %v2759_v44, 0 }
 0x19a   :  { %2674 = vmatpush.bf16.msra.mxu3 %v5558_v32  ;;  %v1117_v32 = vmul.f32 0.0015625, %v1116_v41 }
 0x19b   :  { %2706 = vmatpush.bf16.msra.mxu0 %v5750_v54  ;;  %v5869_v54 = vld [vmem:[%s10298_s4] sm:$0xf] }
 0x19c   :  { %2665 = vmatpush.bf16.msrb.mxu1 %v5350_v61  ;;  %v9132_v31 = vor.u32 %v6809_v59, %v5869_v54  ;;  %v9154_v61 = vor.u32 %v6807_v30, %v5871_v18 }
 0x19d   :  { %2693 = vmatpush.bf16.msrb.mxu2 %v5606_v29 }
 0x19e   :  { %2675 = vmatpush.bf16.msra.mxu3 %v5542_v24  ;;  %v2402_v33 = vpop.f32.mrf.mxu0 }
 0x19f   :  { %2707 = vmatpush.bf16.msra.mxu0 %v5734_v56  ;;  %v1119_v56 = vsub.f32 %v1117_v32, %v1118_v34 }
 0x1a0   :  { %2666 = vmatpush.bf16.msrb.mxu1 %v5334_v40  ;;  %v2416_v3 = vpop.f32.mrf.mxu1 }
 0x1a1   :  { %2694 = vmatpush.bf16.msrb.mxu2 %v5590_v2  ;;  %v1120_v15 = vmax.f32 %v1119_v56, 0.0  ;;  %v9199_v2 = vpop.f32.mrf.mxu3 }
 0x1a2   :  { %2676 = vmatpush.bf16.msra.mxu3 %v5526_v7 }
 0x1a3   :  { %2708 = vmatpush.bf16.msra.mxu0 %v5718_v16  ;;  %2667 = vmatmul.bf16.vlgmr.msrb.gmra.mxu1 %v7706_v20  ;;  %v2389_v20 = vadd.f32 %v2388_v48, %v8994_v28  ;;  %v1122_v28 = vadd.f32 1e-05, %v1120_v15 }
 0x1a4   :  { %2721 = vmatpush.bf16.msra.mxu1 %v5862_v39  ;;  %2695 = vmatmul.bf16.vlgmr.msrb.gmra.mxu2 %v7737_v13  ;;  %v5475_v13 = vld [vmem:[%s10297_s3 + $0x338] sm:$0xf0] }
 0x1a5   :  { %2814 = vmatpush.bf16.msra.mxu2 %v9113_v42  ;;  %v2403_v52 = vadd.f32 %v2402_v33, %v2389_v20  ;;  %v5478_v29 = vor.u32 %v6708_v0, %v5475_v13  ;;  %6995 = vrsqrt.f32 %v1122_v28  ;;  %vm1129_vm4 = vweird.f32 %v1122_v28 }
 0x1a6   :  { %2709 = vmatmul.bf16.vlgmr.msra.gmra.mxu0 %v7749_v6  ;;  %v9138_v6 = vpop.f32.mrf.mxu2  ;;  %2677 = vmatpush.bf16.msra.mxu3 %v5510_v37  ;;  %v9202_v39 = vpop.f32.mrf.mxu0 }
 0x1a7   :  { %2856 = vmatpush.bf16.msrb.mxu0 %v9104_v58  ;;  %v2417_v21 = vadd.f32 %v2416_v3, %v2403_v52 }
 0x1a8   :  { %2722 = vmatpush.bf16.msra.mxu1 %v5846_v55  ;;  %v9208_v44 = vpop.f32.mrf.mxu1 }
 0x1a9   :  { %2815 = vmatpush.bf16.msra.mxu2 %v9148_v26 }
 0x1aa   :  { %2678 = vmatpush.bf16.msra.mxu3 %v5494_v60 }
 0x1ab   :  { %2857 = vmatpush.bf16.msrb.mxu0 %v9132_v31  ;;  %v6996_v62 = vpop.eup %6995 }
 0x1ac   :  { %2801 = vmatpush.bf16.msrb.mxu1 %v9130_v8  ;;  %v1124_v11 = vmul.f32 %v6996_v62, %v1122_v28  ;;  %vm1130_vm3 = vweird.f32 %v6996_v62 }
 0x1ad   :  { %2882 = vmatpush.bf16.msrb.mxu2 %v9113_v42  ;;  %vm1131_vm5 = vmor %vm1129_vm4, %vm1130_vm3 }
 0x1ae   :  { %v2430_v24 = vpop.f32.mrf.mxu2  ;;  %2679 = vmatpush.bf16.msra.mxu3 %v5478_v29  ;;  %v1125_v16 = vmul.f32 %v6996_v62, %v1124_v11 }
 0x1af   :  { %v9173_v10 = vadd.f32 %v2430_v24, %v2417_v21 }
 0x1b0   :  { %2802 = vmatpush.bf16.msrb.mxu1 %v9154_v61  ;;  %v1126_v40 = vmul.f32 0.5, %v1125_v16  ;;  %v6817_v16 = vld [vmem:[%s10299_s5 + $0x30] sm:$0xff] }
 0x1b1   :  { %2883 = vmatpush.bf16.msrb.mxu2 %v9148_v26 }
 0x1b2   :  { %2680 = vmatpush.bf16.msra.mxu3 %v5462_v27  ;;  %v6818_v27 = vld [vmem:[%s10299_s5 + $0x38] sm:$0xff] }
 0x1b3   :  { %5866 = vmatmul.msk.bf16.vlgmr.msra.gmra.mxu1 %vm873_vm0, %v7766_v23  ;;  %v1127_v23 = vsub.f32 1.5, %v1126_v40  ;;  %v2472_v41 = vpop.f32.mrf.mxu0  ;;  %3130 = vmatpush.bf16.msra.mxu0 %v6818_v27  ;;  %v6820_v27 = vld [vmem:[%s10299_s5 + $0x48] sm:$0xff] }
 0x1b4   :  { %2869 = vmatpush.bf16.msra.mxu1 %v9130_v8 }
 0x1b5   :  { %2681 = vmatmul.bf16.vlgmr.msra.gmra.mxu3 %v7712_v50  ;;  %v9192_v50 = vor.u32 %v6808_v1, %v5879_v12  ;;  %v1128_v35 = vmul.f32 %v6996_v62, %v1127_v23  ;;  %v6826_v23 = vld [vmem:[%s10299_s5 + $0x78] sm:$0xff] }
 0x1b6   :  { %2788 = vmatpush.bf16.msrb.mxu3 %v9104_v58  ;;  %v9197_v49 = vpop.f32.mrf.mxu2 }
 0x1b7   :  { %v1132_v51 = vsel %vm1131_vm5, %v6996_v62, %v1128_v35  ;;  %3131 = vmatpush.bf16.msra.mxu0 %v6817_v16  ;;  %v6816_v35 = vld [vmem:[%s10299_s5 + $0x28] sm:$0xff]  ;;  %v6819_v16 = vld [vmem:[%s10299_s5 + $0x40] sm:$0xff] }
 0x1b8   :  { %2870 = vmatpush.bf16.msra.mxu1 %v9154_v61  ;;  %v1133_v7 = vmul.f32 %v1132_v51, %v1121_v4  ;;  %v2444_v59 = vpop.f32.mrf.mxu3 }
 0x1ba   :  { %2789 = vmatpush.bf16.msrb.mxu3 %v9132_v31  ;;  %v2735_v38 = vpack.c.bf16 %v1133_v7, %v1133_v7  ;;  %v1135_v36 = vmul.f32 %v1133_v7, %v9087_v47 }
 0x1bb   :  { %v9223_v34 = vpop.f32.mrf.mxu0  ;;  %3132 = vmatpush.bf16.msra.mxu0 %v6816_v35 }
 0x1bc   :  { %5885 = vmatmul.msk.bf16.vlgmr.msra.gmra.mxu2 %vm975_vm1, %v2735_v38  ;;  %v1136_v14 = vsub.f32 %v1134_v53, %v1135_v36  ;;  %v6825_v53 = vld [vmem:[%s10299_s5 + $0x70] sm:$0xff]  ;;  %v6815_v36 = vld [vmem:[%s10299_s5 + $0x20] sm:$0xff] }
 0x1be   :  { %2827 = vmatpush.bf16.msra.mxu3 %v9181_v63  ;;  %v2458_v54 = vpop.f32.mrf.mxu2  ;;  %v2846_v46 = vpack.c.bf16 %v1136_v14, %v1136_v14 }
 0x1bf   :  { %v2459_v43 = vadd.f32 %v2458_v54, %v2444_v59  ;;  %v6834_v59 = vld [vmem:[%s10299_s5 + $0xb8] sm:$0xff]  ;;  %3133 = vmatpush.bf16.msra.mxu0 %v6815_v36 }
 0x1c0   :  { %5887 = vmatmul.msk.bf16.vlgmr.msrb.gmra.mxu0 %vm975_vm1, %v2846_v46  ;;  %v2486_v47 = vpop.f32.mrf.mxu1  ;;  %v9219_v57 = vpop.f32.mrf.mxu3  ;;  %3158 = vmatpush.bf16.msra.mxu2 %v6834_v59 }
 0x1c1   :  { %v2473_v55 = vadd.f32 %v2472_v41, %v2459_v43  ;;  %v6814_v43 = vld [vmem:[%s10299_s5 + $0x18] sm:$0xff]  ;;  %v6833_v41 = vld [vmem:[%s10299_s5 + $0xb0] sm:$0xff] }
 0x1c2   :  { %2828 = vmatpush.bf16.msra.mxu3 %v9192_v50 }
 0x1c3   :  { %5884 = vmatmul.msk.bf16.vlgmr.msrb.gmra.mxu1 %vm975_vm1, %v2735_v38  ;;  %v2487_v37 = vadd.f32 %v2486_v47, %v2473_v55  ;;  %v2528_v48 = vpop.f32.mrf.mxu0  ;;  %3134 = vmatpush.bf16.msra.mxu0 %v6814_v43  ;;  %v6823_v55 = vld [vmem:[%s10299_s5 + $0x60] sm:$0xff] }
 0x1c4   :  { %3144 = vmatpush.bf16.msrb.mxu1 %v6826_v23  ;;  %3159 = vmatpush.bf16.msra.mxu2 %v6833_v41 }
 0x1c5   :  { %5883 = vmatmul.msk.bf16.vlgmr.msrb.gmra.mxu3 %vm975_vm1, %v2735_v38 }
 0x1c6   :  { %2895 = vmatpush.bf16.msrb.mxu3 %v9181_v63  ;;  %v9221_v5 = vpop.f32.mrf.mxu2 }
 0x1c8   :  { %v9230_v15 = vpop.f32.mrf.mxu1  ;;  %3145 = vmatpush.bf16.msrb.mxu1 %v6825_v53  ;;  %v2461_v53 = vadd.f32 %v9221_v5, %v9219_v57 }
 0x1ca   :  { %2896 = vmatpush.bf16.msrb.mxu3 %v9192_v50  ;;  %v2475_v59 = vadd.f32 %v9223_v34, %v2461_v53 }
 0x1cb   :  { %v9228_v60 = vpop.f32.mrf.mxu0 }
 0x1cc   :  { %5889 = vmatmul.msk.bf16.vlgmr.msrb.gmra.mxu2 %vm975_vm1, %v2846_v46 }
 0x1ce   :  { %v2514_v18 = vpop.f32.mrf.mxu2 }
 0x1d3   :  { %5888 = vmatmul.msk.bf16.vlgmr.msra.gmra.mxu1 %vm975_vm1, %v2846_v46 }
 0x1d5   :  { %5886 = vmatmul.msk.bf16.vlgmr.msra.gmra.mxu3 %vm975_vm1, %v2735_v38 }
 0x1d6   :  { %v9236_v19 = vpop.f32.mrf.mxu2 }
 0x1d8   :  { %v2500_v32 = vpop.f32.mrf.mxu3 }
 0x1d9   :  { %v2501_v30 = vadd.f32 %v2500_v32, %v2487_v37  ;;  %v6813_v37 = vld [vmem:[%s10299_s5 + $0x10] sm:$0xff] }
 0x1da   :  { %3135 = vmatpush.bf16.msra.mxu0 %v6813_v37 }
 0x1db   :  { %v2515_v56 = vadd.f32 %v2514_v18, %v2501_v30  ;;  %v2570_v0 = vpop.f32.mrf.mxu0  ;;  %v6832_v30 = vld [vmem:[%s10299_s5 + $0xa8] sm:$0xff] }
 0x1dc   :  { %3160 = vmatpush.bf16.msra.mxu2 %v6832_v30 }
 0x1dd   :  { %v9226_v20 = vadd.f32 %v2528_v48, %v2515_v56  ;;  %v6822_v56 = vld [vmem:[%s10299_s5 + $0x58] sm:$0xff]  ;;  %v6812_v48 = vld [vmem:[%s10299_s5 + $0x8] sm:$0xff] }
 0x1de   :  { %3136 = vmatpush.bf16.msra.mxu0 %v6812_v48 }
 0x1e0   :  { %v9232_v33 = vpop.f32.mrf.mxu3  ;;  %v2542_v13 = vpop.f32.mrf.mxu1 }
 0x1e3   :  { %v9234_v29 = vpop.f32.mrf.mxu0 }
 0x1e5   :  { %5890 = vmatmul.msk.bf16.vlgmr.msrb.gmra.mxu3 %vm975_vm1, %v2846_v46  ;;  %v6824_v46 = vld [vmem:[%s10299_s5 + $0x68] sm:$0xff] }
 0x1e6   :  { %3146 = vmatpush.bf16.msrb.mxu1 %v6824_v46 }
 0x1e7   :  { %v2584_v24 = vpop.f32.mrf.mxu2 }
 0x1e8   :  { %v9238_v22 = vpop.f32.mrf.mxu1 }
 0x1ea   :  { %3147 = vmatpush.bf16.msrb.mxu1 %v6823_v55 }
 0x1eb   :  { %v2626_v21 = vpop.f32.mrf.mxu0 }
 0x1ee   :  { %3148 = vmatpush.bf16.msrb.mxu1 %v6822_v56 }
 0x1ef   :  { %v9250_v1 = vpop.f32.mrf.mxu2 }
 0x1f3   :  { %v9245_v25 = vpop.f32.mrf.mxu0 }
 0x1f8   :  { %v2556_v52 = vpop.f32.mrf.mxu3 }
 0x1f9   :  { %v2557_v28 = vadd.f32 %v2556_v52, %v2542_v13  ;;  %v6821_v13 = vld [vmem:[%s10299_s5 + $0x50] sm:$0xff] }
 0x1fa   :  { %3149 = vmatpush.bf16.msrb.mxu1 %v6821_v13 }
 0x1fb   :  { %v2571_v3 = vadd.f32 %v2570_v0, %v2557_v28  ;;  %v6831_v0 = vld [vmem:[%s10299_s5 + $0xa0] sm:$0xff] }
 0x1fc   :  { %3161 = vmatpush.bf16.msra.mxu2 %v6831_v0  ;;  %v6811_v28 = vld [vmem:[%s10299_s5] sm:$0xff] }
 0x1fd   :  { %v2585_v11 = vadd.f32 %v2584_v24, %v2571_v3  ;;  %v6830_v24 = vld [vmem:[%s10299_s5 + $0x98] sm:$0xff]  ;;  %3137 = vmatpush.bf16.msra.mxu0 %v6811_v28 }
 0x1fe   :  { %3150 = vmatpush.bf16.msrb.mxu1 %v6820_v27 }
 0x200   :  { %v2598_v9 = vpop.f32.mrf.mxu1  ;;  %v9243_v62 = vpop.f32.mrf.mxu3  ;;  %3162 = vmatpush.bf16.msra.mxu2 %v6830_v24 }
 0x201   :  { %v2599_v40 = vadd.f32 %v2598_v9, %v2585_v11  ;;  %3232 = vmatpush.bf16.msrb.mxu0 %v9130_v8  ;;  %v6829_v11 = vld [vmem:[%s10299_s5 + $0x90] sm:$0xff]  ;;  %v6828_v8 = vld [vmem:[%s10299_s5 + $0x88] sm:$0xff]  ;;  %v2559_v46 = vadd.f32 %v9243_v62, %v9238_v22 }
 0x202   :  { %3151 = vmatpush.bf16.msrb.mxu1 %v6819_v16 }
 0x203   :  { %v9260_v7 = vpop.f32.mrf.mxu0 }
 0x204   :  { %3163 = vmatpush.bf16.msra.mxu2 %v6829_v11 }
 0x205   :  { %3233 = vmatpush.bf16.msrb.mxu0 %v9154_v61 }
 0x206   :  { %3246 = vmatpush.bf16.msra.mxu1 %v9113_v42 }
 0x207   :  { %v9270_v14 = vpop.f32.mrf.mxu2 }
 0x208   :  { %v9252_v12 = vpop.f32.mrf.mxu1  ;;  %3164 = vmatpush.bf16.msra.mxu2 %v6828_v8 }
 0x20a   :  { %3247 = vmatpush.bf16.msra.mxu1 %v9148_v26  ;;  %v2489_v26 = vadd.f32 %v9230_v15, %v2475_v59 }
 0x20b   :  { %v9289_v47 = vpop.f32.mrf.mxu0 }
 0x20c   :  { %v2503_v5 = vadd.f32 %v9232_v33, %v2489_v26 }
 0x20e   :  { %v2517_v62 = vadd.f32 %v9236_v19, %v2503_v5 }
 0x20f   :  { %v9299_v18 = vpop.f32.mrf.mxu2 }
 0x210   :  { %v2531_v0 = vadd.f32 %v9228_v60, %v2517_v62  ;;  %v2657_v53 = vadd.f32 %v9289_v47, %v9299_v18 }
 0x218   :  { %v2612_v4 = vpop.f32.mrf.mxu3 }
 0x219   :  { %v2613_v51 = vadd.f32 %v2612_v4, %v2599_v40  ;;  %v2363_v40 = vadd.f32 %v9136_v17, %v9101_v45  ;;  %v6827_v45 = vld [vmem:[%s10299_s5 + $0x80] sm:$0xff] }
 0x21a   :  { %3165 = vmatpush.bf16.msra.mxu2 %v6827_v45 }
 0x21b   :  { %v9265_v38 = vadd.f32 %v2626_v21, %v2613_v51  ;;  %v2377_v51 = vadd.f32 %v9138_v6, %v2363_v40 }
 0x21d   :  { %v2391_v61 = vadd.f32 %v9199_v2, %v2377_v51 }
 0x21e   :  { %3260 = vmatpush.bf16.msrb.mxu2 %v9181_v63  ;;  %v2573_v63 = vadd.f32 %v9234_v29, %v2559_v46 }
 0x21f   :  { %v2405_v6 = vadd.f32 %v9202_v39, %v2391_v61 }
 0x220   :  { %v9272_v54 = vpop.f32.mrf.mxu1  ;;  %v2614_v3 = vpop.f32.mrf.mxu3  ;;  %v2587_v34 = vadd.f32 %v9250_v1, %v2573_v63 }
 0x221   :  { %v2419_v57 = vadd.f32 %v9208_v44, %v2405_v6 }
 0x222   :  { %3261 = vmatpush.bf16.msrb.mxu2 %v9192_v50  ;;  %v2601_v15 = vadd.f32 %v9252_v12, %v2587_v34 }
 0x223   :  { %v9313_v52 = vpop.f32.mrf.mxu0  ;;  %v2433_v39 = vadd.f32 %v9197_v49, %v2419_v57  ;;  %v6835_v49 = vld [vmem:[%s10299_s5 + $0xc0] sm:$0xff] }
 0x224   :  { %v2615_v1 = vadd.f32 %v2614_v3, %v2601_v15  ;;  %3179 = vmatpush.bf16.msra.mxu3 %v6835_v49  ;;  %v6110_v49 = vld [vmem:[%s10300_s6 + $0xe0] sm:$0xf] }
 0x226   :  { %v2629_v3 = vadd.f32 %v9245_v25, %v2615_v1  ;;  %v2655_v25 = vadd.f32 %v9260_v7, %v9270_v14  ;;  %v6866_v1 = vld [vmem:[%s10300_s6 + $0xec] sm:$0xf0] }
 0x227   :  { %v9323_v9 = vpop.f32.mrf.mxu2 }
 0x228   :  { %v9294_v32 = vpop.f32.mrf.mxu1  ;;  %3218 = vmatpush.bf16.msrb.mxu3 %v9104_v58  ;;  %v2669_v46 = vadd.f32 %v9272_v54, %v2655_v25  ;;  %v6206_v25 = vld [vmem:[%s10300_s6 + $0x1a0] sm:$0xf] }
 0x22b   :  { %v9346_v35 = vpop.f32.mrf.mxu0 }
 0x22c   :  { %3219 = vmatpush.bf16.msrb.mxu3 %v9132_v31 }
 0x22f   :  { %v9352_v17 = vpop.f32.mrf.mxu2 }
 0x230   :  { %v9318_v21 = vpop.f32.mrf.mxu1 }
 0x238   :  { %v9338_v23 = vpop.f32.mrf.mxu3  ;;  %v9340_v4 = vpop.f32.mrf.mxu1 }
 0x239   :  { %v2683_v14 = vadd.f32 %v9338_v23, %v2669_v46 }
 0x23b   :  { %v2697_v26 = vadd.f32 %v9323_v9, %v2683_v14  ;;  %v6854_v14 = vld [vmem:[%s10300_s6 + $0x8c] sm:$0xf0] }
 0x23d   :  { %v2859_v43 = vpop.f32.mrf.mxu0 }
 0x23e   :  { %v2902_v50 = vperm.slane %v2859_v43, 0  ;;  %v2671_v43 = vadd.f32 %v9294_v32, %v2657_v53  ;;  %v2711_v32 = vadd.f32 %v9313_v52, %v2697_v26 }
 0x23f   :  { %v2817_v2 = vpop.f32.mrf.mxu2 }
 0x240   :  { %v9359_v42 = vpop.f32.mrf.mxu3  ;;  %v2804_v36 = vpop.f32.mrf.mxu1  ;;  %v2836_v12 = vperm.slane %v2817_v2, 0 }
 0x241   :  { %v2835_v29 = vperm.slane %v2804_v36, 0  ;;  %v2685_v47 = vadd.f32 %v9359_v42, %v2671_v43 }
 0x242   :  { %v2840_v8 = vmul.f32 %v2836_v12, %v9265_v38  ;;  %v2844_v45 = vmul.f32 %v2836_v12, %v2629_v3  ;;  %v6862_v12 = vld [vmem:[%s10300_s6 + $0xcc] sm:$0xf0] }
 0x243   :  { %v2839_v24 = vmul.f32 %v2835_v29, %v9226_v20  ;;  %v2843_v27 = vmul.f32 %v2835_v29, %v2531_v0  ;;  %v2699_v54 = vadd.f32 %v9352_v17, %v2685_v47  ;;  %v6094_v0 = vld [vmem:[%s10300_s6 + $0xc0] sm:$0xf] }
 0x244   :  { %v6350_v47 = vld [vmem:[%s10300_s6 + $0x2c0] sm:$0xf] }
 0x245   :  { %v2861_v22 = vpop.f32.mrf.mxu0  ;;  %v2713_v5 = vadd.f32 %v9346_v35, %v2699_v54 }
 0x247   :  { %v2819_v56 = vpop.f32.mrf.mxu2 }
 0x248   :  { %v2791_v41 = vpop.f32.mrf.mxu3  ;;  %v2806_v55 = vpop.f32.mrf.mxu1 }
 0x249   :  { %v2834_v37 = vperm.slane %v2791_v41, 0  ;;  %v2725_v55 = vadd.f32 %v9318_v21, %v2711_v32 }
 0x24b   :  { %v2838_v30 = vmul.f32 %v2834_v37, %v9173_v10  ;;  %v2842_v44 = vmul.f32 %v2834_v37, %v2433_v39  ;;  %v2727_v39 = vadd.f32 %v9340_v4, %v2713_v5  ;;  %v6190_v5 = vld [vmem:[%s10300_s6 + $0x180] sm:$0xf] }
 0x24d   :  { %v9375_v48 = vadd.f32 %v2902_v50, %v2838_v30  ;;  %v9377_v33 = vadd.f32 %v2902_v50, %v2842_v44 }
 0x24f   :  { %v2914_v19 = vmul.f32 %v9375_v48, %v9375_v48  ;;  %v2918_v10 = vmul.f32 %v9377_v33, %v9377_v33  ;;  %v2885_v51 = vpop.f32.mrf.mxu2 }
 0x250   :  { %v2793_v13 = vpop.f32.mrf.mxu3  ;;  %v2872_v28 = vpop.f32.mrf.mxu1  ;;  %v2904_v61 = vperm.slane %v2885_v51, 0  ;;  %v6894_v51 = vld [vmem:[%s10300_s6 + $0x1cc] sm:$0xf0] }
 0x251   :  { %v2972_v11 = vpack.c.bf16 %v2918_v10, %v2914_v19  ;;  %v2903_v16 = vperm.slane %v2872_v28, 0  ;;  %v6111_v10 = vor.u32 %v6866_v1, %v6110_v49  ;;  %v6238_v13 = vld [vmem:[%s10300_s6 + $0x1e0] sm:$0xf]  ;;  %v6846_v49 = vld [vmem:[%s10300_s6 + $0x4c] sm:$0xf0] }
 0x252   :  { %v9404_v6 = vadd.f32 %v2904_v61, %v2840_v8  ;;  %v9406_v38 = vadd.f32 %v2904_v61, %v2844_v45  ;;  %v6222_v8 = vld [vmem:[%s10300_s6 + $0x1c0] sm:$0xf] }
 0x253   :  { %v9390_v60 = vadd.f32 %v2903_v16, %v2839_v24  ;;  %v9392_v40 = vadd.f32 %v2903_v16, %v2843_v27  ;;  %3138 = vmatmul.bf16.vlgmr.msra.gmra.mxu0 %v2972_v11  ;;  %v6898_v27 = vld [vmem:[%s10300_s6 + $0x1ec] sm:$0xf0]  ;;  %v6095_v16 = vor.u32 %v6862_v12, %v6094_v0  ;;  %v6078_v45 = vld [vmem:[%s10300_s6 + $0xa0] sm:$0xf]  ;;  %v6223_v61 = vor.u32 %v6894_v51, %v6222_v8 }
 0x254   :  { %v2916_v2 = vmul.f32 %v9404_v6, %v9404_v6  ;;  %v2920_v7 = vmul.f32 %v9406_v38, %v9406_v38  ;;  %v6239_v3 = vor.u32 %v6898_v27, %v6238_v13  ;;  %v6914_v27 = vld [vmem:[%s10300_s6 + $0x26c] sm:$0xf0]  ;;  %v6014_v8 = vld [vmem:[%s10300_s6 + $0x20] sm:$0xf] }
 0x255   :  { %v2915_v58 = vmul.f32 %v9390_v60, %v9390_v60  ;;  %v2919_v20 = vmul.f32 %v9392_v40, %v9392_v40  ;;  %v6842_v51 = vld [vmem:[%s10300_s6 + $0x2c] sm:$0xf0] }
 0x256   :  { %v2974_v18 = vpack.c.bf16 %v2920_v7, %v2916_v2  ;;  %3897 = vmatpush.bf16.msra.mxu0 %v6239_v3  ;;  %v6062_v2 = vld [vmem:[%s10300_s6 + $0x80] sm:$0xf] }
 0x257   :  { %v2973_v36 = vpack.c.bf16 %v2919_v20, %v2915_v58  ;;  %v2887_v57 = vpop.f32.mrf.mxu2  ;;  %v6858_v58 = vld [vmem:[%s10300_s6 + $0xac] sm:$0xf0] }
 0x258   :  { %v2830_v31 = vpop.f32.mrf.mxu3  ;;  %v2874_v59 = vpop.f32.mrf.mxu1  ;;  %3166 = vmatmul.bf16.vlgmr.msra.gmra.mxu2 %v2974_v18  ;;  %v6079_v43 = vor.u32 %v6858_v58, %v6078_v45  ;;  %v6926_v18 = vld [vmem:[%s10300_s6 + $0x2cc] sm:$0xf0] }
 0x259   :  { %3152 = vmatmul.bf16.vlgmr.msrb.gmra.mxu1 %v2973_v36  ;;  %v2837_v41 = vperm.slane %v2830_v31, 0  ;;  %v6890_v36 = vld [vmem:[%s10300_s6 + $0x1ac] sm:$0xf0]  ;;  %v6366_v31 = vld [vmem:[%s10300_s6 + $0x2e0] sm:$0xf] }
 0x25a   :  { %v6930_v59 = vld [vmem:[%s10300_s6 + $0x2ec] sm:$0xf0]  ;;  %3898 = vmatpush.bf16.msra.mxu0 %v6223_v61  ;;  %v6207_v54 = vor.u32 %v6890_v36, %v6206_v25  ;;  %v6142_v61 = vld [vmem:[%s10300_s6 + $0x120] sm:$0xf] }
 0x25b   :  { %v2841_v34 = vmul.f32 %v2837_v41, %v2725_v55  ;;  %v2845_v42 = vmul.f32 %v2837_v41, %v2727_v39  ;;  %v6367_v7 = vor.u32 %v6930_v59, %v6366_v31  ;;  %v6886_v41 = vld [vmem:[%s10300_s6 + $0x18c] sm:$0xf0]  ;;  %v6334_v55 = vld [vmem:[%s10300_s6 + $0x2a0] sm:$0xf]  ;;  %v6063_v39 = vor.u32 %v6854_v14, %v6062_v2  ;;  %v6112_v14 = vld [vmem:[%s10300_s6 + $0xf0] sm:$0xf0] }
 0x25c   :  { %v6874_v25 = vld [vmem:[%s10300_s6 + $0x12c] sm:$0xf0] }
 0x25d   :  { %3911 = vmatpush.bf16.msrb.mxu1 %v6367_v7  ;;  %v6143_v2 = vor.u32 %v6874_v25, %v6142_v61  ;;  %v6336_v25 = vld [vmem:[%s10300_s6 + $0x2b0] sm:$0xf0] }
 0x25e   :  { %3899 = vmatpush.bf16.msra.mxu0 %v6207_v54  ;;  %v6126_v54 = vld [vmem:[%s10300_s6 + $0x100] sm:$0xf] }
 0x260   :  { %v2832_v63 = vpop.f32.mrf.mxu3 }
 0x261   :  { %v6351_v63 = vor.u32 %v6926_v18, %v6350_v47  ;;  %v6896_v47 = vld [vmem:[%s10300_s6 + $0x1e4] sm:$0xf]  ;;  %v6240_v18 = vld [vmem:[%s10300_s6 + $0x1f0] sm:$0xf0] }
 0x263   :  { %3912 = vmatpush.bf16.msrb.mxu1 %v6351_v63 }
 0x268   :  { %v2898_v23 = vpop.f32.mrf.mxu3 }
 0x269   :  { %v2905_v37 = vperm.slane %v2898_v23, 0  ;;  %v6922_v23 = vld [vmem:[%s10300_s6 + $0x2ac] sm:$0xf0] }
 0x26b   :  { %v9422_v22 = vadd.f32 %v2905_v37, %v2841_v34  ;;  %v9424_v62 = vadd.f32 %v2905_v37, %v2845_v42  ;;  %v6382_v34 = vld [vmem:[%s10300_s6 + $0x300] sm:$0xf] }
 0x26c   :  { %v6046_v37 = vld [vmem:[%s10300_s6 + $0x60] sm:$0xf] }
 0x26d   :  { %v2917_v9 = vmul.f32 %v9422_v22, %v9422_v22  ;;  %v2921_v52 = vmul.f32 %v9424_v62, %v9424_v62 }
 0x26f   :  { %v2975_v35 = vpack.c.bf16 %v2921_v52, %v2917_v9  ;;  %v6850_v9 = vld [vmem:[%s10300_s6 + $0x6c] sm:$0xf0] }
 0x270   :  { %v2900_v17 = vpop.f32.mrf.mxu3  ;;  %v6934_v52 = vld [vmem:[%s10300_s6 + $0x30c] sm:$0xf0] }
 0x271   :  { %5991 = vmatmul.msk.bf16.vlgmr.msra.gmra.mxu3 %vm3126_vm6, %v2975_v35  ;;  %v6191_v35 = vor.u32 %v6886_v41, %v6190_v5  ;;  %v6335_v17 = vor.u32 %v6922_v23, %v6334_v55  ;;  %v6928_v5 = vld [vmem:[%s10300_s6 + $0x2e4] sm:$0xf]  ;;  %v6368_v41 = vld [vmem:[%s10300_s6 + $0x2f0] sm:$0xf0] }
 0x272   :  { %3883 = vmatpush.bf16.msra.mxu3 %v6111_v10  ;;  %v6158_v10 = vld [vmem:[%s10300_s6 + $0x140] sm:$0xf] }
 0x273   :  { %3900 = vmatpush.bf16.msra.mxu0 %v6191_v35  ;;  %3913 = vmatpush.bf16.msrb.mxu1 %v6335_v17  ;;  %v6371_v35 = vor.u32 %v6928_v5, %v6368_v41  ;;  %v6932_v5 = vld [vmem:[%s10300_s6 + $0x304] sm:$0xf]  ;;  %v6384_v41 = vld [vmem:[%s10300_s6 + $0x310] sm:$0xf0] }
 0x276   :  { %3884 = vmatpush.bf16.msra.mxu3 %v6095_v16 }
 0x27a   :  { %3885 = vmatpush.bf16.msra.mxu3 %v6079_v43  ;;  %v6838_v43 = vld [vmem:[%s10300_s6 + $0xc] sm:$0xf0] }
 0x27e   :  { %3886 = vmatpush.bf16.msra.mxu3 %v6063_v39 }
 0x2d0   :  { %v3139_v4 = vpop.f32.mrf.mxu0 }
 0x2d6   :  { %v3153_v21 = vpop.f32.mrf.mxu1 }
 0x2d7   :  { %v3154_v30 = vadd.f32 %v3153_v21, %v3139_v4  ;;  %v6383_v21 = vor.u32 %v6934_v52, %v6382_v34  ;;  %v6174_v4 = vld [vmem:[%s10300_s6 + $0x160] sm:$0xf]  ;;  %v6243_v34 = vor.u32 %v6896_v47, %v6240_v18  ;;  %v6224_v52 = vld [vmem:[%s10300_s6 + $0x1d0] sm:$0xf0] }
 0x2d8   :  { %v3141_v28 = vpop.f32.mrf.mxu0  ;;  %v6320_v18 = vld [vmem:[%s10300_s6 + $0x290] sm:$0xf0] }
 0x2d9   :  { %3932 = vmatpush.bf16.msra.mxu2 %v6383_v21 }
 0x2db   :  { %v3167_v50 = vpop.f32.mrf.mxu2 }
 0x2dc   :  { %v3168_v44 = vadd.f32 %v3167_v50, %v3154_v30  ;;  %v6882_v50 = vld [vmem:[%s10300_s6 + $0x16c] sm:$0xf0]  ;;  %v6047_v30 = vor.u32 %v6850_v9, %v6046_v37  ;;  %v6892_v9 = vld [vmem:[%s10300_s6 + $0x1c4] sm:$0xf] }
 0x2dd   :  { %v6175_v0 = vor.u32 %v6882_v50, %v6174_v4  ;;  %v6227_v21 = vor.u32 %v6892_v9, %v6224_v52  ;;  %v6856_v4 = vld [vmem:[%s10300_s6 + $0xa4] sm:$0xf]  ;;  %v6080_v50 = vld [vmem:[%s10300_s6 + $0xb0] sm:$0xf0] }
 0x2de   :  { %v3155_v29 = vpop.f32.mrf.mxu1  ;;  %3887 = vmatpush.bf16.msra.mxu3 %v6047_v30  ;;  %v6888_v30 = vld [vmem:[%s10300_s6 + $0x1a4] sm:$0xf]  ;;  %v6144_v9 = vld [vmem:[%s10300_s6 + $0x130] sm:$0xf0] }
 0x2df   :  { %v3156_v11 = vadd.f32 %v3155_v29, %v3141_v28  ;;  %v6030_v29 = vld [vmem:[%s10300_s6 + $0x40] sm:$0xf]  ;;  %v6878_v28 = vld [vmem:[%s10300_s6 + $0x14c] sm:$0xf0]  ;;  %3901 = vmatpush.bf16.msra.mxu0 %v6175_v0  ;;  %v6852_v0 = vld [vmem:[%s10300_s6 + $0x84] sm:$0xf] }
 0x2e0   :  { %v6159_v45 = vor.u32 %v6878_v28, %v6158_v10  ;;  %v6064_v10 = vld [vmem:[%s10300_s6 + $0x90] sm:$0xf0] }
 0x2e1   :  { %v6352_v28 = vld [vmem:[%s10300_s6 + $0x2d0] sm:$0xf0] }
 0x2e3   :  { %v3169_v24 = vpop.f32.mrf.mxu2  ;;  %3902 = vmatpush.bf16.msra.mxu0 %v6159_v45  ;;  %v6848_v45 = vld [vmem:[%s10300_s6 + $0x64] sm:$0xf] }
 0x2e4   :  { %v3170_v20 = vadd.f32 %v3169_v24, %v3156_v11  ;;  %v6302_v24 = vld [vmem:[%s10300_s6 + $0x260] sm:$0xf]  ;;  %v6031_v11 = vor.u32 %v6846_v49, %v6030_v29  ;;  %v6910_v49 = vld [vmem:[%s10300_s6 + $0x24c] sm:$0xf0] }
 0x2e5   :  { %v6303_v58 = vor.u32 %v6914_v27, %v6302_v24  ;;  %v6286_v29 = vld [vmem:[%s10300_s6 + $0x240] sm:$0xf]  ;;  %v6884_v24 = vld [vmem:[%s10300_s6 + $0x184] sm:$0xf]  ;;  %v6192_v27 = vld [vmem:[%s10300_s6 + $0x190] sm:$0xf0] }
 0x2e6   :  { %3888 = vmatpush.bf16.msra.mxu3 %v6031_v11 }
 0x2e7   :  { %3903 = vmatpush.bf16.msra.mxu0 %v6143_v2  ;;  %v6844_v2 = vld [vmem:[%s10300_s6 + $0x44] sm:$0xf] }
 0x2f4   :  { %v3181_v56 = vpop.f32.mrf.mxu3 }
 0x2f5   :  { %v3182_v15 = vadd.f32 %v3181_v56, %v3168_v44  ;;  %v6318_v44 = vld [vmem:[%s10300_s6 + $0x280] sm:$0xf]  ;;  %v6918_v56 = vld [vmem:[%s10300_s6 + $0x28c] sm:$0xf0] }
 0x2f6   :  { %v6319_v12 = vor.u32 %v6918_v56, %v6318_v44  ;;  %v6208_v44 = vld [vmem:[%s10300_s6 + $0x1b0] sm:$0xf0]  ;;  %v6083_v56 = vor.u32 %v6856_v4, %v6080_v50  ;;  %v6908_v4 = vld [vmem:[%s10300_s6 + $0x244] sm:$0xf] }
 0x2f7   :  { %v9440_v19 = vmax.f32 %v3182_v15, 1e-24 }
 0x2f8   :  { %3914 = vmatpush.bf16.msrb.mxu1 %v6319_v12  ;;  %v6924_v12 = vld [vmem:[%s10300_s6 + $0x2c4] sm:$0xf] }
 0x2f9   :  { %6997 = vrsqrt.f32 %v9440_v19  ;;  %vm3194_vm8 = vweird.f32 %v9440_v19  ;;  %v6355_v11 = vor.u32 %v6924_v12, %v6352_v28  ;;  %v6256_v12 = vld [vmem:[%s10300_s6 + $0x210] sm:$0xf0] }
 0x2fc   :  { %v3183_v53 = vpop.f32.mrf.mxu3  ;;  %3915 = vmatpush.bf16.msrb.mxu1 %v6303_v58  ;;  %v6048_v58 = vld [vmem:[%s10300_s6 + $0x70] sm:$0xf0] }
 0x2fd   :  { %v3184_v46 = vadd.f32 %v3183_v53, %v3170_v20  ;;  %v6015_v53 = vor.u32 %v6842_v51, %v6014_v8  ;;  %v6906_v8 = vld [vmem:[%s10300_s6 + $0x22c] sm:$0xf0]  ;;  %v6051_v61 = vor.u32 %v6848_v45, %v6048_v58  ;;  %v6867_v45 = vld [vmem:[%s10300_s6 + $0xf4] sm:$0xf0] }
 0x2ff   :  { %v9488_v57 = vpop.eup %6997  ;;  %v9490_v26 = vmax.f32 %v3184_v46, 1e-24  ;;  %v5998_v46 = vld [vmem:[%s10300_s6] sm:$0xf]  ;;  %3889 = vmatpush.bf16.msra.mxu3 %v6015_v53  ;;  %v6880_v53 = vld [vmem:[%s10300_s6 + $0x164] sm:$0xf] }
 0x300   :  { %v3189_v32 = vmul.f32 %v9488_v57, %v9440_v19  ;;  %vm3195_vm7 = vweird.f32 %v9488_v57  ;;  %v6864_v19 = vld [vmem:[%s10300_s6 + $0xe4] sm:$0xf]  ;;  %v5999_v39 = vor.u32 %v6838_v43, %v5998_v46  ;;  %v6254_v46 = vld [vmem:[%s10300_s6 + $0x200] sm:$0xf]  ;;  %v6902_v43 = vld [vmem:[%s10300_s6 + $0x20c] sm:$0xf0] }
 0x301   :  { %6999 = vrsqrt.f32 %v9490_v26  ;;  %vm9566_vm9 = vmor %vm3194_vm8, %vm3195_vm7  ;;  %vm3204_vm11 = vweird.f32 %v9490_v26  ;;  %v6115_v23 = vor.u32 %v6864_v19, %v6112_v14  ;;  %v6255_v19 = vor.u32 %v6902_v43, %v6254_v46  ;;  %v6916_v14 = vld [vmem:[%s10300_s6 + $0x284] sm:$0xf]  ;;  %v6102_v43 = vld [vmem:[%s10300_s6 + $0xc8] sm:$0xf] }
 0x302   :  { %v3190_v42 = vmul.f32 %v9488_v57, %v3189_v32 }
 0x303   :  { %3890 = vmatpush.bf16.msra.mxu3 %v5999_v39  ;;  %v6840_v39 = vld [vmem:[%s10300_s6 + $0x24] sm:$0xf] }
 0x304   :  { %v3191_v15 = vmul.f32 0.5, %v3190_v42  ;;  %v6860_v42 = vld [vmem:[%s10300_s6 + $0xc4] sm:$0xf] }
 0x306   :  { %v3192_v16 = vsub.f32 1.5, %v3191_v15  ;;  %v6211_v15 = vor.u32 %v6888_v30, %v6208_v44  ;;  %v6288_v30 = vld [vmem:[%s10300_s6 + $0x250] sm:$0xf0]  ;;  %v6868_v44 = vld [vmem:[%s10300_s6 + $0x104] sm:$0xf] }
 0x307   :  { %v7000_v1 = vpop.eup %6999 }
 0x308   :  { %v3199_v13 = vmul.f32 %v7000_v1, %v9490_v26  ;;  %v3193_v36 = vmul.f32 %v9488_v57, %v3192_v16  ;;  %vm3205_vm10 = vweird.f32 %v7000_v1  ;;  %v6870_v26 = vld [vmem:[%s10300_s6 + $0x10c] sm:$0xf0]  ;;  %v6195_v16 = vor.u32 %v6884_v24, %v6192_v27 }
 0x309   :  { %vm3206_vm12 = vmor %vm3204_vm11, %vm3205_vm10  ;;  %v6127_v37 = vor.u32 %v6870_v26, %v6126_v54  ;;  %v6876_v54 = vld [vmem:[%s10300_s6 + $0x144] sm:$0xf]  ;;  %v6160_v26 = vld [vmem:[%s10300_s6 + $0x150] sm:$0xf0]  ;;  %vm4670_vm10 = vcmask 1043456   ;;  %vm4710_vm11 = vcmask 17408  }
 0x30a   :  { %v3200_v3 = vmul.f32 %v7000_v1, %v3199_v13  ;;  %v3197_v63 = vsel %vm9566_vm9, %v9488_v57, %v3193_v36  ;;  %v6096_v57 = vld [vmem:[%s10300_s6 + $0xd0] sm:$0xf0]  ;;  %v6067_v13 = vor.u32 %v6852_v0, %v6064_v10  ;;  %v6900_v10 = vld [vmem:[%s10300_s6 + $0x204] sm:$0xf] }
 0x30b   :  { %v6099_v17 = vor.u32 %v6860_v42, %v6096_v57  ;;  %3904 = vmatpush.bf16.msra.mxu0 %v6127_v37  ;;  %v6176_v36 = vld [vmem:[%s10300_s6 + $0x170] sm:$0xf0]  ;;  %v6872_v37 = vld [vmem:[%s10300_s6 + $0x124] sm:$0xf] }
 0x30c   :  { %v3201_v20 = vmul.f32 0.5, %v3200_v3  ;;  %v6270_v3 = vld [vmem:[%s10300_s6 + $0x220] sm:$0xf]  ;;  %v6304_v57 = vld [vmem:[%s10300_s6 + $0x270] sm:$0xf0] }
 0x30d   :  { %v6271_v51 = vor.u32 %v6906_v8, %v6270_v3  ;;  %v6935_v3 = vld [vmem:[%s10300_s6 + $0x314] sm:$0xf0] }
 0x30e   :  { %v3202_v59 = vsub.f32 1.5, %v3201_v20  ;;  %v6920_v20 = vld [vmem:[%s10300_s6 + $0x2a4] sm:$0xf] }
 0x30f   :  { %v6339_v31 = vor.u32 %v6920_v20, %v6336_v25 }
 0x310   :  { %v3203_v7 = vmul.f32 %v7000_v1, %v3202_v59  ;;  %v6179_v59 = vor.u32 %v6880_v53, %v6176_v36 }
 0x312   :  { %v3207_v32 = vsel %vm3206_vm12, %v7000_v1, %v3203_v7  ;;  %v6287_v1 = vor.u32 %v6910_v49, %v6286_v29  ;;  %v6032_v7 = vld [vmem:[%s10300_s6 + $0x50] sm:$0xf0]  ;;  %v6904_v49 = vld [vmem:[%s10300_s6 + $0x224] sm:$0xf] }
 0x313   :  { %v3208_v55 = vpack.c.bf16 %v3207_v32, %v3197_v63  ;;  %v6035_v47 = vor.u32 %v6844_v2, %v6032_v7  ;;  %v6323_v63 = vor.u32 %v6916_v14, %v6320_v18  ;;  %v6163_v32 = vor.u32 %v6876_v54, %v6160_v26  ;;  %v6899_v2 = vld [vmem:[%s10300_s6 + $0x1f4] sm:$0xf0] }
 0x314   :  { %3916 = vmatpush.bf16.msrb.mxu1 %v6287_v1  ;;  %v6272_v1 = vld [vmem:[%s10300_s6 + $0x230] sm:$0xf0] }
 0x315   :  { %5992 = vmatmul.msk.bf16.vlgmr.msrb.gmra.mxu3 %vm975_vm1, %v3208_v55  ;;  %5993 = vmatmul.msk.bf16.vlgmr.msrb.gmra.mxu0 %vm975_vm1, %v3208_v55  ;;  %v6275_v0 = vor.u32 %v6904_v49, %v6272_v1  ;;  %v6919_v49 = vld [vmem:[%s10300_s6 + $0x294] sm:$0xf0] }
 0x316   :  { %5994 = vmatmul.msk.bf16.vlgmr.msra.gmra.mxu1 %vm975_vm1, %v3208_v55  ;;  %5995 = vmatmul.msk.bf16.vlgmr.msrb.gmra.mxu2 %vm975_vm1, %v3208_v55  ;;  %v6387_v55 = vor.u32 %v6932_v5, %v6384_v41  ;;  %v6859_v5 = vld [vmem:[%s10300_s6 + $0xb4] sm:$0xf0] }
 0x317   :  { %3939 = vmatpush.bf16.msrb.mxu2 %v6115_v23  ;;  %3953 = vmatpush.bf16.msrb.mxu3 %v6243_v34  ;;  %v6016_v23 = vld [vmem:[%s10300_s6 + $0x30] sm:$0xf0]  ;;  %v6912_v34 = vld [vmem:[%s10300_s6 + $0x264] sm:$0xf] }
 0x318   :  { %3967 = vmatpush.bf16.msrb.mxu0 %v6371_v35  ;;  %3917 = vmatpush.bf16.msrb.mxu1 %v6271_v51  ;;  %v6019_v42 = vor.u32 %v6840_v39, %v6016_v23  ;;  %v6307_v52 = vor.u32 %v6912_v34, %v6304_v57  ;;  %v6147_v35 = vor.u32 %v6872_v37, %v6144_v9  ;;  %v6118_v51 = vld [vmem:[%s10300_s6 + $0xe8] sm:$0xf]  ;;  %v6895_v39 = vld [vmem:[%s10300_s6 + $0x1d4] sm:$0xf0] }
 0x319   :  { %v6855_v57 = vld [vmem:[%s10300_s6 + $0x94] sm:$0xf0]  ;;  %v6342_v9 = vld [vmem:[%s10300_s6 + $0x2a8] sm:$0xf] }
 0x31b   :  { %3940 = vmatpush.bf16.msrb.mxu2 %v6099_v17  ;;  %3954 = vmatpush.bf16.msrb.mxu3 %v6227_v21  ;;  %v6836_v17 = vld [vmem:[%s10300_s6 + $0x4] sm:$0xf]  ;;  %v6000_v21 = vld [vmem:[%s10300_s6 + $0x10] sm:$0xf0] }
 0x31c   :  { %3968 = vmatpush.bf16.msrb.mxu0 %v6355_v11  ;;  %3918 = vmatpush.bf16.msrb.mxu1 %v6255_v19  ;;  %v6003_v50 = vor.u32 %v6836_v17, %v6000_v21  ;;  %v6246_v19 = vld [vmem:[%s10300_s6 + $0x1e8] sm:$0xf]  ;;  %v6891_v17 = vld [vmem:[%s10300_s6 + $0x1b4] sm:$0xf0] }
 0x31f   :  { %3941 = vmatpush.bf16.msrb.mxu2 %v6083_v56  ;;  %3955 = vmatpush.bf16.msrb.mxu3 %v6211_v15  ;;  %v6128_v56 = vld [vmem:[%s10300_s6 + $0x110] sm:$0xf0]  ;;  %v6291_v15 = vor.u32 %v6908_v4, %v6288_v30  ;;  %v6865_v4 = vld [vmem:[%s10300_s6 + $0xec] sm:$0xf] }
 0x320   :  { %3969 = vmatpush.bf16.msrb.mxu0 %v6339_v31  ;;  %3988 = vmatpush.bf16.msra.mxu1 %v6387_v55  ;;  %v6131_v29 = vor.u32 %v6868_v44, %v6128_v56  ;;  %v6230_v55 = vld [vmem:[%s10300_s6 + $0x1c8] sm:$0xf]  ;;  %v6851_v56 = vld [vmem:[%s10300_s6 + $0x74] sm:$0xf0] }
 0x321   :  { %v6231_v37 = vor.u32 %v6895_v39, %v6230_v55  ;;  %v6054_v44 = vld [vmem:[%s10300_s6 + $0x68] sm:$0xf]  ;;  %v6875_v55 = vld [vmem:[%s10300_s6 + $0x134] sm:$0xf0] }
 0x323   :  { %3942 = vmatpush.bf16.msrb.mxu2 %v6067_v13  ;;  %3956 = vmatpush.bf16.msrb.mxu3 %v6195_v16  ;;  %v6259_v13 = vor.u32 %v6900_v10, %v6256_v12  ;;  %v6390_v16 = vld [vmem:[%s10300_s6 + $0x308] sm:$0xf]  ;;  %v6887_v10 = vld [vmem:[%s10300_s6 + $0x194] sm:$0xf0]  ;;  %v6055_v12 = vor.u32 %v6851_v56, %v6054_v44  ;;  %v6933_v44 = vld [vmem:[%s10300_s6 + $0x30c] sm:$0xf] }
 0x324   :  { %3970 = vmatpush.bf16.msrb.mxu0 %v6323_v63  ;;  %v6391_v36 = vor.u32 %v6935_v3, %v6390_v16  ;;  %v6310_v3 = vld [vmem:[%s10300_s6 + $0x268] sm:$0xf]  ;;  %v6392_v56 = vld [vmem:[%s10300_s6 + $0x318] sm:$0xf0] }
 0x327   :  { %3943 = vmatpush.bf16.msrb.mxu2 %v6051_v61  ;;  %3957 = vmatpush.bf16.msrb.mxu3 %v6179_v59  ;;  %v6119_v59 = vor.u32 %v6867_v45, %v6118_v51  ;;  %v6182_v45 = vld [vmem:[%s10300_s6 + $0x168] sm:$0xf] }
 0x328   :  { %3971 = vmatpush.bf16.msrb.mxu0 %v6307_v52  ;;  %v6923_v52 = vld [vmem:[%s10300_s6 + $0x2b4] sm:$0xf0] }
 0x329   :  { %v6343_v30 = vor.u32 %v6923_v52, %v6342_v9  ;;  %v6232_v9 = vld [vmem:[%s10300_s6 + $0x1d8] sm:$0xf0]  ;;  %v6134_v52 = vld [vmem:[%s10300_s6 + $0x108] sm:$0xf] }
 0x32b   :  { %3944 = vmatpush.bf16.msrb.mxu2 %v6035_v47  ;;  %3958 = vmatpush.bf16.msrb.mxu3 %v6163_v32  ;;  %v6086_v32 = vld [vmem:[%s10300_s6 + $0xa8] sm:$0xf] }
 0x32c   :  { %3972 = vmatpush.bf16.msrb.mxu0 %v6291_v15  ;;  %v6087_v23 = vor.u32 %v6859_v5, %v6086_v32  ;;  %v6248_v32 = vld [vmem:[%s10300_s6 + $0x1f8] sm:$0xf0]  ;;  %v6278_v5 = vld [vmem:[%s10300_s6 + $0x228] sm:$0xf] }
 0x32f   :  { %3945 = vmatpush.bf16.msrb.mxu2 %v6019_v42  ;;  %3959 = vmatpush.bf16.msrb.mxu3 %v6147_v35  ;;  %v6070_v42 = vld [vmem:[%s10300_s6 + $0x88] sm:$0xf] }
 0x330   :  { %3973 = vmatpush.bf16.msrb.mxu0 %v6275_v0  ;;  %v6214_v35 = vld [vmem:[%s10300_s6 + $0x1a8] sm:$0xf]  ;;  %v6071_v21 = vor.u32 %v6855_v57, %v6070_v42 }
 0x331   :  { %v6215_v15 = vor.u32 %v6891_v17, %v6214_v35  ;;  %v6198_v0 = vld [vmem:[%s10300_s6 + $0x188] sm:$0xf]  ;;  %v6871_v17 = vld [vmem:[%s10300_s6 + $0x114] sm:$0xf0] }
 0x332   :  { %v6199_v16 = vor.u32 %v6887_v10, %v6198_v0  ;;  %v6135_v10 = vor.u32 %v6871_v17, %v6134_v52 }
 0x333   :  { %3946 = vmatpush.bf16.msrb.mxu2 %v6003_v50  ;;  %3960 = vmatpush.bf16.msrb.mxu3 %v6131_v29  ;;  %v6120_v50 = vld [vmem:[%s10300_s6 + $0xf8] sm:$0xf0]  ;;  %v6326_v29 = vld [vmem:[%s10300_s6 + $0x288] sm:$0xf] }
 0x334   :  { %3974 = vmatpush.bf16.msrb.mxu0 %v6259_v13  ;;  %v6123_v1 = vor.u32 %v6865_v4, %v6120_v50  ;;  %v6861_v13 = vld [vmem:[%s10300_s6 + $0xcc] sm:$0xf]  ;;  %v6903_v4 = vld [vmem:[%s10300_s6 + $0x214] sm:$0xf0] }
 0x392   :  { %v3235_v28 = vpop.f32.mrf.mxu0 }
 0x393   :  { %v3249_v24 = vpop.f32.mrf.mxu1  ;;  %v3269_v58 = vmul.f32 %v3235_v28, %v9390_v60  ;;  %v6863_v60 = vld [vmem:[%s10300_s6 + $0xd4] sm:$0xf0]  ;;  %v6104_v28 = vld [vmem:[%s10300_s6 + $0xd8] sm:$0xf0] }
 0x394   :  { %v3270_v25 = vmul.f32 %v3249_v24, %v9404_v6  ;;  %v6931_v6 = vld [vmem:[%s10300_s6 + $0x2f4] sm:$0xf0]  ;;  %v6103_v18 = vor.u32 %v6863_v60, %v6102_v43  ;;  %v6327_v24 = vor.u32 %v6919_v49, %v6326_v29  ;;  %v6107_v51 = vor.u32 %v6861_v13, %v6104_v28  ;;  %v6294_v60 = vld [vmem:[%s10300_s6 + $0x248] sm:$0xf]  ;;  %v6845_v29 = vld [vmem:[%s10300_s6 + $0x4c] sm:$0xf] }
 0x395   :  { %v6040_v49 = vld [vmem:[%s10300_s6 + $0x58] sm:$0xf0]  ;;  %v6395_v28 = vor.u32 %v6933_v44, %v6392_v56 }
 0x396   :  { %v6216_v13 = vld [vmem:[%s10300_s6 + $0x1b8] sm:$0xf0] }
 0x398   :  { %v3221_v27 = vpop.f32.mrf.mxu3 }
 0x399   :  { %v3263_v11 = vpop.f32.mrf.mxu2  ;;  %v3268_v7 = vmul.f32 %v3221_v27, %v9375_v48  ;;  %v6247_v48 = vor.u32 %v6899_v2, %v6246_v19  ;;  %v6038_v27 = vld [vmem:[%s10300_s6 + $0x48] sm:$0xf]  ;;  %v6879_v19 = vld [vmem:[%s10300_s6 + $0x154] sm:$0xf0] }
 0x39a   :  { %v3237_v8 = vpop.f32.mrf.mxu0  ;;  %v3271_v54 = vmul.f32 %v3263_v11, %v9422_v22  ;;  %v6927_v22 = vld [vmem:[%s10300_s6 + $0x2d4] sm:$0xf0] }
 0x39b   :  { %v3273_v20 = vmul.f32 %v3237_v8, %v9392_v40  ;;  %v3251_v61 = vpop.f32.mrf.mxu1  ;;  %v6374_v40 = vld [vmem:[%s10300_s6 + $0x2e8] sm:$0xf]  ;;  %v6847_v11 = vld [vmem:[%s10300_s6 + $0x54] sm:$0xf0] }
 0x39c   :  { %v3274_v53 = vmul.f32 %v3251_v61, %v9406_v38  ;;  %v6375_v63 = vor.u32 %v6931_v6, %v6374_v40  ;;  %v6915_v8 = vld [vmem:[%s10300_s6 + $0x274] sm:$0xf0]  ;;  %v6857_v61 = vld [vmem:[%s10300_s6 + $0xac] sm:$0xf] }
 0x39d   :  { %v9774_v31 = vpack.c.bf16 %v3273_v20, %v3269_v58  ;;  %v6883_v58 = vld [vmem:[%s10300_s6 + $0x174] sm:$0xf0]  ;;  %v6039_v20 = vor.u32 %v6847_v11, %v6038_v27  ;;  %v6043_v27 = vor.u32 %v6845_v29, %v6040_v49  ;;  %v6925_v11 = vld [vmem:[%s10300_s6 + $0x2cc] sm:$0xf] }
 0x39e   :  { %v9776_v46 = vpack.c.bf16 %v3274_v53, %v3270_v25  ;;  %v6088_v25 = vld [vmem:[%s10300_s6 + $0xb8] sm:$0xf0]  ;;  %v6311_v53 = vor.u32 %v6915_v8, %v6310_v3  ;;  %v6183_v43 = vor.u32 %v6883_v58, %v6182_v45  ;;  %v6911_v40 = vld [vmem:[%s10300_s6 + $0x254] sm:$0xf0]  ;;  %v6841_v3 = vld [vmem:[%s10300_s6 + $0x2c] sm:$0xf] }
 0x39f   :  { %3905 = vmatmul.bf16.vlgmr.msra.gmra.mxu0 %v9774_v31  ;;  %v6091_v6 = vor.u32 %v6857_v61, %v6088_v25  ;;  %v6024_v8 = vld [vmem:[%s10300_s6 + $0x38] sm:$0xf0]  ;;  %v6885_v45 = vld [vmem:[%s10300_s6 + $0x18c] sm:$0xf] }
 0x3a0   :  { %3919 = vmatmul.bf16.vlgmr.msrb.gmra.mxu1 %v9776_v46  ;;  %v3223_v38 = vpop.f32.mrf.mxu3  ;;  %4044 = vmatpush.bf16.msra.mxu0 %v6391_v36  ;;  %v6022_v36 = vld [vmem:[%s10300_s6 + $0x28] sm:$0xf]  ;;  %v6200_v58 = vld [vmem:[%s10300_s6 + $0x198] sm:$0xf0]  ;;  %v6027_v61 = vor.u32 %v6841_v3, %v6024_v8  ;;  %v6921_v25 = vld [vmem:[%s10300_s6 + $0x2ac] sm:$0xf] }
 0x3a1   :  { %3995 = vmatpush.bf16.msrb.mxu1 %v6119_v59  ;;  %v3272_v14 = vmul.f32 %v3223_v38, %v9377_v33  ;;  %v3265_v47 = vpop.f32.mrf.mxu2  ;;  %v6358_v33 = vld [vmem:[%s10300_s6 + $0x2c8] sm:$0xf]  ;;  %v6843_v59 = vld [vmem:[%s10300_s6 + $0x34] sm:$0xf0] }
 0x3a2   :  { %v3275_v26 = vmul.f32 %v3265_v47, %v9424_v62  ;;  %v6359_v34 = vor.u32 %v6927_v22, %v6358_v33  ;;  %v6166_v38 = vld [vmem:[%s10300_s6 + $0x148] sm:$0xf]  ;;  %v6023_v2 = vor.u32 %v6843_v59, %v6022_v36  ;;  %v6295_v47 = vor.u32 %v6911_v40, %v6294_v60  ;;  %v6837_v36 = vld [vmem:[%s10300_s6 + $0xc] sm:$0xf]  ;;  %v6008_v59 = vld [vmem:[%s10300_s6 + $0x18] sm:$0xf0] }
 0x3a3   :  { %v9808_v41 = vpack.c.bf16 %v3272_v14, %v3268_v7  ;;  %v6853_v7 = vld [vmem:[%s10300_s6 + $0x8c] sm:$0xf]  ;;  %v6072_v14 = vld [vmem:[%s10300_s6 + $0x98] sm:$0xf0]  ;;  %v6150_v22 = vld [vmem:[%s10300_s6 + $0x128] sm:$0xf] }
 0x3a4   :  { %v9816_v62 = vpack.c.bf16 %v3275_v26, %v3271_v54  ;;  %v6839_v54 = vld [vmem:[%s10300_s6 + $0x14] sm:$0xf0]  ;;  %v6897_v26 = vld [vmem:[%s10300_s6 + $0x1ec] sm:$0xf]  ;;  %v6075_v33 = vor.u32 %v6853_v7, %v6072_v14  ;;  %v6151_v35 = vor.u32 %v6875_v55, %v6150_v22  ;;  %v6184_v40 = vld [vmem:[%s10300_s6 + $0x178] sm:$0xf0] }
 0x3a5   :  { %3996 = vmatpush.bf16.msrb.mxu1 %v6103_v18  ;;  %3891 = vmatmul.bf16.vlgmr.msra.gmra.mxu3 %v9808_v41  ;;  %v6006_v18 = vld [vmem:[%s10300_s6 + $0x8] sm:$0xf]  ;;  %v6251_v42 = vor.u32 %v6897_v26, %v6248_v32  ;;  %v6881_v60 = vld [vmem:[%s10300_s6 + $0x16c] sm:$0xf]  ;;  %v6312_v26 = vld [vmem:[%s10300_s6 + $0x278] sm:$0xf0] }
 0x3a6   :  { %6396 = vmatmul.msk.bf16.vlgmr.msra.gmra.mxu2 %vm3126_vm6, %v9816_v62  ;;  %4023 = vmatpush.bf16.msra.mxu3 %v6375_v63  ;;  %v6167_v63 = vor.u32 %v6879_v19, %v6166_v38  ;;  %v6007_v39 = vor.u32 %v6839_v54, %v6006_v18  ;;  %v6011_v38 = vor.u32 %v6837_v36, %v6008_v59  ;;  %v6917_v19 = vld [vmem:[%s10300_s6 + $0x28c] sm:$0xf]  ;;  %v6296_v22 = vld [vmem:[%s10300_s6 + $0x258] sm:$0xf0] }
 0x3a7   :  { %4009 = vmatpush.bf16.msra.mxu2 %v6247_v48  ;;  %v6907_v48 = vld [vmem:[%s10300_s6 + $0x234] sm:$0xf0]  ;;  %v6187_v7 = vor.u32 %v6881_v60, %v6184_v40  ;;  %v6877_v14 = vld [vmem:[%s10300_s6 + $0x14c] sm:$0xf] }
 0x3a8   :  { %v6279_v57 = vor.u32 %v6907_v48, %v6278_v5  ;;  %v6913_v54 = vld [vmem:[%s10300_s6 + $0x26c] sm:$0xf]  ;;  %v6152_v5 = vld [vmem:[%s10300_s6 + $0x138] sm:$0xf0] }
 0x3a9   :  { %3997 = vmatpush.bf16.msrb.mxu1 %v6087_v23  ;;  %v6849_v23 = vld [vmem:[%s10300_s6 + $0x6c] sm:$0xf]  ;;  %v6315_v48 = vor.u32 %v6913_v54, %v6312_v26  ;;  %v10106_v26 = vld [vmem:[%s10303_s9 + $0x38] sm:$0xff] }
 0x3aa   :  { %4024 = vmatpush.bf16.msra.mxu3 %v6359_v34  ;;  %v6056_v34 = vld [vmem:[%s10300_s6 + $0x78] sm:$0xf0]  ;;  %v6873_v32 = vld [vmem:[%s10300_s6 + $0x12c] sm:$0xf] }
 0x3ab   :  { %4010 = vmatpush.bf16.msra.mxu2 %v6231_v37  ;;  %v6893_v37 = vld [vmem:[%s10300_s6 + $0x1cc] sm:$0xf]  ;;  %v6059_v50 = vor.u32 %v6849_v23, %v6056_v34 }
 0x3ac   :  { %v6869_v55 = vld [vmem:[%s10300_s6 + $0x10c] sm:$0xf] }
 0x3ad   :  { %3998 = vmatpush.bf16.msrb.mxu1 %v6071_v21  ;;  %v6262_v21 = vld [vmem:[%s10300_s6 + $0x208] sm:$0xf]  ;;  %v6905_v34 = vld [vmem:[%s10300_s6 + $0x22c] sm:$0xf] }
 0x3ae   :  { %4025 = vmatpush.bf16.msra.mxu3 %v6343_v30  ;;  %v6929_v30 = vld [vmem:[%s10300_s6 + $0x2ec] sm:$0xf]  ;;  %v6263_v0 = vor.u32 %v6903_v4, %v6262_v21 }
 0x3af   :  { %4011 = vmatpush.bf16.msra.mxu2 %v6215_v15  ;;  %3975 = vmatmul.bf16.vlgmr.msrb.gmra.mxu0 %v9776_v46  ;;  %v6376_v15 = vld [vmem:[%s10300_s6 + $0x2f8] sm:$0xf0] }
 0x3b0   :  { %6397 = vmatmul.msk.bf16.vlgmr.msra.gmra.mxu1 %vm3126_vm6, %v9816_v62  ;;  %4051 = vmatpush.bf16.msrb.mxu0 %v6123_v1  ;;  %v6235_v1 = vor.u32 %v6893_v37, %v6232_v9  ;;  %v6901_v9 = vld [vmem:[%s10300_s6 + $0x20c] sm:$0xf] }
 0x3b1   :  { %3999 = vmatpush.bf16.msrb.mxu1 %v6055_v12  ;;  %v6889_v12 = vld [vmem:[%s10300_s6 + $0x1ac] sm:$0xf] }
 0x3b2   :  { %4026 = vmatpush.bf16.msra.mxu3 %v6327_v24  ;;  %v6379_v24 = vor.u32 %v6929_v30, %v6376_v15 }
 0x3b3   :  { %4012 = vmatpush.bf16.msra.mxu2 %v6199_v16  ;;  %v6360_v16 = vld [vmem:[%s10300_s6 + $0x2d8] sm:$0xf0] }
 0x3b4   :  { %4052 = vmatpush.bf16.msrb.mxu0 %v6107_v51  ;;  %v6219_v51 = vor.u32 %v6889_v12, %v6216_v13 }
 0x3b5   :  { %4000 = vmatpush.bf16.msrb.mxu1 %v6039_v20  ;;  %3961 = vmatmul.bf16.vlgmr.msrb.gmra.mxu3 %v9774_v31  ;;  %v6363_v20 = vor.u32 %v6925_v11, %v6360_v16 }
 0x3b6   :  { %3947 = vmatmul.bf16.vlgmr.msrb.gmra.mxu2 %v9808_v41  ;;  %4027 = vmatpush.bf16.msra.mxu3 %v6311_v53  ;;  %v6344_v53 = vld [vmem:[%s10300_s6 + $0x2b8] sm:$0xf0] }
 0x3b7   :  { %4013 = vmatpush.bf16.msra.mxu2 %v6183_v43  ;;  %v6203_v43 = vor.u32 %v6885_v45, %v6200_v58 }
 0x3b8   :  { %4053 = vmatpush.bf16.msrb.mxu0 %v6091_v6  ;;  %v6347_v6 = vor.u32 %v6921_v25, %v6344_v53 }
 0x3b9   :  { %4001 = vmatpush.bf16.msrb.mxu1 %v6023_v2  ;;  %v6328_v2 = vld [vmem:[%s10300_s6 + $0x298] sm:$0xf0] }
 0x3ba   :  { %4028 = vmatpush.bf16.msra.mxu3 %v6295_v47  ;;  %v6168_v47 = vld [vmem:[%s10300_s6 + $0x158] sm:$0xf0]  ;;  %v6331_v18 = vor.u32 %v6917_v19, %v6328_v2 }
 0x3bb   :  { %4014 = vmatpush.bf16.msra.mxu2 %v6167_v63  ;;  %v6171_v63 = vor.u32 %v6877_v14, %v6168_v47 }
 0x3bc   :  { %4054 = vmatpush.bf16.msrb.mxu0 %v6075_v33  ;;  %v6909_v33 = vld [vmem:[%s10300_s6 + $0x24c] sm:$0xf] }
 0x3bd   :  { %4002 = vmatpush.bf16.msrb.mxu1 %v6007_v39  ;;  %v6136_v39 = vld [vmem:[%s10300_s6 + $0x118] sm:$0xf0]  ;;  %v6299_v23 = vor.u32 %v6909_v33, %v6296_v22  ;;  %v10131_v33 = vld [vmem:[%s10303_s9 + $0x68] sm:$0xff] }
 0x3be   :  { %4029 = vmatpush.bf16.msra.mxu3 %v6279_v57  ;;  %v6139_v57 = vor.u32 %v6869_v55, %v6136_v39  ;;  %v10137_v55 = vld [vmem:[%s10303_s9 + $0x20] sm:$0xff] }
 0x3bf   :  { %4015 = vmatpush.bf16.msra.mxu2 %v6151_v35  ;;  %6398 = vmatmul.msk.bf16.vlgmr.msra.gmra.mxu0 %vm3126_vm6, %v9816_v62  ;;  %v10143_v39 = vld [vmem:[%s10303_s9 + $0x60] sm:$0xff] }
 0x3c0   :  { %4003 = vmatmul.bf16.vlgmr.msrb.gmra.mxu1 %v9808_v41  ;;  %4055 = vmatpush.bf16.msrb.mxu0 %v6059_v50 }
 0x3c1   :  { %4065 = vmatpush.bf16.msra.mxu1 %v6251_v42  ;;  %v6280_v42 = vld [vmem:[%s10300_s6 + $0x238] sm:$0xf0] }
 0x3c2   :  { %4030 = vmatpush.bf16.msra.mxu3 %v6263_v0  ;;  %v6283_v37 = vor.u32 %v6905_v34, %v6280_v42  ;;  %v10149_v42 = vld [vmem:[%s10303_s9 + $0x18] sm:$0xff] }
 0x3c3   :  { %4016 = vmatpush.bf16.msra.mxu2 %v6135_v10 }
 0x3c4   :  { %4056 = vmatpush.bf16.msrb.mxu0 %v6043_v27 }
 0x3c5   :  { %4066 = vmatpush.bf16.msra.mxu1 %v6235_v1  ;;  %4031 = vmatmul.bf16.vlgmr.msra.gmra.mxu3 %v9776_v46 }
 0x3c6   :  { %4100 = vmatpush.bf16.msrb.mxu3 %v6395_v28  ;;  %4017 = vmatmul.bf16.vlgmr.msra.gmra.mxu2 %v9774_v31 }
 0x3c7   :  { %4079 = vmatpush.bf16.msrb.mxu2 %v6379_v24 }
 0x3c8   :  { %4057 = vmatpush.bf16.msrb.mxu0 %v6027_v61 }
 0x3c9   :  { %4067 = vmatpush.bf16.msra.mxu1 %v6219_v51 }
 0x3cb   :  { %4080 = vmatpush.bf16.msrb.mxu2 %v6363_v20 }
 0x3cc   :  { %4058 = vmatpush.bf16.msrb.mxu0 %v6011_v38 }
 0x3cd   :  { %4068 = vmatpush.bf16.msra.mxu1 %v6203_v43 }
 0x3cf   :  { %4081 = vmatpush.bf16.msrb.mxu2 %v6347_v6  ;;  %4059 = vmatmul.bf16.vlgmr.msrb.gmra.mxu0 %v9808_v41  ;;  %v6155_v41 = vor.u32 %v6873_v32, %v6152_v5  ;;  %v10115_v32 = vld [vmem:[%s10303_s9 + $0x30] sm:$0xff] }
 0x3d0   :  { %v6951_v5 = vld [vmem:[%s10303_s9 + $0x70] sm:$0xff] }
 0x3d1   :  { %4069 = vmatpush.bf16.msra.mxu1 %v6187_v7 }
 0x3d3   :  { %4082 = vmatpush.bf16.msrb.mxu2 %v6331_v18 }
 0x3d5   :  { %4070 = vmatpush.bf16.msra.mxu1 %v6171_v63  ;;  %6399 = vmatmul.msk.bf16.vlgmr.msrb.gmra.mxu3 %vm3126_vm6, %v9816_v62  ;;  %v6264_v62 = vld [vmem:[%s10300_s6 + $0x218] sm:$0xf0] }
 0x3d6   :  { %v6267_v52 = vor.u32 %v6901_v9, %v6264_v62  ;;  %v6952_v63 = vld [vmem:[%s10303_s9 + $0x78] sm:$0xff] }
 0x3d7   :  { %4083 = vmatpush.bf16.msrb.mxu2 %v6315_v48  ;;  %v10126_v48 = vld [vmem:[%s10303_s9 + $0x28] sm:$0xff] }
 0x3d9   :  { %4071 = vmatpush.bf16.msra.mxu1 %v6155_v41 }
 0x3db   :  { %4084 = vmatpush.bf16.msrb.mxu2 %v6299_v23 }
 0x3dd   :  { %4072 = vmatpush.bf16.msra.mxu1 %v6139_v57 }
 0x3df   :  { %4085 = vmatpush.bf16.msrb.mxu2 %v6283_v37 }
 0x3e0   :  { %4073 = vmatmul.bf16.vlgmr.msra.gmra.mxu1 %v9774_v31 }
 0x3e3   :  { %4086 = vmatpush.bf16.msrb.mxu2 %v6267_v52 }
 0x3e6   :  { %4087 = vmatmul.bf16.vlgmr.msrb.gmra.mxu2 %v9776_v46  ;;  %v10097_v46 = vld [vmem:[%s10301_s7] sm:$0xff] }
 0x41c   :  { %v3906_v17 = vpop.f32.mrf.mxu0 }
 0x41d   :  { %v3920_v35 = vpop.f32.mrf.mxu1 }
 0x424   :  { %v3908_v30 = vpop.f32.mrf.mxu0 }
 0x425   :  { %v3922_v4 = vpop.f32.mrf.mxu1 }
 0x428   :  { %v3892_v21 = vpop.f32.mrf.mxu3 }
 0x429   :  { %v3934_v50 = vpop.f32.mrf.mxu2  ;;  %v3907_v44 = vadd.f32 %v3906_v17, %v3892_v21 }
 0x42b   :  { %v3921_v15 = vadd.f32 %v3920_v35, %v3907_v44  ;;  %v6948_v44 = vld [vmem:[%s10303_s9 + $0x58] sm:$0xff] }
 0x42c   :  { %v3976_v13 = vpop.f32.mrf.mxu0 }
 0x42d   :  { %v3990_v1 = vpop.f32.mrf.mxu1  ;;  %v3935_v10 = vadd.f32 %v3934_v50, %v3921_v15  ;;  %v10166_v15 = vld [vmem:[%s10303_s9 + $0x10] sm:$0xff] }
 0x430   :  { %v3894_v56 = vpop.f32.mrf.mxu3 }
 0x431   :  { %v3909_v29 = vadd.f32 %v3908_v30, %v3894_v56  ;;  %v3936_v49 = vpop.f32.mrf.mxu2  ;;  %v10161_v56 = vld [vmem:[%s10302_s8] sm:$0xf] }
 0x433   :  { %v3923_v0 = vadd.f32 %v3922_v4, %v3909_v29  ;;  %v10172_v29 = vld [vmem:[%s10303_s9 + $0x50] sm:$0xff] }
 0x434   :  { %v3978_v3 = vpop.f32.mrf.mxu0 }
 0x435   :  { %v3937_v12 = vadd.f32 %v3936_v49, %v3923_v0  ;;  %v3992_v27 = vpop.f32.mrf.mxu1  ;;  %v10177_v49 = vld [vmem:[%s10303_s9 + $0x8] sm:$0xff] }
 0x436   :  { %v10184_v0 = vld [vmem:[%s10303_s9 + $0x48] sm:$0xff] }
 0x437   :  { %v4109_v31 = vpack.c.bf16 %v3937_v12, %v3935_v10 }
 0x438   :  { %v3962_v28 = vpop.f32.mrf.mxu3 }
 0x439   :  { %v3948_v24 = vpop.f32.mrf.mxu2  ;;  %4138 = vmatpush.bf16.msra.mxu3 %v4109_v31  ;;  %v10194_v31 = vld [vmem:[%s10303_s9] sm:$0xff] }
 0x43a   :  { %v3963_v11 = vadd.f32 %v3962_v28, %v3948_v24 }
 0x43c   :  { %6404 = vmatmul.msk.bf16.vlgmr.msra.gmra.mxu3 %vm3126_vm6, %v10097_v46  ;;  %v3977_v51 = vadd.f32 %v3976_v13, %v3963_v11  ;;  %v4046_v43 = vpop.f32.mrf.mxu0  ;;  %v6960_v13 = vld [vmem:[%s10303_s9 + $0xb8] sm:$0xff]  ;;  %v4116_v11 = vperm.slane %v10161_v56, 1 }
 0x43d   :  { %v4004_v25 = vpop.f32.mrf.mxu1  ;;  %4442 = vmatpush.bf16.msrb.mxu3 %v10106_v26 }
 0x43e   :  { %v3991_v20 = vadd.f32 %v3990_v1, %v3977_v51  ;;  %v4115_v1 = vperm.slane %v10161_v56, 0 }
 0x440   :  { %v3964_v16 = vpop.f32.mrf.mxu3 }
 0x441   :  { %v3950_v8 = vpop.f32.mrf.mxu2  ;;  %4443 = vmatpush.bf16.msrb.mxu3 %v10115_v32 }
 0x442   :  { %v3965_v45 = vadd.f32 %v3964_v16, %v3950_v8  ;;  %v6958_v8 = vld [vmem:[%s10303_s9 + $0xa8] sm:$0xff] }
 0x444   :  { %v3979_v58 = vadd.f32 %v3978_v3, %v3965_v45  ;;  %v4048_v14 = vpop.f32.mrf.mxu0 }
 0x445   :  { %v4006_v40 = vpop.f32.mrf.mxu1  ;;  %4444 = vmatpush.bf16.msrb.mxu3 %v10126_v48 }
 0x446   :  { %v3993_v61 = vadd.f32 %v3992_v27, %v3979_v58  ;;  %v6959_v27 = vld [vmem:[%s10303_s9 + $0xb0] sm:$0xff] }
 0x448   :  { %v4110_v53 = vpack.c.bf16 %v3993_v61, %v3991_v20  ;;  %v4032_v59 = vpop.f32.mrf.mxu3  ;;  %v6957_v61 = vld [vmem:[%s10303_s9 + $0xa0] sm:$0xff] }
 0x449   :  { %v4018_v36 = vpop.f32.mrf.mxu2  ;;  %4445 = vmatpush.bf16.msrb.mxu3 %v10137_v55 }
 0x44a   :  { %4152 = vmatpush.bf16.msra.mxu0 %v4110_v53  ;;  %v4019_v60 = vadd.f32 %v4018_v36, %v4004_v25 }
 0x44c   :  { %v4033_v38 = vadd.f32 %v4032_v59, %v4019_v60  ;;  %v4060_v41 = vpop.f32.mrf.mxu0  ;;  %v6956_v59 = vld [vmem:[%s10303_s9 + $0x98] sm:$0xff] }
 0x44d   :  { %6405 = vmatmul.msk.bf16.vlgmr.msra.gmra.mxu0 %vm3126_vm6, %v10097_v46  ;;  %4446 = vmatpush.bf16.msrb.mxu3 %v10149_v42 }
 0x44e   :  { %v4047_v47 = vadd.f32 %v4046_v43, %v4033_v38  ;;  %4456 = vmatpush.bf16.msrb.mxu0 %v6952_v63  ;;  %v6955_v38 = vld [vmem:[%s10303_s9 + $0x90] sm:$0xff] }
 0x450   :  { %v4034_v2 = vpop.f32.mrf.mxu3 }
 0x451   :  { %v4020_v6 = vpop.f32.mrf.mxu2  ;;  %4447 = vmatpush.bf16.msrb.mxu3 %v10166_v15 }
 0x452   :  { %v4021_v19 = vadd.f32 %v4020_v6, %v4006_v40  ;;  %4457 = vmatpush.bf16.msrb.mxu0 %v6951_v5 }
 0x454   :  { %v4035_v7 = vadd.f32 %v4034_v2, %v4021_v19  ;;  %v4062_v9 = vpop.f32.mrf.mxu0 }
 0x455   :  { %4448 = vmatpush.bf16.msrb.mxu3 %v10177_v49 }
 0x456   :  { %v4049_v18 = vadd.f32 %v4048_v14, %v4035_v7  ;;  %4458 = vmatpush.bf16.msrb.mxu0 %v10131_v33 }
 0x458   :  { %v4111_v54 = vpack.c.bf16 %v4049_v18, %v4047_v47  ;;  %v4102_v23 = vpop.f32.mrf.mxu3  ;;  %v6954_v47 = vld [vmem:[%s10303_s9 + $0x88] sm:$0xff] }
 0x459   :  { %4449 = vmatpush.bf16.msrb.mxu3 %v10194_v31 }
 0x45a   :  { %4166 = vmatpush.bf16.msrb.mxu1 %v4111_v54  ;;  %4459 = vmatpush.bf16.msrb.mxu0 %v10143_v39 }
 0x45d   :  { %6406 = vmatmul.msk.bf16.vlgmr.msrb.gmra.mxu1 %vm3126_vm6, %v10097_v46  ;;  %v4074_v22 = vpop.f32.mrf.mxu1  ;;  %4537 = vmatpush.bf16.msra.mxu3 %v6952_v63  ;;  %v4117_v63 = vperm.slane %v10161_v56, 2 }
 0x45e   :  { %v4075_v37 = vadd.f32 %v4074_v22, %v4060_v41  ;;  %4460 = vmatpush.bf16.msrb.mxu0 %v6948_v44  ;;  %4470 = vmatpush.bf16.msra.mxu1 %v6960_v13 }
 0x460   :  { %v4104_v21 = vpop.f32.mrf.mxu3 }
 0x461   :  { %4538 = vmatpush.bf16.msra.mxu3 %v6951_v5 }
 0x462   :  { %4461 = vmatpush.bf16.msrb.mxu0 %v10172_v29  ;;  %4471 = vmatpush.bf16.msra.mxu1 %v6959_v27 }
 0x465   :  { %v4076_v57 = vpop.f32.mrf.mxu1  ;;  %4539 = vmatpush.bf16.msra.mxu3 %v10131_v33 }
 0x466   :  { %v4077_v62 = vadd.f32 %v4076_v57, %v4062_v9  ;;  %4462 = vmatpush.bf16.msrb.mxu0 %v10184_v0  ;;  %4472 = vmatpush.bf16.msra.mxu1 %v6958_v8  ;;  %v6953_v57 = vld [vmem:[%s10303_s9 + $0x80] sm:$0xff] }
 0x469   :  { %v4088_v34 = vpop.f32.mrf.mxu2  ;;  %4540 = vmatpush.bf16.msra.mxu3 %v10143_v39 }
 0x46a   :  { %v4089_v52 = vadd.f32 %v4088_v34, %v4075_v37  ;;  %4473 = vmatpush.bf16.msra.mxu1 %v6957_v61 }
 0x46c   :  { %v4103_v4 = vadd.f32 %v4102_v23, %v4089_v52 }
 0x46d   :  { %4541 = vmatpush.bf16.msra.mxu3 %v6948_v44 }
 0x46e   :  { %4474 = vmatpush.bf16.msra.mxu1 %v6956_v59 }
 0x471   :  { %v4090_v35 = vpop.f32.mrf.mxu2  ;;  %4542 = vmatpush.bf16.msra.mxu3 %v10172_v29  ;;  %v6961_v29 = vld [vmem:[%s10303_s9 + $0xc0] sm:$0xff] }
 0x472   :  { %v4091_v17 = vadd.f32 %v4090_v35, %v4077_v62  ;;  %4475 = vmatpush.bf16.msra.mxu1 %v6955_v38 }
 0x474   :  { %v4105_v50 = vadd.f32 %v4104_v21, %v4091_v17 }
 0x475   :  { %4543 = vmatpush.bf16.msra.mxu3 %v10184_v0 }
 0x476   :  { %v4112_v30 = vpack.c.bf16 %v4105_v50, %v4103_v4  ;;  %4476 = vmatpush.bf16.msra.mxu1 %v6954_v47 }
 0x478   :  { %4180 = vmatpush.bf16.msra.mxu2 %v4112_v30 }
 0x47a   :  { %4477 = vmatpush.bf16.msra.mxu1 %v6953_v57 }
 0x47b   :  { %6407 = vmatmul.msk.bf16.vlgmr.msra.gmra.mxu2 %vm3126_vm6, %v10097_v46  ;;  %v10200_v46 = vld [vmem:[%s10303_s9 + $0x40] sm:$0xff] }
 0x47c   :  { %4463 = vmatpush.bf16.msrb.mxu0 %v10200_v46  ;;  %4544 = vmatpush.bf16.msra.mxu3 %v10200_v46 }
 0x47d   :  { %4491 = vmatpush.bf16.msrb.mxu2 %v6961_v29 }
 0x47e   :  { %4572 = vmatpush.bf16.msrb.mxu1 %v6961_v29 }
 0x480   :  { %4551 = vmatpush.bf16.msra.mxu0 %v6960_v13 }
 0x481   :  { %4523 = vmatpush.bf16.msra.mxu2 %v10106_v26 }
 0x484   :  { %4552 = vmatpush.bf16.msra.mxu0 %v6959_v27 }
 0x485   :  { %4524 = vmatpush.bf16.msra.mxu2 %v10115_v32  ;;  %v4118_v32 = vperm.slane %v10161_v56, 3 }
 0x488   :  { %4553 = vmatpush.bf16.msra.mxu0 %v6958_v8 }
 0x489   :  { %4525 = vmatpush.bf16.msra.mxu2 %v10126_v48 }
 0x48c   :  { %4554 = vmatpush.bf16.msra.mxu0 %v6957_v61 }
 0x48d   :  { %4526 = vmatpush.bf16.msra.mxu2 %v10137_v55 }
 0x490   :  { %4555 = vmatpush.bf16.msra.mxu0 %v6956_v59 }
 0x491   :  { %4527 = vmatpush.bf16.msra.mxu2 %v10149_v42 }
 0x494   :  { %4556 = vmatpush.bf16.msra.mxu0 %v6955_v38 }
 0x495   :  { %4528 = vmatpush.bf16.msra.mxu2 %v10166_v15 }
 0x498   :  { %4557 = vmatpush.bf16.msra.mxu0 %v6954_v47 }
 0x499   :  { %4529 = vmatpush.bf16.msra.mxu2 %v10177_v49 }
 0x49c   :  { %4558 = vmatpush.bf16.msra.mxu0 %v6953_v57 }
 0x49d   :  { %4530 = vmatpush.bf16.msra.mxu2 %v10194_v31 }
 0x4bf   :  { %v4140_v10 = vpop.f32.mrf.mxu3 }
 0x4c0   :  { %v4141_v12 = vadd.f32 %v4140_v10, %v4115_v1 }
 0x4c2   :  { %v4195_v28 = vmin.f32 %v4141_v12, 0.0  ;;  %vm4187_vm13 = vcmp.gt.f32.partialorder %v4141_v12, 0.0 }
 0x4c4   :  { %v4203_v24 = vmul.f32 1.442695, %v4195_v28 }
 0x4c6   :  { %7001 = vpow2.f32 %v4203_v24 }
 0x4c7   :  { %v4142_v16 = vpop.f32.mrf.mxu3 }
 0x4c8   :  { %v4143_v3 = vadd.f32 %v4142_v16, %v4115_v1 }
 0x4ca   :  { %v4154_v51 = vpop.f32.mrf.mxu0  ;;  %v4199_v45 = vmin.f32 %v4143_v3, 0.0  ;;  %vm4191_vm14 = vcmp.gt.f32.partialorder %v4143_v3, 0.0 }
 0x4cb   :  { %v4155_v58 = vadd.f32 %v4154_v51, %v4116_v11 }
 0x4cc   :  { %v4211_v20 = vmul.f32 1.442695, %v4199_v45  ;;  %v7002_v53 = vpop.eup %7001 }
 0x4cd   :  { %v4196_v25 = vmin.f32 %v4155_v58, 0.0  ;;  %v6408_v43 = vadd.f32 -1.0, %v7002_v53  ;;  %vm4188_vm15 = vcmp.gt.f32.partialorder %v4155_v58, 0.0 }
 0x4ce   :  { %7003 = vpow2.f32 %v4211_v20 }
 0x4cf   :  { %v4205_v36 = vmul.f32 1.442695, %v4196_v25  ;;  %v4227_v19 = vsel %vm4187_vm13, %v4141_v12, %v6408_v43 }
 0x4d0   :  { %v10221_v14 = vmul.f32 %v4227_v19, %v4227_v19 }
 0x4d1   :  { %7005 = vpow2.f32 %v4205_v36 }
 0x4d2   :  { %v4156_v60 = vpop.f32.mrf.mxu0 }
 0x4d3   :  { %v4157_v40 = vadd.f32 %v4156_v60, %v4116_v11 }
 0x4d4   :  { %v7004_v6 = vpop.eup %7003 }
 0x4d5   :  { %v6412_v2 = vadd.f32 -1.0, %v7004_v6  ;;  %v4200_v7 = vmin.f32 %v4157_v40, 0.0  ;;  %vm4192_vm0 = vcmp.gt.f32.partialorder %v4157_v40, 0.0 }
 0x4d7   :  { %v4231_v18 = vsel %vm4191_vm14, %v4143_v3, %v6412_v2  ;;  %v4213_v54 = vmul.f32 1.442695, %v4200_v7  ;;  %v7006_v22 = vpop.eup %7005 }
 0x4d8   :  { %v4285_v5 = vpack.c.bf16 %v4231_v18, %v4227_v19  ;;  %v10227_v33 = vmul.f32 %v4231_v18, %v4231_v18  ;;  %v6409_v34 = vadd.f32 -1.0, %v7006_v22 }
 0x4d9   :  { %7007 = vpow2.f32 %v4213_v54 }
 0x4da   :  { %v4516_v41 = vpack.c.bf16 %v10227_v33, %v10221_v14  ;;  %v4168_v39 = vpop.f32.mrf.mxu1  ;;  %4450 = vmatmul.bf16.vlgmr.msrb.gmra.mxu3 %v4285_v5  ;;  %v4228_v52 = vsel %vm4188_vm15, %v4155_v58, %v6409_v34 }
 0x4db   :  { %v4169_v23 = vadd.f32 %v4168_v39, %v4117_v63  ;;  %v4509_v17 = vmul.f32 %v4228_v52, %v4228_v52 }
 0x4dd   :  { %v4197_v37 = vmin.f32 %v4169_v23, 0.0  ;;  %vm4189_vm3 = vcmp.gt.f32.partialorder %v4169_v23, 0.0 }
 0x4df   :  { %v7008_v9 = vpop.eup %7007  ;;  %v4207_v62 = vmul.f32 1.442695, %v4197_v37 }
 0x4e0   :  { %v6413_v35 = vadd.f32 -1.0, %v7008_v9 }
 0x4e1   :  { %7009 = vpow2.f32 %v4207_v62 }
 0x4e2   :  { %v4232_v21 = vsel %vm4192_vm0, %v4157_v40, %v6413_v35  ;;  %v4170_v4 = vpop.f32.mrf.mxu1 }
 0x4e3   :  { %v4286_v50 = vpack.c.bf16 %v4232_v21, %v4228_v52  ;;  %v4513_v30 = vmul.f32 %v4232_v21, %v4232_v21  ;;  %v4171_v44 = vadd.f32 %v4170_v4, %v4117_v63 }
 0x4e5   :  { %v4201_v1 = vmin.f32 %v4171_v44, 0.0  ;;  %4464 = vmatmul.bf16.vlgmr.msrb.gmra.mxu0 %v4286_v50  ;;  %v4517_v0 = vpack.c.bf16 %v4513_v30, %v4509_v17  ;;  %vm4193_vm4 = vcmp.gt.f32.partialorder %v4171_v44, 0.0 }
 0x4e7   :  { %v4215_v10 = vmul.f32 1.442695, %v4201_v1  ;;  %v7010_v12 = vpop.eup %7009 }
 0x4e8   :  { %v6410_v13 = vadd.f32 -1.0, %v7010_v12 }
 0x4e9   :  { %7011 = vpow2.f32 %v4215_v10 }
 0x4ea   :  { %4545 = vmatmul.bf16.vlgmr.msra.gmra.mxu3 %v4517_v0  ;;  %v4229_v46 = vsel %vm4189_vm3, %v4169_v23, %v6410_v13 }
 0x4eb   :  { %v4510_v27 = vmul.f32 %v4229_v46, %v4229_v46 }
 0x4ef   :  { %v7012_v28 = vpop.eup %7011 }
 0x4f0   :  { %v6414_v24 = vadd.f32 -1.0, %v7012_v28 }
 0x4f2   :  { %v4233_v11 = vsel %vm4193_vm4, %v4171_v44, %v6414_v24 }
 0x4f3   :  { %v4287_v16 = vpack.c.bf16 %v4233_v11, %v4229_v46  ;;  %v4514_v3 = vmul.f32 %v4233_v11, %v4233_v11 }
 0x4f5   :  { %v4518_v26 = vpack.c.bf16 %v4514_v3, %v4510_v27  ;;  %4478 = vmatmul.bf16.vlgmr.msra.gmra.mxu1 %v4287_v16  ;;  %v4618_v3 = vld [vmem:[%s10305_s11 + $0x8] sm:$0x3] }
 0x4f7   :  { %4559 = vmatmul.bf16.vlgmr.msra.gmra.mxu0 %v4518_v26 }
 0x4fe   :  { %v4182_v8 = vpop.f32.mrf.mxu2 }
 0x4ff   :  { %v4183_v51 = vadd.f32 %v4182_v8, %v4118_v32 }
 0x501   :  { %v4198_v48 = vmin.f32 %v4183_v51, 0.0  ;;  %vm4190_vm5 = vcmp.gt.f32.partialorder %v4183_v51, 0.0 }
 0x503   :  { %v4209_v45 = vmul.f32 1.442695, %v4198_v48 }
 0x505   :  { %7013 = vpow2.f32 %v4209_v45 }
 0x506   :  { %v4184_v58 = vpop.f32.mrf.mxu2 }
 0x507   :  { %v4185_v55 = vadd.f32 %v4184_v58, %v4118_v32  ;;  %v4625_v32 = vunpack.c.l.b16 %v4618_v3 }
 0x509   :  { %v4202_v20 = vmin.f32 %v4185_v55, 0.0  ;;  %vm4194_vm7 = vcmp.gt.f32.partialorder %v4185_v55, 0.0  ;;  %v4627_v48 = vpack.c.b16 %v4625_v32, %v4625_v32 }
 0x50b   :  { %v4217_v61 = vmul.f32 1.442695, %v4202_v20  ;;  %v7014_v25 = vpop.eup %7013  ;;  %v4633_v58 = vsel %vm2769_vm2, %v4627_v48, 0 }
 0x50c   :  { %v6411_v42 = vadd.f32 -1.0, %v7014_v25  ;;  %4641 = vmatpush.bf16.msra.mxu1 %v4633_v58 }
 0x50d   :  { %7015 = vpow2.f32 %v4217_v61 }
 0x50e   :  { %v4230_v56 = vsel %vm4190_vm5, %v4183_v51, %v6411_v42 }
 0x50f   :  { %v4511_v59 = vmul.f32 %v4230_v56, %v4230_v56 }
 0x513   :  { %v7016_v53 = vpop.eup %7015 }
 0x514   :  { %v6415_v36 = vadd.f32 -1.0, %v7016_v53 }
 0x516   :  { %v4234_v15 = vsel %vm4194_vm7, %v4185_v55, %v6415_v36  ;;  %v6962_v55 = vld [vmem:[%s10305_s11] sm:$0xff] }
 0x517   :  { %v4288_v43 = vpack.c.bf16 %v4234_v15, %v4230_v56  ;;  %v4515_v49 = vmul.f32 %v4234_v15, %v4234_v15  ;;  %4642 = vmatpush.bf16.msra.mxu1 %v6962_v55 }
 0x519   :  { %v4519_v60 = vpack.c.bf16 %v4515_v49, %v4511_v59  ;;  %6516 = vmatmul.msk.bf16.vlgmr.msrb.gmra.mxu2 %vm3126_vm6, %v4288_v43 }
 0x51b   :  { %6517 = vmatmul.msk.bf16.vlgmr.msrb.gmra.mxu1 %vm3126_vm6, %v4519_v60  ;;  %v4592_v60 = vld [vmem:[%s10304_s10 + $0x2] sm:$0x1] }
 0x529   :  { %4531 = vmatmul.bf16.vlgmr.msra.gmra.mxu2 %v4516_v41 }
 0x55d   :  { %v4451_v40 = vpop.f32.mrf.mxu3 }
 0x562   :  { %v4465_v31 = vpop.f32.mrf.mxu0 }
 0x563   :  { %v4466_v7 = vadd.f32 %v4465_v31, %v4451_v40 }
 0x565   :  { %v4453_v2 = vpop.f32.mrf.mxu3 }
 0x56a   :  { %v4467_v19 = vpop.f32.mrf.mxu0 }
 0x56b   :  { %v4468_v47 = vadd.f32 %v4467_v19, %v4453_v2 }
 0x56d   :  { %v4546_v14 = vpop.f32.mrf.mxu3 }
 0x572   :  { %v4479_v6 = vpop.f32.mrf.mxu1 }
 0x573   :  { %v4480_v54 = vadd.f32 %v4479_v6, %v4466_v7  ;;  %v4605_v6 = vld [vmem:[%s10304_s10 + $0x3] sm:$0x1] }
 0x574   :  { %v4560_v41 = vpop.f32.mrf.mxu0 }
 0x575   :  { %v4548_v17 = vpop.f32.mrf.mxu3 }
 0x57a   :  { %v4481_v18 = vpop.f32.mrf.mxu1 }
 0x57b   :  { %v4482_v63 = vadd.f32 %v4481_v18, %v4468_v47 }
 0x57c   :  { %v4562_v50 = vpop.f32.mrf.mxu0 }
 0x598   :  { %v4574_v37 = vpop.f32.mrf.mxu1 }
 0x59c   :  { %v4493_v38 = vpop.f32.mrf.mxu2 }
 0x59d   :  { %v4494_v22 = vadd.f32 %v4493_v38, %v4480_v54 }
 0x59f   :  { %v4498_v34 = vsel %vm975_vm1, %v4494_v22, 0.0  ;;  %v4608_v2 = vmul.f32 0.05, %v4494_v22  ;;  %v6963_v22 = vld [vmem:[%s10308_s14] sm:$0xff] }
 0x5a0   :  { %v4576_v1 = vpop.f32.mrf.mxu1 }
 0x5a4   :  { %v4495_v5 = vpop.f32.mrf.mxu2 }
 0x5a5   :  { %v4496_v39 = vadd.f32 %v4495_v5, %v4482_v63 }
 0x5a7   :  { %v4499_v23 = vsel %vm975_vm1, %v4496_v39, 0.0  ;;  %v4609_v7 = vmul.f32 0.05, %v4496_v39 }
 0x5a8   :  { %v4500_v33 = vadd.f32 %v4499_v23, %v4498_v34 }
 0x5aa   :  { %v4501_v9 = vrot.slane %v4500_v33, 4 }
 0x5ac   :  { %v4532_v57 = vpop.f32.mrf.mxu2  ;;  %v4502_v52 = vadd.f32 %v4501_v9, %v4500_v33  ;;  %v4650_v9 = vld [vmem:[%s10306_s12 + $0x8] sm:$0xff] }
 0x5ad   :  { %v4547_v62 = vadd.f32 %v4546_v14, %v4532_v57  ;;  %v4655_v14 = vld [vmem:[%s10308_s14 + $0x8] sm:$0xf] }
 0x5ae   :  { %v4503_v30 = vrot.slane %v4502_v52, 2  ;;  %v4662_v33 = vunpack.c.l.b16 %v4655_v14 }
 0x5af   :  { %v4561_v35 = vadd.f32 %v4560_v41, %v4547_v62 }
 0x5b0   :  { %v4504_v10 = vadd.f32 %v4503_v30, %v4502_v52  ;;  %v4664_v41 = vpack.c.b16 %v4662_v33, %v4662_v33  ;;  %v4688_v30 = vld [vmem:[%s10307_s13] sm:$0x1] }
 0x5b1   :  { %v4575_v44 = vadd.f32 %v4574_v37, %v4561_v35  ;;  %v4649_v37 = vld [vmem:[%s10306_s12] sm:$0xff]  ;;  %s7046_s12 = smov [#allocation2]  }
 0x5b2   :  { %v4505_v46 = vrot.slane %v4504_v10, 1  ;;  %v4672_v57 = vsel %vm4670_vm10, %v4664_v41, 0  ;;  %s4717_s7 = sshll.u32 %s7046_s12, 4  ;;  %s4718_s7 = int_to_ptr.vmem [resolvable:$true] %s4717_s7 }
 0x5b3   :  { %v4579_v12 = vsel %vm975_vm1, %v4575_v44, 0.0  ;;  %4680 = vmatpush.bf16.msrb.mxu2 %v4672_v57  ;;  %v6966_v44 = vld [vmem:[%s10309_s15] ss:$0 sm:$0xff] }
 0x5b4   :  { %v4534_v21 = vpop.f32.mrf.mxu2  ;;  %v4506_v11 = vadd.f32 %v4505_v46, %v4504_v10 }
 0x5b5   :  { %v4549_v4 = vadd.f32 %v4548_v17, %v4534_v21 }
 0x5b6   :  { %v4507_v8 = vmul.f32 0.003125, %v4506_v11 }
 0x5b7   :  { %v4563_v29 = vadd.f32 %v4562_v50, %v4549_v4  ;;  %4681 = vmatpush.bf16.msrb.mxu2 %v6963_v22 }
 0x5b8   :  { %v4589_v20 = vmul.f32 %v4507_v8, %v4507_v8 }
 0x5b9   :  { %v4577_v0 = vadd.f32 %v4576_v1, %v4563_v29 }
 0x5bb   :  { %v4580_v13 = vsel %vm975_vm1, %v4577_v0, 0.0 }
 0x5bc   :  { %v4581_v28 = vadd.f32 %v4580_v13, %v4579_v12 }
 0x5be   :  { %v4582_v24 = vrot.slane %v4581_v28, 4 }
 0x5c0   :  { %v4583_v27 = vadd.f32 %v4582_v24, %v4581_v28 }
 0x5c2   :  { %v4584_v16 = vrot.slane %v4583_v27, 2 }
 0x5c4   :  { %v4585_v26 = vadd.f32 %v4584_v16, %v4583_v27 }
 0x5c6   :  { %v4586_v51 = vrot.slane %v4585_v26, 1 }
 0x5c8   :  { %v4587_v45 = vadd.f32 %v4586_v51, %v4585_v26 }
 0x5ca   :  { %v4588_v61 = vmul.f32 0.003125, %v4587_v45 }
 0x5cc   :  { %v4590_v25 = vsub.f32 %v4588_v61, %v4589_v20 }
 0x5ce   :  { %v4591_v42 = vmax.f32 %v4590_v25, 0.0 }
 0x5d0   :  { %v4593_v53 = vadd.f32 1e-05, %v4591_v42 }
 0x5d2   :  { %7017 = vrsqrt.f32 %v4593_v53  ;;  %vm4600_vm2 = vweird.f32 %v4593_v53 }
 0x5d8   :  { %v7018_v56 = vpop.eup %7017 }
 0x5d9   :  { %v4595_v36 = vmul.f32 %v7018_v56, %v4593_v53  ;;  %vm4601_vm8 = vweird.f32 %v7018_v56 }
 0x5da   :  { %vm4602_vm9 = vmor %vm4600_vm2, %vm4601_vm8 }
 0x5db   :  { %v4596_v15 = vmul.f32 %v7018_v56, %v4595_v36 }
 0x5dd   :  { %v4597_v59 = vmul.f32 0.5, %v4596_v15 }
 0x5df   :  { %v4598_v43 = vsub.f32 1.5, %v4597_v59 }
 0x5e1   :  { %v4599_v49 = vmul.f32 %v7018_v56, %v4598_v43 }
 0x5e3   :  { %v4603_v31 = vsel %vm4602_vm9, %v7018_v56, %v4599_v49 }
 0x5e4   :  { %v4604_v40 = vmul.f32 %v4603_v31, %v4592_v60 }
 0x5e6   :  { %v4606_v38 = vmul.f32 %v4604_v40, %v4507_v8  ;;  %v4610_v19 = vperm.slane %v4604_v40, 0 }
 0x5e8   :  { %v4607_v47 = vsub.f32 %v4605_v6, %v4606_v38  ;;  %v4611_v18 = vmul.f32 %v4610_v19, %v4608_v2  ;;  %v4612_v54 = vmul.f32 %v4610_v19, %v4609_v7 }
 0x5ea   :  { %v4613_v63 = vperm.slane %v4607_v47, 0 }
 0x5ec   :  { %v4614_v5 = vadd.f32 %v4613_v63, %v4611_v18  ;;  %v4615_v23 = vadd.f32 %v4613_v63, %v4612_v54 }
 0x5ee   :  { %v4619_v34 = vpack.c.bf16 %v4615_v23, %v4614_v5 }
 0x5f0   :  { %6522 = vmatmul.msk.bf16.vlgmr.msra.gmra.mxu1 %vm975_vm1, %v4619_v34  ;;  %vm4666_vm1 = vcmask 195584  }
 0x66d   :  { %v4644_v39 = vpop.f32.mrf.mxu1 }
 0x66e   :  { %v4651_v52 = vmul.f32 %v4649_v37, %v4644_v39 }
 0x675   :  { %v4646_v62 = vpop.f32.mrf.mxu1 }
 0x676   :  { %v4652_v35 = vmul.f32 %v4650_v9, %v4646_v62 }
 0x678   :  { %v4656_v17 = vpack.c.bf16 %v4652_v35, %v4651_v52 }
 0x67a   :  { %6527 = vmatmul.msk.bf16.vlgmr.msrb.gmra.mxu2 %vm4666_vm1, %v4656_v17 }
 0x6fd   :  { %v4683_v21 = vpop.f32.mrf.mxu2 }
 0x705   :  { %v4685_v4 = vpop.f32.mrf.mxu2 }
 0x706   :  { %v4689_v50 = vpack.c.bf16 %v4685_v4, %v4683_v21 }
 0x708   :  { %4704 = vmatpush.bf16.msrb.mxu3 %v4689_v50 }
 0x70b   :  { %6528 = vmatmul.msk.bf16.vlgmr.msrb.gmra.mxu3 %vm3126_vm6, %v4688_v30 }
 0x78e   :  { %v4706_v29 = vpop.f32.mrf.mxu3 }
 0x78f   :  { %v4707_v1 = vadd.f32 %v6966_v44, %v4706_v29 }
 0x791   :  { %4711 = vst.msk [vmem:[#allocation2] sm:$0x3] %vm4710_vm11, %v4707_v1 }
 0x792   :  { %4722 = dma.vmem_to_hbm [thread:$0]  %s4718_s7, 32, %s4720_s0, [#allocation3]  }
 0x796   :  { %v4708_v0 = vpop.f32.mrf.mxu3 }
 0x797   :  { %7043 = dma.done.wait [#allocation3], 32  }
 0x798   :  { %7044 = vsyncadd [#allocation3], 4294967264 }
 0x799   :  { %4727 = vsyncpa [#allocation3], 1 }

</bundles_post_ra>
